<compile_context>
chip_gen: v6e
topology: v6e:2x2x1
jax: 0.10.0
libtpu: 0.0.40
codegen_flags: <defaults>
</compile_context>

<pallas_src>
import numpy as np
import jax
import jax.numpy as jnp
from jax.experimental import pallas as pl
from jax.experimental.pallas import tpu as pltpu

# ----- config mirroring the argparse hyper-parameters of the original module -
N_CLASSES = 10
CHANNELS = 1          # emb.view(B, channels, H, W) with Embedding dim H*H forces channels == 1
IMG_SIZE = 16         # must be divisible by 2**4
BATCH = 2
K, S, P = 4, 2, 1     # conv kernel / stride / padding
LRELU_SLOPE = 0.2
BN_EPS = 0.8          # nn.BatchNorm2d(out_features, 0.8): 2nd positional arg is eps
FC_PAD = 128          # pad final Linear N=1 -> 128 for a lane-dense HBM store


# ----------------------------- fused Pallas kernel ----------------------------
def _fused_disc_kernel(x_ref,
                       m1, b1, s1, m2, b2, s2, m3, b3, s3, m4, b4, s4,
                       fcw, fcb, o_ref):
    def conv_block(x, m_ref, b_ref, s_ref):
        # conv (as dense matmul on NHWC-flat activation) + bias + LeakyReLU(0.2)
        # + BatchNorm2d eval shift (BN scale already folded into m/b).
        y = jnp.dot(x, m_ref[...], preferred_element_type=jnp.float32)
        y = y + b_ref[...]
        y = jnp.where(y >= 0.0, y, LRELU_SLOPE * y)
        return y + s_ref[...]

    x = x_ref[...]                                   # (B, H*W*(C+1)) f32
    x = conv_block(x, m1, b1, s1)                    # (B, 8*8*16)  = (B, 1024)
    x = conv_block(x, m2, b2, s2)                    # (B, 4*4*32)  = (B, 512)
    x = conv_block(x, m3, b3, s3)                    # (B, 2*2*64)  = (B, 256)
    x = conv_block(x, m4, b4, s4)                    # (B, 1*1*128) = (B, 128)
    y = jnp.dot(x, fcw[...], preferred_element_type=jnp.float32) + fcb[...]
    o_ref[...] = 1.0 / (1.0 + jnp.exp(-y))           # Sigmoid (padded cols discarded)


def fused_discriminator_pallas(x_flat, blocks_fused, fcw_pad, fcb_pad):
    args = [x_flat]
    for m, b, s in blocks_fused:
        args += [m, b, s]
    args += [fcw_pad, fcb_pad]
    out = pl.pallas_call(
        _fused_disc_kernel,
        out_shape=jax.ShapeDtypeStruct((BATCH, FC_PAD), jnp.float32),
        # no grid: single invocation, whole operands resident in VMEM
        in_specs=[pl.BlockSpec(memory_space=pltpu.MemorySpace.VMEM) for _ in args],
        out_specs=pl.BlockSpec(memory_space=pltpu.MemorySpace.VMEM),
    )(*args)
    return out[:, :1]                                # real Linear output is column 0


# ------------------- host-side conv -> dense-matmul lowering ------------------
def conv_as_dense(w_hwio, Hi, Wi):
    # Build M with M[(h*Wi+w)*Ci + ci, (oh*Wo+ow)*Co + co] = W[kh, kw, ci, co]
    # where h = oh*S + kh - P, w = ow*S + kw - P (zero rows implement padding).
    Kh, Kw, Ci, Co = w_hwio.shape
    Ho = (Hi + 2 * P - K) // S + 1
    Wo = (Wi + 2 * P - K) // S + 1
    M = np.zeros((Hi * Wi * Ci, Ho * Wo * Co), np.float32)
    w = np.asarray(w_hwio, np.float32)
    for oh in range(Ho):
        for ow in range(Wo):
            ob = (oh * Wo + ow) * Co
            for kh in range(K):
                h = oh * S + kh - P
                if h < 0 or h >= Hi:
                    continue
                for kw in range(K):
                    ww = ow * S + kw - P
                    if ww < 0 or ww >= Wi:
                        continue
                    ib = (h * Wi + ww) * Ci
                    M[ib:ib + Ci, ob:ob + Co] = w[kh, kw]
    return jnp.asarray(M), Ho, Wo


# --------------------------------- params -------------------------------------
def init_params(key):
    keys = jax.random.split(key, 12)
    chans = [CHANNELS + 1, 16, 32, 64, 128]
    spatial = [IMG_SIZE, IMG_SIZE // 2, IMG_SIZE // 4, IMG_SIZE // 8]
    blocks_fused = []   # (dense M with BN scale folded, bias_flat, shift_flat)
    blocks_ref = []     # raw params for the pure-JAX reference path
    for li in range(4):
        cin, cout = chans[li], chans[li + 1]
        Hi = spatial[li]
        w = jax.random.normal(keys[2 * li], (K, K, cin, cout), jnp.float32) * 0.05
        b = jax.random.normal(keys[2 * li + 1], (cout,), jnp.float32) * 0.05
        # BatchNorm2d(cout, 0.8) eval mode, default init: gamma=1, beta=0, mean=0, var=1.
        gamma = jnp.ones((cout,), jnp.float32)
        beta = jnp.zeros((cout,), jnp.float32)
        r_mean = jnp.zeros((cout,), jnp.float32)
        r_var = jnp.ones((cout,), jnp.float32)
        scale = gamma / jnp.sqrt(r_var + BN_EPS)
        shift = beta - r_mean * scale
        # Fold BN scale into conv weight/bias: only valid because scale > 0
        # (LeakyReLU is positively homogeneous).
        assert bool(jnp.all(scale > 0.0)), "BN-scale fold requires scale > 0"
        M, Ho, Wo = conv_as_dense(np.asarray(w * scale[None, None, None, :]), Hi, Hi)
        bflat = jnp.tile(b * scale, Ho * Wo).reshape(1, Ho * Wo * cout)
        sflat = jnp.tile(shift, Ho * Wo).reshape(1, Ho * Wo * cout)
        blocks_fused.append((M, bflat, sflat))
        blocks_ref.append(dict(w=w.reshape(K * K * cin, cout), b=b, scale=scale, shift=shift))

    down = IMG_SIZE // 2 ** 4          # == 1, so NHWC/NCHW flatten orders coincide
    fc_in = 128 * down * down
    fc_w = jax.random.normal(keys[8], (fc_in, 1), jnp.float32) * 0.05
    fc_b = jnp.zeros((1,), jnp.float32)
    fcw_pad = jnp.zeros((fc_in, FC_PAD), jnp.float32).at[:, :1].set(fc_w)
    fcb_pad = jnp.zeros((1, FC_PAD), jnp.float32).at[0, 0].set(fc_b[0])
    emb_table = jax.random.normal(keys[9], (N_CLASSES, IMG_SIZE * IMG_SIZE), jnp.float32) * 0.1
    return dict(emb_table=emb_table, blocks_fused=blocks_fused, blocks_ref=blocks_ref,
                fc_w=fc_w, fc_b=fc_b, fcw_pad=fcw_pad, fcb_pad=fcb_pad)


# ------------------------------- forward passes --------------------------------
@jax.jit
def discriminator_forward(params, img_nchw, label):
    # nn.Embedding lookup + concat + NHWC flatten: cheap XLA glue before the kernel.
    emb = params["emb_table"][label].reshape(BATCH, CHANNELS, IMG_SIZE, IMG_SIZE)
    x = jnp.concatenate([img_nchw, emb], axis=1)                  # (B, C+1, H, W)
    x = jnp.transpose(x, (0, 2, 3, 1)).reshape(BATCH, -1)         # NHWC flat (B, H*W*(C+1))
    # TODO(synk): Dropout2d(0.4) is identity in eval mode; training-mode channel
    # dropout / BatchNorm batch-statistics updates are not reproduced.
    return fused_discriminator_pallas(x, params["blocks_fused"],
                                      params["fcw_pad"], params["fcb_pad"])


def _im2col(x):
    # x: (B, H, W, C) NHWC -> (B*Ho*Wo, K*K*C); col index = (kh*K + kw)*C + c.
    B, H, W, C = x.shape
    xp = jnp.pad(x, ((0, 0), (P, P), (P, P), (0, 0)))
    Ho = (H + 2 * P - K) // S + 1
    Wo = (W + 2 * P - K) // S + 1
    cols = []
    for i in range(K):
        for j in range(K):
            cols.append(xp[:, i:i + S * Ho:S, j:j + S * Wo:S, :])
    patches = jnp.stack(cols, axis=3)                             # (B, Ho, Wo, K*K, C)
    return patches.reshape(B * Ho * Wo, K * K * C), (B, Ho, Wo)


def reference_forward(params, img_nchw, label):
    # Pure-JAX reference (im2col conv path, un-folded BN) mirroring torch op order.
    emb = params["emb_table"][label].reshape(BATCH, CHANNELS, IMG_SIZE, IMG_SIZE)
    x = jnp.transpose(jnp.concatenate([img_nchw, emb], axis=1), (0, 2, 3, 1))
    for blk in params["blocks_ref"]:
        patches, (B, Ho, Wo) = _im2col(x)
        y = patches @ blk["w"] + blk["b"][None]
        y = jnp.where(y >= 0.0, y, LRELU_SLOPE * y)
        y = y * blk["scale"][None] + blk["shift"][None]
        x = y.reshape(B, Ho, Wo, -1)
    flat = x.reshape(BATCH, -1)        # down_size == 1: matches torch .view order
    return jax.nn.sigmoid(flat @ params["fc_w"] + params["fc_b"][None])


if __name__ == "__main__":
    key = jax.random.PRNGKey(0)
    k_img, k_lbl, k_par = jax.random.split(key, 3)
    img = jax.random.normal(k_img, (BATCH, CHANNELS, IMG_SIZE, IMG_SIZE), jnp.float32)
    label = jax.random.randint(k_lbl, (BATCH,), 0, N_CLASSES)
    params = init_params(k_par)

    val = discriminator_forward(params, img, label)
    val = jax.block_until_ready(val)

    ref = reference_forward(params, img, label)
    assert val.shape == (BATCH, 1)
    assert jnp.allclose(val, ref, rtol=1e-3, atol=1e-3), (val, ref)
    print("KERNEL_OK")
</pallas_src>

<mosaic_0001>
module attributes {stable_mosaic.version = 11 : i64} {
  func.func @_fused_disc_kernel(%arg0: memref<2x512xf32, #tpu.memory_space<vmem>>, %arg1: memref<512x1024xf32, #tpu.memory_space<vmem>>, %arg2: memref<1x1024xf32, #tpu.memory_space<vmem>>, %arg3: memref<1x1024xf32, #tpu.memory_space<vmem>>, %arg4: memref<1024x512xf32, #tpu.memory_space<vmem>>, %arg5: memref<1x512xf32, #tpu.memory_space<vmem>>, %arg6: memref<1x512xf32, #tpu.memory_space<vmem>>, %arg7: memref<512x256xf32, #tpu.memory_space<vmem>>, %arg8: memref<1x256xf32, #tpu.memory_space<vmem>>, %arg9: memref<1x256xf32, #tpu.memory_space<vmem>>, %arg10: memref<256x128xf32, #tpu.memory_space<vmem>>, %arg11: memref<1x128xf32, #tpu.memory_space<vmem>>, %arg12: memref<1x128xf32, #tpu.memory_space<vmem>>, %arg13: memref<128x128xf32, #tpu.memory_space<vmem>>, %arg14: memref<1x128xf32, #tpu.memory_space<vmem>>, %arg15: memref<2x128xf32, #tpu.memory_space<vmem>>) attributes {dimension_semantics = [], scalar_prefetch = 0 : i64, scratch_operands = 0 : i64, tpu.core_type = #tpu.core_type<tc>} {
    %c0 = arith.constant 0 : index
    %c0_0 = arith.constant 0 : index
    %0 = vector.load %arg0[%c0, %c0_0] : memref<2x512xf32, #tpu.memory_space<vmem>>, vector<2x512xf32>
    %c0_1 = arith.constant 0 : index
    %c0_2 = arith.constant 0 : index
    %1 = vector.load %arg1[%c0_1, %c0_2] : memref<512x1024xf32, #tpu.memory_space<vmem>>, vector<512x1024xf32>
    %cst = arith.constant dense<0.000000e+00> : vector<2x1024xf32>
    %2 = tpu.matmul %0, %1, %cst {dimension_numbers = #tpu.dot_dimension_numbers<[1], [0], [0], [1], [0, 0, 1, 1], [], []>} : vector<2x512xf32>, vector<512x1024xf32>, vector<2x1024xf32> -> vector<2x1024xf32>
    %c0_3 = arith.constant 0 : index
    %c0_4 = arith.constant 0 : index
    %3 = vector.load %arg2[%c0_3, %c0_4] : memref<1x1024xf32, #tpu.memory_space<vmem>>, vector<1x1024xf32>
    %4 = vector.broadcast %3 : vector<1x1024xf32> to vector<2x1024xf32>
    %5 = arith.addf %2, %4 : vector<2x1024xf32>
    %cst_5 = arith.constant 0.000000e+00 : f32
    %6 = vector.broadcast %cst_5 : f32 to vector<2x1024xf32>
    %7 = arith.cmpf oge, %5, %6 : vector<2x1024xf32>
    %cst_6 = arith.constant 2.000000e-01 : f32
    %8 = vector.broadcast %cst_6 : f32 to vector<2x1024xf32>
    %9 = arith.mulf %8, %5 : vector<2x1024xf32>
    %10 = arith.select %7, %5, %9 : vector<2x1024xi1>, vector<2x1024xf32>
    %c0_7 = arith.constant 0 : index
    %c0_8 = arith.constant 0 : index
    %11 = vector.load %arg3[%c0_7, %c0_8] : memref<1x1024xf32, #tpu.memory_space<vmem>>, vector<1x1024xf32>
    %12 = vector.broadcast %11 : vector<1x1024xf32> to vector<2x1024xf32>
    %13 = arith.addf %10, %12 : vector<2x1024xf32>
    %c0_9 = arith.constant 0 : index
    %c0_10 = arith.constant 0 : index
    %14 = vector.load %arg4[%c0_9, %c0_10] : memref<1024x512xf32, #tpu.memory_space<vmem>>, vector<1024x512xf32>
    %cst_11 = arith.constant dense<0.000000e+00> : vector<2x512xf32>
    %15 = tpu.matmul %13, %14, %cst_11 {dimension_numbers = #tpu.dot_dimension_numbers<[1], [0], [0], [1], [0, 0, 1, 1], [], []>} : vector<2x1024xf32>, vector<1024x512xf32>, vector<2x512xf32> -> vector<2x512xf32>
    %c0_12 = arith.constant 0 : index
    %c0_13 = arith.constant 0 : index
    %16 = vector.load %arg5[%c0_12, %c0_13] : memref<1x512xf32, #tpu.memory_space<vmem>>, vector<1x512xf32>
    %17 = vector.broadcast %16 : vector<1x512xf32> to vector<2x512xf32>
    %18 = arith.addf %15, %17 : vector<2x512xf32>
    %cst_14 = arith.constant 0.000000e+00 : f32
    %19 = vector.broadcast %cst_14 : f32 to vector<2x512xf32>
    %20 = arith.cmpf oge, %18, %19 : vector<2x512xf32>
    %cst_15 = arith.constant 2.000000e-01 : f32
    %21 = vector.broadcast %cst_15 : f32 to vector<2x512xf32>
    %22 = arith.mulf %21, %18 : vector<2x512xf32>
    %23 = arith.select %20, %18, %22 : vector<2x512xi1>, vector<2x512xf32>
    %c0_16 = arith.constant 0 : index
    %c0_17 = arith.constant 0 : index
    %24 = vector.load %arg6[%c0_16, %c0_17] : memref<1x512xf32, #tpu.memory_space<vmem>>, vector<1x512xf32>
    %25 = vector.broadcast %24 : vector<1x512xf32> to vector<2x512xf32>
    %26 = arith.addf %23, %25 : vector<2x512xf32>
    %c0_18 = arith.constant 0 : index
    %c0_19 = arith.constant 0 : index
    %27 = vector.load %arg7[%c0_18, %c0_19] : memref<512x256xf32, #tpu.memory_space<vmem>>, vector<512x256xf32>
    %cst_20 = arith.constant dense<0.000000e+00> : vector<2x256xf32>
    %28 = tpu.matmul %26, %27, %cst_20 {dimension_numbers = #tpu.dot_dimension_numbers<[1], [0], [0], [1], [0, 0, 1, 1], [], []>} : vector<2x512xf32>, vector<512x256xf32>, vector<2x256xf32> -> vector<2x256xf32>
    %c0_21 = arith.constant 0 : index
    %c0_22 = arith.constant 0 : index
    %29 = vector.load %arg8[%c0_21, %c0_22] : memref<1x256xf32, #tpu.memory_space<vmem>>, vector<1x256xf32>
    %30 = vector.broadcast %29 : vector<1x256xf32> to vector<2x256xf32>
    %31 = arith.addf %28, %30 : vector<2x256xf32>
    %cst_23 = arith.constant 0.000000e+00 : f32
    %32 = vector.broadcast %cst_23 : f32 to vector<2x256xf32>
    %33 = arith.cmpf oge, %31, %32 : vector<2x256xf32>
    %cst_24 = arith.constant 2.000000e-01 : f32
    %34 = vector.broadcast %cst_24 : f32 to vector<2x256xf32>
    %35 = arith.mulf %34, %31 : vector<2x256xf32>
    %36 = arith.select %33, %31, %35 : vector<2x256xi1>, vector<2x256xf32>
    %c0_25 = arith.constant 0 : index
    %c0_26 = arith.constant 0 : index
    %37 = vector.load %arg9[%c0_25, %c0_26] : memref<1x256xf32, #tpu.memory_space<vmem>>, vector<1x256xf32>
    %38 = vector.broadcast %37 : vector<1x256xf32> to vector<2x256xf32>
    %39 = arith.addf %36, %38 : vector<2x256xf32>
    %c0_27 = arith.constant 0 : index
    %c0_28 = arith.constant 0 : index
    %40 = vector.load %arg10[%c0_27, %c0_28] : memref<256x128xf32, #tpu.memory_space<vmem>>, vector<256x128xf32>
    %cst_29 = arith.constant dense<0.000000e+00> : vector<2x128xf32>
    %41 = tpu.matmul %39, %40, %cst_29 {dimension_numbers = #tpu.dot_dimension_numbers<[1], [0], [0], [1], [0, 0, 1, 1], [], []>} : vector<2x256xf32>, vector<256x128xf32>, vector<2x128xf32> -> vector<2x128xf32>
    %c0_30 = arith.constant 0 : index
    %c0_31 = arith.constant 0 : index
    %42 = vector.load %arg11[%c0_30, %c0_31] : memref<1x128xf32, #tpu.memory_space<vmem>>, vector<1x128xf32>
    %43 = vector.broadcast %42 : vector<1x128xf32> to vector<2x128xf32>
    %44 = arith.addf %41, %43 : vector<2x128xf32>
    %cst_32 = arith.constant 0.000000e+00 : f32
    %45 = vector.broadcast %cst_32 : f32 to vector<2x128xf32>
    %46 = arith.cmpf oge, %44, %45 : vector<2x128xf32>
    %cst_33 = arith.constant 2.000000e-01 : f32
    %47 = vector.broadcast %cst_33 : f32 to vector<2x128xf32>
    %48 = arith.mulf %47, %44 : vector<2x128xf32>
    %49 = arith.select %46, %44, %48 : vector<2x128xi1>, vector<2x128xf32>
    %c0_34 = arith.constant 0 : index
    %c0_35 = arith.constant 0 : index
    %50 = vector.load %arg12[%c0_34, %c0_35] : memref<1x128xf32, #tpu.memory_space<vmem>>, vector<1x128xf32>
    %51 = vector.broadcast %50 : vector<1x128xf32> to vector<2x128xf32>
    %52 = arith.addf %49, %51 : vector<2x128xf32>
    %c0_36 = arith.constant 0 : index
    %c0_37 = arith.constant 0 : index
    %53 = vector.load %arg13[%c0_36, %c0_37] : memref<128x128xf32, #tpu.memory_space<vmem>>, vector<128x128xf32>
    %cst_38 = arith.constant dense<0.000000e+00> : vector<2x128xf32>
    %54 = tpu.matmul %52, %53, %cst_38 {dimension_numbers = #tpu.dot_dimension_numbers<[1], [0], [0], [1], [0, 0, 1, 1], [], []>} : vector<2x128xf32>, vector<128x128xf32>, vector<2x128xf32> -> vector<2x128xf32>
    %c0_39 = arith.constant 0 : index
    %c0_40 = arith.constant 0 : index
    %55 = vector.load %arg14[%c0_39, %c0_40] : memref<1x128xf32, #tpu.memory_space<vmem>>, vector<1x128xf32>
    %56 = vector.broadcast %55 : vector<1x128xf32> to vector<2x128xf32>
    %57 = arith.addf %54, %56 : vector<2x128xf32>
    %cst_41 = arith.constant 0.000000e+00 : f32
    %58 = vector.broadcast %cst_41 : f32 to vector<2x128xf32>
    %59 = arith.subf %58, %57 : vector<2x128xf32>
    %60 = math.exp %59 : vector<2x128xf32>
    %cst_42 = arith.constant 1.000000e+00 : f32
    %61 = vector.broadcast %cst_42 : f32 to vector<2x128xf32>
    %62 = arith.addf %61, %60 : vector<2x128xf32>
    %cst_43 = arith.constant 1.000000e+00 : f32
    %63 = vector.broadcast %cst_43 : f32 to vector<2x128xf32>
    %64 = arith.divf %63, %62 : vector<2x128xf32>
    %c0_44 = arith.constant 0 : index
    %c0_45 = arith.constant 0 : index
    %65 = vector.load %arg15[%c0_44, %c0_45] : memref<2x128xf32, #tpu.memory_space<vmem>>, vector<2x128xf32>
    tpu.vector_store %arg15[%c0_44, %c0_45], %64 {strides = array<i32>} : memref<2x128xf32, #tpu.memory_space<vmem>>, vector<2x128xf32>,
    return
  }
}

</mosaic_0001>

<bundles_post_ra>
// kernel: discriminator_forward.1
= control target key start
LH: loop header
LB: loop body
LE: loop exit
PB: predicated region body
PF: predicated region fallthrough
CT: control target
= control target key end

     0   :  { %20 = vsyncpa [#allocation3], 0  ;;  %s3855_s0 = inlined_call_operand.vmem [shape: f32[2,512], index: 0, kind: input, shape index: {}]   ;;  %s3856_s1 = inlined_call_operand.hbm [shape: f32[512,1024], index: 1, kind: input, shape index: {}]   ;;  %s3857_s2 = inlined_call_operand.hbm [shape: f32[1,1024], index: 2, kind: input, shape index: {}]   ;;  %s3858_s3 = inlined_call_operand.hbm [shape: f32[1,1024], index: 3, kind: input, shape index: {}]   ;;  %s3859_s4 = inlined_call_operand.hbm [shape: f32[1024,512], index: 4, kind: input, shape index: {}]   ;;  %s3860_s5 = inlined_call_operand.hbm [shape: f32[1,512], index: 5, kind: input, shape index: {}]   ;;  %s3861_s6 = inlined_call_operand.hbm [shape: f32[1,512], index: 6, kind: input, shape index: {}]   ;;  %s3862_s7 = inlined_call_operand.hbm [shape: f32[512,256], index: 7, kind: input, shape index: {}]   ;;  %s3863_s8 = inlined_call_operand.hbm [shape: f32[1,256], index: 8, kind: input, shape index: {}]   ;;  %s3864_s9 = inlined_call_operand.hbm [shape: f32[1,256], index: 9, kind: input, shape index: {}]   ;;  %s3865_s10 = inlined_call_operand.hbm [shape: f32[256,128], index: 10, kind: input, shape index: {}]   ;;  %s3866_s11 = inlined_call_operand.hbm [shape: f32[1,128], index: 11, kind: input, shape index: {}]   ;;  %s3867_s12 = inlined_call_operand.hbm [shape: f32[1,128], index: 12, kind: input, shape index: {}]   ;;  %s3868_s13 = inlined_call_operand.hbm [shape: f32[128,128], index: 13, kind: input, shape index: {}]   ;;  %s3869_s14 = inlined_call_operand.hbm [shape: f32[1,128], index: 14, kind: input, shape index: {}]   ;;  %s3870_s15 = inlined_call_operand.vmem [shape: f32[2,128], index: 15, kind: output, shape index: {}]  }
   0x1   :  { %21 = vsyncpa [#allocation5], 0 }
   0x2   :  { %22 = vsyncpa [#allocation8], 0 }
   0x3   :  { %23 = vsyncpa [#allocation11], 0 }
   0x4   :  { %24 = vsyncpa [#allocation14], 0 }
   0x5   :  { %25 = vsyncpa [#allocation17], 0 }
   0x6   :  { %26 = vsyncpa [#allocation20], 0 }
   0x7   :  { %27 = vsyncpa [#allocation23], 0  ;;  %s3533_s18 = smov [#allocation4]   ;;  %s3534_s20 = smov [#allocation7]  }
   0x8   :  { %s48_s19 = sshll.u32 %s3533_s18, 4  ;;  %s67_s21 = sshll.u32 %s3534_s20, 4  ;;  %s49_s19 = int_to_ptr.vmem [resolvable:$true] %s48_s19  ;;  %s68_s21 = int_to_ptr.vmem [resolvable:$true] %s67_s21 }
   0x9   :  { %s3245_s22 = scalar_lea.vmem %s49_s19, 128  ;;  %p3250_p1 = scmp.lt.s32.totalorder %s49_s19, %s49_s19 }
   0xa   :  { %p3246_p0 = scmp.ne.s32.totalorder %s49_s19, %s3245_s22  ;;  %p3251_p2 = scmp.lt.s32.totalorder %s3245_s22, %s3245_s22 }
   0xc   :  { %p3252_p3 = por %p3251_p2, %p3250_p1 }
   0xe   :  { %p3253_p4 = pnand %p3252_p3, %p3246_p0 }
  0x10   :  { %3256 = shalt.err (!%p3253_p4)
}
  0x11   :  { %51 = dma.hbm_to_vmem [thread:$0]  %s3857_s2, 128, %s49_s19, [#allocation5]  }
  0x12   :  { %s3265_s25 = scalar_lea.vmem %s68_s21, 65536  ;;  %p3270_p6 = scmp.lt.s32.totalorder %s68_s21, %s68_s21 }
  0x13   :  { %p3266_p5 = scmp.ne.s32.totalorder %s68_s21, %s3265_s25  ;;  %p3271_p7 = scmp.lt.s32.totalorder %s3265_s25, %s3265_s25 }
  0x15   :  { %p3272_p8 = por %p3271_p7, %p3270_p6 }
  0x17   :  { %p3273_p9 = pnand %p3272_p8, %p3266_p5 }
  0x19   :  { %3276 = shalt.err (!%p3273_p9)
}
  0x1a   :  { %s3535_s26 = smov 512   ;;  %s3536_s27 = smov 32  }
  0x1b   :  { %73 = dma.hbm_to_vmem [thread:$0]  %s3859_s4, 65536, %s68_s21, [#allocation8], %s3535_s26, %s3535_s26, %s3536_s27  }
  0x1c   :  { %s3537_s30 = smov [#allocation10]   ;;  %s3538_s17 = smov [#allocation13]  }
  0x1d   :  { %s90_s16 = sshll.u32 %s3537_s30, 4  ;;  %s112_s18 = sshll.u32 %s3538_s17, 4  ;;  %s91_s16 = int_to_ptr.vmem [resolvable:$true] %s90_s16  ;;  %s113_s18 = int_to_ptr.vmem [resolvable:$true] %s112_s18 }
  0x1e   :  { %s3285_s2 = scalar_lea.vmem %s91_s16, 64  ;;  %p3290_p11 = scmp.lt.s32.totalorder %s91_s16, %s91_s16 }
  0x1f   :  { %p3286_p10 = scmp.ne.s32.totalorder %s91_s16, %s3285_s2  ;;  %p3291_p12 = scmp.lt.s32.totalorder %s3285_s2, %s3285_s2 }
  0x21   :  { %p3292_p13 = por %p3291_p12, %p3290_p11 }
  0x23   :  { %p3293_p0 = pnand %p3292_p13, %p3286_p10 }
  0x25   :  { %3296 = shalt.err (!%p3293_p0)
}
  0x26   :  { %93 = dma.hbm_to_vmem [thread:$0]  %s3861_s6, 64, %s91_s16, [#allocation11]  }
  0x27   :  { %s3305_s22 = scalar_lea.vmem %s113_s18, 32  ;;  %p3310_p2 = scmp.lt.s32.totalorder %s113_s18, %s113_s18 }
  0x28   :  { %p3306_p1 = scmp.ne.s32.totalorder %s113_s18, %s3305_s22  ;;  %p3311_p3 = scmp.lt.s32.totalorder %s3305_s22, %s3305_s22 }
  0x2a   :  { %p3312_p4 = por %p3311_p3, %p3310_p2 }
  0x2c   :  { %p3313_p5 = pnand %p3312_p4, %p3306_p1 }
  0x2e   :  { %3316 = shalt.err (!%p3313_p5)
}
  0x2f   :  { %115 = dma.hbm_to_vmem [thread:$0]  %s3863_s8, 32, %s113_s18, [#allocation14]  }
  0x30   :  { %s3539_s23 = smov [#allocation16]  }
  0x31   :  { %s131_s24 = sshll.u32 %s3539_s23, 4  ;;  %s132_s24 = int_to_ptr.vmem [resolvable:$true] %s131_s24 }
  0x32   :  { %s3325_s25 = scalar_lea.vmem %s132_s24, 4096  ;;  %p3330_p7 = scmp.lt.s32.totalorder %s132_s24, %s132_s24 }
  0x33   :  { %p3326_p6 = scmp.ne.s32.totalorder %s132_s24, %s3325_s25  ;;  %p3331_p8 = scmp.lt.s32.totalorder %s3325_s25, %s3325_s25 }
  0x35   :  { %p3332_p9 = por %p3331_p8, %p3330_p7 }
  0x37   :  { %p3333_p10 = pnand %p3332_p9, %p3326_p6 }
  0x39   :  { %3336 = shalt.err (!%p3333_p10)
}
  0x3a   :  { %s3540_s6 = smov 128   ;;  %s3541_s26 = smov 8  }
  0x3b   :  { %137 = dma.hbm_to_vmem [thread:$0]  %s3865_s10, 4096, %s132_s24, [#allocation17], %s3540_s6, %s3540_s6, %s3541_s26  }
  0x3c   :  { %s3542_s8 = smov [#allocation19]   ;;  %s3543_s30 = smov [#allocation2]  }
  0x3d   :  { %s154_s29 = sshll.u32 %s3542_s8, 4  ;;  %s35_s16 = sshll.u32 %s3543_s30, 4  ;;  %s155_s29 = int_to_ptr.vmem [resolvable:$true] %s154_s29  ;;  %s36_s16 = int_to_ptr.vmem [resolvable:$true] %s35_s16 }
  0x3e   :  { %s3345_s17 = scalar_lea.vmem %s155_s29, 16  ;;  %s3349_s18 = scalar_lea.vmem %s155_s29, 32 }
  0x3f   :  { %p3346_p11 = scmp.ne.s32.totalorder %s155_s29, %s3345_s17  ;;  %p3350_p12 = scmp.lt.s32.totalorder %s155_s29, %s155_s29 }
  0x40   :  { %p3351_p13 = scmp.lt.s32.totalorder %s3349_s18, %s3345_s17 }
  0x42   :  { %p3352_p0 = por %p3351_p13, %p3350_p12 }
  0x44   :  { %p3353_p1 = pnand %p3352_p0, %p3346_p11 }
  0x46   :  { %3356 = shalt.err (!%p3353_p1)
}
  0x47   :  { %157 = dma.hbm_to_vmem [thread:$0]  %s3867_s12, 16, %s155_s29, [#allocation20]  }
  0x48   :  { %s3365_s20 = scalar_lea.vmem %s36_s16, 65536  ;;  %p3370_p3 = scmp.lt.s32.totalorder %s36_s16, %s36_s16 }
  0x49   :  { %p3366_p2 = scmp.ne.s32.totalorder %s36_s16, %s3365_s20  ;;  %p3371_p4 = scmp.lt.s32.totalorder %s3365_s20, %s3365_s20 }
  0x4b   :  { %p3372_p5 = por %p3371_p4, %p3370_p3 }
  0x4d   :  { %p3373_p6 = pnand %p3372_p5, %p3366_p2 }
  0x4f   :  { %3376 = shalt.err (!%p3373_p6)
}
  0x50   :  { %s3544_s10 = smov 1024   ;;  %s3545_s22 = smov 64  }
  0x51   :  { %41 = dma.hbm_to_vmem [thread:$0]  %s3856_s1, 65536, %s36_s16, [#allocation3], %s3544_s10, %s3544_s10, %s3545_s22  }
  0x52   :  { %s3546_s23 = smov [#allocation6]   ;;  %s3547_s25 = smov [#allocation9]  }
  0x53   :  { %s58_s24 = sshll.u32 %s3546_s23, 4  ;;  %s80_s27 = sshll.u32 %s3547_s25, 4  ;;  %s59_s24 = int_to_ptr.vmem [resolvable:$true] %s58_s24  ;;  %s81_s27 = int_to_ptr.vmem [resolvable:$true] %s80_s27 }
  0x54   :  { %s3385_s12 = scalar_lea.vmem %s59_s24, 128  ;;  %p3390_p8 = scmp.lt.s32.totalorder %s59_s24, %s59_s24 }
  0x55   :  { %p3386_p7 = scmp.ne.s32.totalorder %s59_s24, %s3385_s12  ;;  %p3391_p9 = scmp.lt.s32.totalorder %s3385_s12, %s3385_s12 }
  0x57   :  { %p3392_p10 = por %p3391_p9, %p3390_p8 }
  0x59   :  { %p3393_p11 = pnand %p3392_p10, %p3386_p7 }
  0x5b   :  { %3396 = shalt.err (!%p3393_p11)
}
  0x5c   :  { %61 = dma.hbm_to_vmem [thread:$0]  %s3858_s3, 128, %s59_s24, [#allocation5]  }
  0x5d   :  { %s3405_s29 = scalar_lea.vmem %s81_s27, 64  ;;  %p3410_p13 = scmp.lt.s32.totalorder %s81_s27, %s81_s27 }
  0x5e   :  { %p3406_p12 = scmp.ne.s32.totalorder %s81_s27, %s3405_s29  ;;  %p3411_p0 = scmp.lt.s32.totalorder %s3405_s29, %s3405_s29 }
  0x60   :  { %p3412_p1 = por %p3411_p0, %p3410_p13 }
  0x62   :  { %p3413_p2 = pnand %p3412_p1, %p3406_p12 }
  0x64   :  { %3416 = shalt.err (!%p3413_p2)
}
  0x65   :  { %83 = dma.hbm_to_vmem [thread:$0]  %s3860_s5, 64, %s81_s27, [#allocation8]  }
  0x66   :  { %s3548_s16 = smov [#allocation12]  }
  0x67   :  { %s99_s17 = sshll.u32 %s3548_s16, 4  ;;  %s100_s17 = int_to_ptr.vmem [resolvable:$true] %s99_s17 }
  0x68   :  { %s3425_s18 = scalar_lea.vmem %s100_s17, 16384  ;;  %p3430_p4 = scmp.lt.s32.totalorder %s100_s17, %s100_s17 }
  0x69   :  { %p3426_p3 = scmp.ne.s32.totalorder %s100_s17, %s3425_s18  ;;  %p3431_p5 = scmp.lt.s32.totalorder %s3425_s18, %s3425_s18 }
  0x6b   :  { %p3432_p6 = por %p3431_p5, %p3430_p4 }
  0x6d   :  { %p3433_p7 = pnand %p3432_p6, %p3426_p3 }
  0x6f   :  { %3436 = shalt.err (!%p3433_p7)
}
  0x70   :  { %s3549_s3 = smov 256   ;;  %s3550_s2 = smov 16  }
  0x71   :  { %105 = dma.hbm_to_vmem [thread:$0]  %s3862_s7, 16384, %s100_s17, [#allocation11], %s3549_s3, %s3549_s3, %s3550_s2  }
  0x72   :  { %s3551_s10 = smov [#allocation15]   ;;  %s3552_s4 = smov [#allocation18]  }
  0x73   :  { %s122_s22 = sshll.u32 %s3551_s10, 4  ;;  %s144_s5 = sshll.u32 %s3552_s4, 4  ;;  %s123_s22 = int_to_ptr.vmem [resolvable:$true] %s122_s22  ;;  %s145_s5 = int_to_ptr.vmem [resolvable:$true] %s144_s5 }
  0x74   :  { %s3445_s21 = scalar_lea.vmem %s123_s22, 32  ;;  %p3450_p9 = scmp.lt.s32.totalorder %s123_s22, %s123_s22 }
  0x75   :  { %p3446_p8 = scmp.ne.s32.totalorder %s123_s22, %s3445_s21  ;;  %p3451_p10 = scmp.lt.s32.totalorder %s3445_s21, %s3445_s21 }
  0x77   :  { %p3452_p11 = por %p3451_p10, %p3450_p9 }
  0x79   :  { %p3453_p12 = pnand %p3452_p11, %p3446_p8 }
  0x7b   :  { %3456 = shalt.err (!%p3453_p12)
}
  0x7c   :  { %125 = dma.hbm_to_vmem [thread:$0]  %s3864_s9, 32, %s123_s22, [#allocation14]  }
  0x7d   :  { %s3465_s25 = scalar_lea.vmem %s145_s5, 16  ;;  %s3469_s7 = scalar_lea.vmem %s145_s5, 32 }
  0x7e   :  { %p3466_p13 = scmp.ne.s32.totalorder %s145_s5, %s3465_s25  ;;  %p3470_p0 = scmp.lt.s32.totalorder %s145_s5, %s145_s5 }
  0x7f   :  { %p3471_p1 = scmp.lt.s32.totalorder %s3469_s7, %s3465_s25 }
  0x81   :  { %p3472_p2 = por %p3471_p1, %p3470_p0 }
  0x83   :  { %p3473_p3 = pnand %p3472_p2, %p3466_p13 }
  0x85   :  { %3476 = shalt.err (!%p3473_p3)
}
  0x86   :  { %147 = dma.hbm_to_vmem [thread:$0]  %s3866_s11, 16, %s145_s5, [#allocation17]  }
  0x87   :  { %s3553_s28 = smov [#allocation21]   ;;  %s3554_s29 = smov [#allocation22]  }
  0x88   :  { %s163_s8 = sshll.u32 %s3553_s28, 4  ;;  %s176_s1 = sshll.u32 %s3554_s29, 4  ;;  %s164_s8 = int_to_ptr.vmem [resolvable:$true] %s163_s8  ;;  %s177_s1 = int_to_ptr.vmem [resolvable:$true] %s176_s1 }
  0x89   :  { %s3485_s30 = scalar_lea.vmem %s164_s8, 2048  ;;  %p3490_p5 = scmp.lt.s32.totalorder %s164_s8, %s164_s8 }
  0x8a   :  { %p3486_p4 = scmp.ne.s32.totalorder %s164_s8, %s3485_s30  ;;  %p3491_p6 = scmp.lt.s32.totalorder %s3485_s30, %s3485_s30 }
  0x8c   :  { %p3492_p7 = por %p3491_p6, %p3490_p5 }
  0x8e   :  { %p3493_p8 = pnand %p3492_p7, %p3486_p4 }
  0x90   :  { %3496 = shalt.err (!%p3493_p8)
}
  0x91   :  { %169 = dma.hbm_to_vmem [thread:$0]  %s3868_s13, 2048, %s164_s8, [#allocation20], %s3540_s6, %s3540_s6, %s3541_s26  }
  0x92   :  { %s3505_s11 = scalar_lea.vmem %s177_s1, 16  ;;  %s3509_s17 = scalar_lea.vmem %s177_s1, 32 }
  0x93   :  { %p3506_p9 = scmp.ne.s32.totalorder %s177_s1, %s3505_s11  ;;  %p3510_p10 = scmp.lt.s32.totalorder %s177_s1, %s177_s1 }
  0x94   :  { %p3511_p11 = scmp.lt.s32.totalorder %s3509_s17, %s3505_s11 }
  0x96   :  { %p3512_p12 = por %p3511_p11, %p3510_p10 }
  0x98   :  { %p3513_p13 = pnand %p3512_p12, %p3506_p9 }
  0x9a   :  { %3516 = shalt.err (!%p3513_p13)
}
  0x9b   :  { %179 = dma.hbm_to_vmem [thread:$0]  %s3869_s14, 16, %s177_s1, [#allocation23]  }
  0x9c   :  { %3517 = dma.done.wait [#allocation3], 65536  }
  0x9d   :  { %3518 = vsyncadd [#allocation3], 4294901760 }
  0x9e   :  { %3519 = dma.done.wait [#allocation5], 256  }
  0x9f   :  { %3520 = vsyncadd [#allocation5], 4294967040 }
  0xa0   :  { %3521 = dma.done.wait [#allocation8], 65600  }
  0xa1   :  { %3522 = vsyncadd [#allocation8], 4294901696 }
  0xa2   :  { %3523 = dma.done.wait [#allocation11], 16448  }
  0xa3   :  { %3524 = vsyncadd [#allocation11], 4294950848 }
  0xa4   :  { %3525 = dma.done.wait [#allocation14], 64  }
  0xa5   :  { %3526 = vsyncadd [#allocation14], 4294967232 }
  0xa6   :  { %3527 = dma.done.wait [#allocation17], 4112  }
  0xa7   :  { %3528 = vsyncadd [#allocation17], 4294963184 }
  0xa8   :  { %3529 = dma.done.wait [#allocation20], 2064  }
  0xa9   :  { %3530 = vsyncadd [#allocation20], 4294965232 }
  0xaa   :  { %3531 = dma.done.wait [#allocation23], 16  }
  0xab   :  { %3532 = vsyncadd [#allocation23], 4294967280  ;;  %v344_v0 = vld [vmem:[#allocation2 + $0x3c8] sm:$0xff]  ;;  %v343_v2 = vld [vmem:[#allocation2 + $0x3c0] sm:$0xff]  ;;  %vm3557_vm14 = vmmov 0  }
  0xac   :  { %v600_v1 = vld [vmem:[#allocation2 + $0xbc8] sm:$0xff]  ;;  %799 = vmatprep.subr.mxu0 %v344_v0  ;;  %v599_v3 = vld [vmem:[#allocation2 + $0xbc0] sm:$0xff] }
  0xad   :  { %870 = vmatprep.subr.mxu1 %v600_v1  ;;  %v336_v4 = vld [vmem:[#allocation2 + $0x388] sm:$0xff]  ;;  %800 = vmatpush1.msra.mxu0 %v343_v2  ;;  %v335_v6 = vld [vmem:[#allocation2 + $0x380] sm:$0xff] }
  0xae   :  { %v592_v5 = vld [vmem:[#allocation2 + $0xb88] sm:$0xff]  ;;  %871 = vmatpush1.msra.mxu1 %v599_v3  ;;  %v591_v7 = vld [vmem:[#allocation2 + $0xb80] sm:$0xff]  ;;  %801 = vmatprep.subr.mxu0 %v336_v4 }
  0xaf   :  { %v328_v8 = vld [vmem:[#allocation2 + $0x348] sm:$0xff]  ;;  %872 = vmatprep.subr.mxu1 %v592_v5  ;;  %v327_v10 = vld [vmem:[#allocation2 + $0x340] sm:$0xff]  ;;  %802 = vmatpush1.msra.mxu0 %v335_v6 }
  0xb0   :  { %v584_v9 = vld [vmem:[#allocation2 + $0xb48] sm:$0xff]  ;;  %v583_v11 = vld [vmem:[#allocation2 + $0xb40] sm:$0xff]  ;;  %873 = vmatpush1.msra.mxu1 %v591_v7  ;;  %803 = vmatprep.subr.mxu0 %v328_v8 }
  0xb1   :  { %v320_v12 = vld [vmem:[#allocation2 + $0x308] sm:$0xff]  ;;  %874 = vmatprep.subr.mxu1 %v584_v9  ;;  %v319_v14 = vld [vmem:[#allocation2 + $0x300] sm:$0xff]  ;;  %804 = vmatpush1.msra.mxu0 %v327_v10 }
  0xb2   :  { %v576_v13 = vld [vmem:[#allocation2 + $0xb08] sm:$0xff]  ;;  %v575_v15 = vld [vmem:[#allocation2 + $0xb00] sm:$0xff]  ;;  %875 = vmatpush1.msra.mxu1 %v583_v11  ;;  %805 = vmatprep.subr.mxu0 %v320_v12 }
  0xb3   :  { %v312_v16 = vld [vmem:[#allocation2 + $0x2c8] sm:$0xff]  ;;  %876 = vmatprep.subr.mxu1 %v576_v13  ;;  %v311_v18 = vld [vmem:[#allocation2 + $0x2c0] sm:$0xff]  ;;  %806 = vmatpush1.msra.mxu0 %v319_v14 }
  0xb4   :  { %v568_v17 = vld [vmem:[#allocation2 + $0xac8] sm:$0xff]  ;;  %v567_v19 = vld [vmem:[#allocation2 + $0xac0] sm:$0xff]  ;;  %877 = vmatpush1.msra.mxu1 %v575_v15  ;;  %807 = vmatprep.subr.mxu0 %v312_v16 }
  0xb5   :  { %v304_v20 = vld [vmem:[#allocation2 + $0x288] sm:$0xff]  ;;  %878 = vmatprep.subr.mxu1 %v568_v17  ;;  %v303_v22 = vld [vmem:[#allocation2 + $0x280] sm:$0xff]  ;;  %808 = vmatpush1.msra.mxu0 %v311_v18 }
  0xb6   :  { %v560_v21 = vld [vmem:[#allocation2 + $0xa88] sm:$0xff]  ;;  %v559_v23 = vld [vmem:[#allocation2 + $0xa80] sm:$0xff]  ;;  %879 = vmatpush1.msra.mxu1 %v567_v19  ;;  %809 = vmatprep.subr.mxu0 %v304_v20 }
  0xb7   :  { %v296_v24 = vld [vmem:[#allocation2 + $0x248] sm:$0xff]  ;;  %880 = vmatprep.subr.mxu1 %v560_v21  ;;  %v295_v26 = vld [vmem:[#allocation2 + $0x240] sm:$0xff]  ;;  %810 = vmatpush1.msra.mxu0 %v303_v22 }
  0xb8   :  { %v552_v25 = vld [vmem:[#allocation2 + $0xa48] sm:$0xff]  ;;  %v551_v27 = vld [vmem:[#allocation2 + $0xa40] sm:$0xff]  ;;  %881 = vmatpush1.msra.mxu1 %v559_v23  ;;  %811 = vmatprep.subr.mxu0 %v296_v24 }
  0xb9   :  { %v288_v28 = vld [vmem:[#allocation2 + $0x208] sm:$0xff]  ;;  %882 = vmatprep.subr.mxu1 %v552_v25  ;;  %v287_v30 = vld [vmem:[#allocation2 + $0x200] sm:$0xff]  ;;  %812 = vmatpush1.msra.mxu0 %v295_v26 }
  0xba   :  { %v544_v29 = vld [vmem:[#allocation2 + $0xa08] sm:$0xff]  ;;  %v543_v31 = vld [vmem:[#allocation2 + $0xa00] sm:$0xff]  ;;  %883 = vmatpush1.msra.mxu1 %v551_v27  ;;  %813 = vmatprep.subr.mxu0 %v288_v28 }
  0xbb   :  { %v280_v32 = vld [vmem:[#allocation2 + $0x1c8] sm:$0xff]  ;;  %884 = vmatprep.subr.mxu1 %v544_v29  ;;  %v279_v34 = vld [vmem:[#allocation2 + $0x1c0] sm:$0xff]  ;;  %814 = vmatpush1.msra.mxu0 %v287_v30  ;;  %v737_v30 = vlaneseq }
  0xbc   :  { %v536_v33 = vld [vmem:[#allocation2 + $0x9c8] sm:$0xff]  ;;  %v535_v35 = vld [vmem:[#allocation2 + $0x9c0] sm:$0xff]  ;;  %885 = vmatpush1.msra.mxu1 %v543_v31  ;;  %815 = vmatprep.subr.mxu0 %v280_v32  ;;  %v3555_v31 = vmov 1983009808  }
  0xbd   :  { %v272_v36 = vld [vmem:[#allocation2 + $0x188] sm:$0xff]  ;;  %886 = vmatprep.subr.mxu1 %v536_v33  ;;  %v271_v38 = vld [vmem:[#allocation2 + $0x180] sm:$0xff]  ;;  %816 = vmatpush1.msra.mxu0 %v279_v34  ;;  %v780_v32 = vunpack.c.l.s4 %v3555_v31  ;;  %v569_v31 = vld [vmem:[#allocation2 + $0xad0] sm:$0xff] }
  0xbe   :  { %v528_v37 = vld [vmem:[#allocation2 + $0x988] sm:$0xff]  ;;  %v527_v39 = vld [vmem:[#allocation2 + $0x980] sm:$0xff]  ;;  %887 = vmatpush1.msra.mxu1 %v535_v35  ;;  %817 = vmatprep.subr.mxu0 %v272_v36 }
  0xbf   :  { %v264_v40 = vld [vmem:[#allocation2 + $0x148] sm:$0xff]  ;;  %888 = vmatprep.subr.mxu1 %v528_v37  ;;  %v263_v42 = vld [vmem:[#allocation2 + $0x140] sm:$0xff]  ;;  %818 = vmatpush1.msra.mxu0 %v271_v38 }
  0xc0   :  { %v520_v41 = vld [vmem:[#allocation2 + $0x948] sm:$0xff]  ;;  %v519_v43 = vld [vmem:[#allocation2 + $0x940] sm:$0xff]  ;;  %889 = vmatpush1.msra.mxu1 %v527_v39  ;;  %819 = vmatprep.subr.mxu0 %v264_v40 }
  0xc1   :  { %v256_v44 = vld [vmem:[#allocation2 + $0x108] sm:$0xff]  ;;  %890 = vmatprep.subr.mxu1 %v520_v41  ;;  %v255_v46 = vld [vmem:[#allocation2 + $0x100] sm:$0xff]  ;;  %820 = vmatpush1.msra.mxu0 %v263_v42  ;;  %v3686_v41 = vshrl.u32 %v737_v30, 7  ;;  %v781_v42 = vunpack.c.0.s8 %v780_v32  ;;  %v313_v30 = vld [vmem:[#allocation2 + $0x2d0] sm:$0xff] }
  0xc2   :  { %v512_v45 = vld [vmem:[#allocation2 + $0x908] sm:$0xff]  ;;  %v511_v47 = vld [vmem:[#allocation2 + $0x900] sm:$0xff]  ;;  %891 = vmatpush1.msra.mxu1 %v519_v43  ;;  %821 = vmatprep.subr.mxu0 %v256_v44  ;;  %v306_v32 = vld [vmem:[#allocation2 + $0x298] sm:$0xff] }
  0xc3   :  { %v248_v48 = vld [vmem:[#allocation2 + $0xc8] sm:$0xff]  ;;  %892 = vmatprep.subr.mxu1 %v512_v45  ;;  %v247_v50 = vld [vmem:[#allocation2 + $0xc0] sm:$0xff]  ;;  %822 = vmatpush1.msra.mxu0 %v255_v46 }
  0xc4   :  { %v504_v49 = vld [vmem:[#allocation2 + $0x8c8] sm:$0xff]  ;;  %v503_v51 = vld [vmem:[#allocation2 + $0x8c0] sm:$0xff]  ;;  %893 = vmatpush1.msra.mxu1 %v511_v47  ;;  %823 = vmatprep.subr.mxu0 %v248_v48 }
  0xc5   :  { %v240_v52 = vld [vmem:[#allocation2 + $0x88] sm:$0xff]  ;;  %894 = vmatprep.subr.mxu1 %v504_v49  ;;  %v239_v54 = vld [vmem:[#allocation2 + $0x80] sm:$0xff]  ;;  %824 = vmatpush1.msra.mxu0 %v247_v50 }
  0xc6   :  { %v496_v53 = vld [vmem:[#allocation2 + $0x888] sm:$0xff]  ;;  %v495_v55 = vld [vmem:[#allocation2 + $0x880] sm:$0xff]  ;;  %895 = vmatpush1.msra.mxu1 %v503_v51  ;;  %825 = vmatprep.subr.mxu0 %v240_v52  ;;  %v784_v52 = vsub.s32 %v781_v42, %v3686_v41  ;;  %v546_v42 = vld [vmem:[#allocation2 + $0xa18] sm:$0xff] }
  0xc7   :  { %v232_v56 = vld [vmem:[#allocation2 + $0x48] sm:$0xff]  ;;  %896 = vmatprep.subr.mxu1 %v496_v53  ;;  %v231_v58 = vld [vmem:[#allocation2 + $0x40] sm:$0xff]  ;;  %826 = vmatpush1.msra.mxu0 %v239_v54 }
  0xc8   :  { %v488_v57 = vld [vmem:[#allocation2 + $0x848] sm:$0xff]  ;;  %v487_v59 = vld [vmem:[#allocation2 + $0x840] sm:$0xff]  ;;  %897 = vmatpush1.msra.mxu1 %v495_v55  ;;  %827 = vmatprep.subr.mxu0 %v232_v56 }
  0xc9   :  { %v224_v60 = vld [vmem:[#allocation2 + $0x8] sm:$0xff]  ;;  %898 = vmatprep.subr.mxu1 %v488_v57  ;;  %v223_v62 = vld [vmem:[#allocation2] sm:$0xff]  ;;  %828 = vmatpush1.msra.mxu0 %v231_v58 }
  0xca   :  { %v480_v61 = vld [vmem:[#allocation2 + $0x808] sm:$0xff]  ;;  %v479_v63 = vld [vmem:[#allocation2 + $0x800] sm:$0xff]  ;;  %899 = vmatpush1.msra.mxu1 %v487_v59  ;;  %829 = vmatprep.subr.mxu0 %v224_v60 }
  0xcb   :  { %v472_v0 = vld [vmem:[#allocation2 + $0x7c8] sm:$0xff]  ;;  %900 = vmatprep.subr.mxu1 %v480_v61  ;;  %v471_v2 = vld [vmem:[#allocation2 + $0x7c0] sm:$0xff]  ;;  %830 = vmatpush1.msra.mxu0 %v223_v62 }
  0xcc   :  { %v728_v1 = vld [vmem:[#allocation2 + $0xfc8] sm:$0xff]  ;;  %v727_v3 = vld [vmem:[#allocation2 + $0xfc0] sm:$0xff]  ;;  %901 = vmatpush1.msra.mxu1 %v479_v63  ;;  %831 = vmatprep.subr.mxu0 %v472_v0 }
  0xcd   :  { %v464_v4 = vld [vmem:[#allocation2 + $0x788] sm:$0xff]  ;;  %902 = vmatprep.subr.mxu1 %v728_v1  ;;  %v463_v6 = vld [vmem:[#allocation2 + $0x780] sm:$0xff]  ;;  %832 = vmatpush2.msra.mxu0 %v471_v2 }
  0xce   :  { %v720_v5 = vld [vmem:[#allocation2 + $0xf88] sm:$0xff]  ;;  %v719_v7 = vld [vmem:[#allocation2 + $0xf80] sm:$0xff]  ;;  %903 = vmatpush2.msra.mxu1 %v727_v3  ;;  %833 = vmatprep.subr.mxu0 %v464_v4 }
  0xcf   :  { %v456_v8 = vld [vmem:[#allocation2 + $0x748] sm:$0xff]  ;;  %904 = vmatprep.subr.mxu1 %v720_v5  ;;  %v455_v10 = vld [vmem:[#allocation2 + $0x740] sm:$0xff]  ;;  %834 = vmatpush2.msra.mxu0 %v463_v6 }
  0xd0   :  { %v712_v9 = vld [vmem:[#allocation2 + $0xf48] sm:$0xff]  ;;  %v711_v11 = vld [vmem:[#allocation2 + $0xf40] sm:$0xff]  ;;  %905 = vmatpush2.msra.mxu1 %v719_v7  ;;  %835 = vmatprep.subr.mxu0 %v456_v8 }
  0xd1   :  { %v448_v12 = vld [vmem:[#allocation2 + $0x708] sm:$0xff]  ;;  %906 = vmatprep.subr.mxu1 %v712_v9  ;;  %v447_v14 = vld [vmem:[#allocation2 + $0x700] sm:$0xff]  ;;  %836 = vmatpush2.msra.mxu0 %v455_v10 }
  0xd2   :  { %v704_v13 = vld [vmem:[#allocation2 + $0xf08] sm:$0xff]  ;;  %v703_v15 = vld [vmem:[#allocation2 + $0xf00] sm:$0xff]  ;;  %907 = vmatpush2.msra.mxu1 %v711_v11  ;;  %837 = vmatprep.subr.mxu0 %v448_v12  ;;  %v346_v12 = vld [vmem:[#allocation2 + $0x3d8] sm:$0xff] }
  0xd3   :  { %v440_v16 = vld [vmem:[#allocation2 + $0x6c8] sm:$0xff]  ;;  %908 = vmatprep.subr.mxu1 %v704_v13  ;;  %v439_v18 = vld [vmem:[#allocation2 + $0x6c0] sm:$0xff]  ;;  %838 = vmatpush2.msra.mxu0 %v447_v14  ;;  %v602_v13 = vld [vmem:[#allocation2 + $0xbd8] sm:$0xff] }
  0xd4   :  { %v696_v17 = vld [vmem:[#allocation2 + $0xec8] sm:$0xff]  ;;  %v695_v19 = vld [vmem:[#allocation2 + $0xec0] sm:$0xff]  ;;  %909 = vmatpush2.msra.mxu1 %v703_v15  ;;  %839 = vmatprep.subr.mxu0 %v440_v16  ;;  %v345_v14 = vld [vmem:[#allocation2 + $0x3d0] sm:$0xff] }
  0xd5   :  { %v432_v20 = vld [vmem:[#allocation2 + $0x688] sm:$0xff]  ;;  %910 = vmatprep.subr.mxu1 %v696_v17  ;;  %v431_v22 = vld [vmem:[#allocation2 + $0x680] sm:$0xff]  ;;  %840 = vmatpush2.msra.mxu0 %v439_v18  ;;  %v601_v15 = vld [vmem:[#allocation2 + $0xbd0] sm:$0xff] }
  0xd6   :  { %v688_v21 = vld [vmem:[#allocation2 + $0xe88] sm:$0xff]  ;;  %v687_v23 = vld [vmem:[#allocation2 + $0xe80] sm:$0xff]  ;;  %911 = vmatpush2.msra.mxu1 %v695_v19  ;;  %841 = vmatprep.subr.mxu0 %v432_v20  ;;  %v338_v16 = vld [vmem:[#allocation2 + $0x398] sm:$0xff] }
  0xd7   :  { %v424_v24 = vld [vmem:[#allocation2 + $0x648] sm:$0xff]  ;;  %912 = vmatprep.subr.mxu1 %v688_v21  ;;  %v423_v26 = vld [vmem:[#allocation2 + $0x640] sm:$0xff]  ;;  %842 = vmatpush2.msra.mxu0 %v431_v22  ;;  %v594_v17 = vld [vmem:[#allocation2 + $0xb98] sm:$0xff] }
  0xd8   :  { %v680_v25 = vld [vmem:[#allocation2 + $0xe48] sm:$0xff]  ;;  %v679_v27 = vld [vmem:[#allocation2 + $0xe40] sm:$0xff]  ;;  %913 = vmatpush2.msra.mxu1 %v687_v23  ;;  %843 = vmatprep.subr.mxu0 %v424_v24  ;;  %v337_v18 = vld [vmem:[#allocation2 + $0x390] sm:$0xff] }
  0xd9   :  { %v416_v28 = vld [vmem:[#allocation2 + $0x608] sm:$0xff]  ;;  %914 = vmatprep.subr.mxu1 %v680_v25  ;;  %v415_v33 = vld [vmem:[#allocation2 + $0x600] sm:$0xff]  ;;  %844 = vmatpush2.msra.mxu0 %v423_v26  ;;  %v593_v19 = vld [vmem:[#allocation2 + $0xb90] sm:$0xff] }
  0xda   :  { %v672_v29 = vld [vmem:[#allocation2 + $0xe08] sm:$0xff]  ;;  %v671_v34 = vld [vmem:[#allocation2 + $0xe00] sm:$0xff]  ;;  %915 = vmatpush2.msra.mxu1 %v679_v27  ;;  %845 = vmatprep.subr.mxu0 %v416_v28  ;;  %v330_v20 = vld [vmem:[#allocation2 + $0x358] sm:$0xff] }
  0xdb   :  { %v408_v35 = vld [vmem:[#allocation2 + $0x5c8] sm:$0xff]  ;;  %916 = vmatprep.subr.mxu1 %v672_v29  ;;  %v407_v37 = vld [vmem:[#allocation2 + $0x5c0] sm:$0xff]  ;;  %846 = vmatpush2.msra.mxu0 %v415_v33  ;;  %v586_v21 = vld [vmem:[#allocation2 + $0xb58] sm:$0xff] }
  0xdc   :  { %v664_v36 = vld [vmem:[#allocation2 + $0xdc8] sm:$0xff]  ;;  %v663_v38 = vld [vmem:[#allocation2 + $0xdc0] sm:$0xff]  ;;  %917 = vmatpush2.msra.mxu1 %v671_v34  ;;  %847 = vmatprep.subr.mxu0 %v408_v35  ;;  %v329_v22 = vld [vmem:[#allocation2 + $0x350] sm:$0xff] }
  0xdd   :  { %v400_v39 = vld [vmem:[#allocation2 + $0x588] sm:$0xff]  ;;  %918 = vmatprep.subr.mxu1 %v664_v36  ;;  %v399_v43 = vld [vmem:[#allocation2 + $0x580] sm:$0xff]  ;;  %848 = vmatpush2.msra.mxu0 %v407_v37  ;;  %v585_v23 = vld [vmem:[#allocation2 + $0xb50] sm:$0xff] }
  0xde   :  { %v656_v40 = vld [vmem:[#allocation2 + $0xd88] sm:$0xff]  ;;  %v655_v44 = vld [vmem:[#allocation2 + $0xd80] sm:$0xff]  ;;  %919 = vmatpush2.msra.mxu1 %v663_v38  ;;  %849 = vmatprep.subr.mxu0 %v400_v39  ;;  %v322_v24 = vld [vmem:[#allocation2 + $0x318] sm:$0xff] }
  0xdf   :  { %v392_v45 = vld [vmem:[#allocation2 + $0x548] sm:$0xff]  ;;  %920 = vmatprep.subr.mxu1 %v656_v40  ;;  %v391_v47 = vld [vmem:[#allocation2 + $0x540] sm:$0xff]  ;;  %850 = vmatpush2.msra.mxu0 %v399_v43  ;;  %v578_v25 = vld [vmem:[#allocation2 + $0xb18] sm:$0xff] }
  0xe0   :  { %v648_v46 = vld [vmem:[#allocation2 + $0xd48] sm:$0xff]  ;;  %v647_v48 = vld [vmem:[#allocation2 + $0xd40] sm:$0xff]  ;;  %921 = vmatpush2.msra.mxu1 %v655_v44  ;;  %851 = vmatprep.subr.mxu0 %v392_v45  ;;  %v321_v26 = vld [vmem:[#allocation2 + $0x310] sm:$0xff] }
  0xe1   :  { %v222_v49 = vld [vmem:[%s3855_s0] sm:$0xff]  ;;  %v384_v50 = vld [vmem:[#allocation2 + $0x508] sm:$0xff]  ;;  %922 = vmatprep.subr.mxu1 %v648_v46  ;;  %852 = vmatpush2.msra.mxu0 %v391_v47  ;;  %v577_v27 = vld [vmem:[#allocation2 + $0xb10] sm:$0xff] }
  0xe2   :  { %v640_v51 = vld [vmem:[#allocation2 + $0xd08] sm:$0xff]  ;;  %v383_v53 = vld [vmem:[#allocation2 + $0x500] sm:$0xff]  ;;  %923 = vmatpush2.msra.mxu1 %v647_v48  ;;  %v778_v57 = vcombine.high %v222_v49, %v222_v49  ;;  %853 = vmatprep.subr.mxu0 %v384_v50  ;;  %v3692_v62 = vrot.slane %v222_v49, %v784_v52  ;;  %v314_v28 = vld [vmem:[#allocation2 + $0x2d8] sm:$0xff] }
  0xe3   :  { %v639_v54 = vld [vmem:[#allocation2 + $0xd00] sm:$0xff]  ;;  %v376_v55 = vld [vmem:[#allocation2 + $0x4c8] sm:$0xff]  ;;  %924 = vmatprep.subr.mxu1 %v640_v51  ;;  %854 = vmatpush2.msra.mxu0 %v383_v53  ;;  %v570_v29 = vld [vmem:[#allocation2 + $0xad8] sm:$0xff] }
  0xe4   :  { %v632_v56 = vld [vmem:[#allocation2 + $0xcc8] sm:$0xff]  ;;  %v375_v58 = vld [vmem:[#allocation2 + $0x4c0] sm:$0xff]  ;;  %925 = vmatpush2.msra.mxu1 %v639_v54  ;;  %855 = vmatprep.subr.mxu0 %v376_v55  ;;  %v3694_v3 = vrot.slane %v778_v57, %v784_v52  ;;  %v3698_v8 = vcombine.high %v3692_v62, %v3692_v62  ;;  %v562_v33 = vld [vmem:[#allocation2 + $0xa98] sm:$0xff] }
  0xe5   :  { %v631_v59 = vld [vmem:[#allocation2 + $0xcc0] sm:$0xff]  ;;  %v368_v60 = vld [vmem:[#allocation2 + $0x488] sm:$0xff]  ;;  %926 = vmatprep.subr.mxu1 %v632_v56  ;;  %856 = vmatpush2.msra.mxu0 %v375_v58  ;;  %v305_v34 = vld [vmem:[#allocation2 + $0x290] sm:$0xff] }
  0xe6   :  { %v624_v61 = vld [vmem:[#allocation2 + $0xc88] sm:$0xff]  ;;  %v367_v63 = vld [vmem:[#allocation2 + $0x480] sm:$0xff]  ;;  %927 = vmatpush2.msra.mxu1 %v631_v59  ;;  %857 = vmatprep.subr.mxu0 %v368_v60  ;;  %v3702_v11 = vcombine.high %v3694_v3, %v3694_v3  ;;  %v561_v35 = vld [vmem:[#allocation2 + $0xa90] sm:$0xff] }
  0xe7   :  { %v623_v0 = vld [vmem:[#allocation2 + $0xc80] sm:$0xff]  ;;  %v360_v1 = vld [vmem:[#allocation2 + $0x448] sm:$0xff]  ;;  %928 = vmatprep.subr.mxu1 %v624_v61  ;;  %858 = vmatpush2.msra.mxu0 %v367_v63  ;;  %v298_v36 = vld [vmem:[#allocation2 + $0x258] sm:$0xff] }
  0xe8   :  { %v616_v2 = vld [vmem:[#allocation2 + $0xc48] sm:$0xff]  ;;  %v359_v4 = vld [vmem:[#allocation2 + $0x440] sm:$0xff]  ;;  %929 = vmatpush2.msra.mxu1 %v623_v0  ;;  %859 = vmatprep.subr.mxu0 %v360_v1  ;;  %v554_v37 = vld [vmem:[#allocation2 + $0xa58] sm:$0xff] }
  0xe9   :  { %v615_v5 = vld [vmem:[#allocation2 + $0xc40] sm:$0xff]  ;;  %v352_v6 = vld [vmem:[#allocation2 + $0x408] sm:$0xff]  ;;  %930 = vmatprep.subr.mxu1 %v616_v2  ;;  %860 = vmatpush2.msra.mxu0 %v359_v4  ;;  %v297_v38 = vld [vmem:[#allocation2 + $0x250] sm:$0xff] }
  0xea   :  { %v608_v7 = vld [vmem:[#allocation2 + $0xc08] sm:$0xff]  ;;  %v351_v9 = vld [vmem:[#allocation2 + $0x400] sm:$0xff]  ;;  %931 = vmatpush2.msra.mxu1 %v615_v5  ;;  %861 = vmatprep.subr.mxu0 %v352_v6  ;;  %v553_v39 = vld [vmem:[#allocation2 + $0xa50] sm:$0xff] }
  0xeb   :  { %v607_v10 = vld [vmem:[#allocation2 + $0xc00] sm:$0xff]  ;;  %932 = vmatprep.subr.mxu1 %v608_v7  ;;  %862 = vmatpush2.msra.mxu0 %v351_v9  ;;  %v290_v40 = vld [vmem:[#allocation2 + $0x218] sm:$0xff]  ;;  %v289_v43 = vld [vmem:[#allocation2 + $0x210] sm:$0xff] }
  0xec   :  { %863 = vmatprep.mubr.f32.mxu0 %v3698_v8  ;;  %933 = vmatpush2.msra.mxu1 %v607_v10  ;;  %v545_v44 = vld [vmem:[#allocation2 + $0xa10] sm:$0xff]  ;;  %v282_v45 = vld [vmem:[#allocation2 + $0x1d8] sm:$0xff] }
  0xed   :  { %864 = vmatmul.mubr.f32.vlgmr.msra.gmra.mxu0 %v3692_v62  ;;  %934 = vmatprep.mubr.f32.mxu1 %v3702_v11  ;;  %v538_v46 = vld [vmem:[#allocation2 + $0x9d8] sm:$0xff]  ;;  %v281_v47 = vld [vmem:[#allocation2 + $0x1d0] sm:$0xff] }
  0xee   :  { %941 = vmatprep.subr.mxu0 %v346_v12  ;;  %1012 = vmatprep.subr.mxu1 %v602_v13  ;;  %v537_v48 = vld [vmem:[#allocation2 + $0x9d0] sm:$0xff]  ;;  %v274_v49 = vld [vmem:[#allocation2 + $0x198] sm:$0xff] }
  0xef   :  { %935 = vmatmul.mubr.f32.vlgmr.msra.gmra.mxu1 %v3694_v3  ;;  %942 = vmatpush1.msra.mxu0 %v345_v14  ;;  %v530_v50 = vld [vmem:[#allocation2 + $0x998] sm:$0xff]  ;;  %v273_v51 = vld [vmem:[#allocation2 + $0x190] sm:$0xff] }
  0xf0   :  { %1013 = vmatpush1.msra.mxu1 %v601_v15  ;;  %943 = vmatprep.subr.mxu0 %v338_v16  ;;  %v529_v52 = vld [vmem:[#allocation2 + $0x990] sm:$0xff]  ;;  %v266_v53 = vld [vmem:[#allocation2 + $0x158] sm:$0xff] }
  0xf1   :  { %1014 = vmatprep.subr.mxu1 %v594_v17  ;;  %944 = vmatpush1.msra.mxu0 %v337_v18  ;;  %v522_v54 = vld [vmem:[#allocation2 + $0x958] sm:$0xff]  ;;  %v265_v55 = vld [vmem:[#allocation2 + $0x150] sm:$0xff] }
  0xf2   :  { %1015 = vmatpush1.msra.mxu1 %v593_v19  ;;  %945 = vmatprep.subr.mxu0 %v330_v20  ;;  %v521_v56 = vld [vmem:[#allocation2 + $0x950] sm:$0xff]  ;;  %v258_v57 = vld [vmem:[#allocation2 + $0x118] sm:$0xff] }
  0xf3   :  { %1016 = vmatprep.subr.mxu1 %v586_v21  ;;  %946 = vmatpush1.msra.mxu0 %v329_v22  ;;  %v514_v58 = vld [vmem:[#allocation2 + $0x918] sm:$0xff]  ;;  %v257_v59 = vld [vmem:[#allocation2 + $0x110] sm:$0xff] }
  0xf4   :  { %1017 = vmatpush1.msra.mxu1 %v585_v23  ;;  %947 = vmatprep.subr.mxu0 %v322_v24  ;;  %v513_v60 = vld [vmem:[#allocation2 + $0x910] sm:$0xff]  ;;  %v250_v61 = vld [vmem:[#allocation2 + $0xd8] sm:$0xff] }
  0xf5   :  { %1018 = vmatprep.subr.mxu1 %v578_v25  ;;  %948 = vmatpush1.msra.mxu0 %v321_v26  ;;  %v506_v63 = vld [vmem:[#allocation2 + $0x8d8] sm:$0xff]  ;;  %v249_v0 = vld [vmem:[#allocation2 + $0xd0] sm:$0xff] }
  0xf6   :  { %1019 = vmatpush1.msra.mxu1 %v577_v27  ;;  %949 = vmatprep.subr.mxu0 %v314_v28  ;;  %v505_v1 = vld [vmem:[#allocation2 + $0x8d0] sm:$0xff]  ;;  %v242_v2 = vld [vmem:[#allocation2 + $0x98] sm:$0xff] }
  0xf7   :  { %1020 = vmatprep.subr.mxu1 %v570_v29  ;;  %950 = vmatpush1.msra.mxu0 %v313_v30  ;;  %v498_v4 = vld [vmem:[#allocation2 + $0x898] sm:$0xff]  ;;  %v241_v5 = vld [vmem:[#allocation2 + $0x90] sm:$0xff] }
  0xf8   :  { %1021 = vmatpush1.msra.mxu1 %v569_v31  ;;  %951 = vmatprep.subr.mxu0 %v306_v32  ;;  %v497_v6 = vld [vmem:[#allocation2 + $0x890] sm:$0xff]  ;;  %v234_v7 = vld [vmem:[#allocation2 + $0x58] sm:$0xff] }
  0xf9   :  { %1022 = vmatprep.subr.mxu1 %v562_v33  ;;  %952 = vmatpush1.msra.mxu0 %v305_v34  ;;  %v490_v9 = vld [vmem:[#allocation2 + $0x858] sm:$0xff]  ;;  %v233_v10 = vld [vmem:[#allocation2 + $0x50] sm:$0xff] }
  0xfa   :  { %1023 = vmatpush1.msra.mxu1 %v561_v35  ;;  %953 = vmatprep.subr.mxu0 %v298_v36  ;;  %v489_v12 = vld [vmem:[#allocation2 + $0x850] sm:$0xff]  ;;  %v226_v13 = vld [vmem:[#allocation2 + $0x18] sm:$0xff] }
  0xfb   :  { %1024 = vmatprep.subr.mxu1 %v554_v37  ;;  %954 = vmatpush1.msra.mxu0 %v297_v38  ;;  %v482_v14 = vld [vmem:[#allocation2 + $0x818] sm:$0xff]  ;;  %v225_v15 = vld [vmem:[#allocation2 + $0x10] sm:$0xff] }
  0xfc   :  { %1025 = vmatpush1.msra.mxu1 %v553_v39  ;;  %955 = vmatprep.subr.mxu0 %v290_v40  ;;  %v481_v16 = vld [vmem:[#allocation2 + $0x810] sm:$0xff]  ;;  %v474_v17 = vld [vmem:[#allocation2 + $0x7d8] sm:$0xff] }
  0xfd   :  { %1026 = vmatprep.subr.mxu1 %v546_v42  ;;  %956 = vmatpush1.msra.mxu0 %v289_v43  ;;  %v730_v18 = vld [vmem:[#allocation2 + $0xfd8] sm:$0xff]  ;;  %v473_v19 = vld [vmem:[#allocation2 + $0x7d0] sm:$0xff] }
  0xfe   :  { %1027 = vmatpush1.msra.mxu1 %v545_v44  ;;  %957 = vmatprep.subr.mxu0 %v282_v45  ;;  %v729_v20 = vld [vmem:[#allocation2 + $0xfd0] sm:$0xff]  ;;  %v466_v21 = vld [vmem:[#allocation2 + $0x798] sm:$0xff] }
  0xff   :  { %1028 = vmatprep.subr.mxu1 %v538_v46  ;;  %958 = vmatpush1.msra.mxu0 %v281_v47  ;;  %v722_v22 = vld [vmem:[#allocation2 + $0xf98] sm:$0xff]  ;;  %v465_v23 = vld [vmem:[#allocation2 + $0x790] sm:$0xff] }
 0x100   :  { %1029 = vmatpush1.msra.mxu1 %v537_v48  ;;  %959 = vmatprep.subr.mxu0 %v274_v49  ;;  %v721_v24 = vld [vmem:[#allocation2 + $0xf90] sm:$0xff]  ;;  %v458_v25 = vld [vmem:[#allocation2 + $0x758] sm:$0xff] }
 0x101   :  { %1030 = vmatprep.subr.mxu1 %v530_v50  ;;  %960 = vmatpush1.msra.mxu0 %v273_v51  ;;  %v714_v26 = vld [vmem:[#allocation2 + $0xf58] sm:$0xff]  ;;  %v457_v27 = vld [vmem:[#allocation2 + $0x750] sm:$0xff] }
 0x102   :  { %1031 = vmatpush1.msra.mxu1 %v529_v52  ;;  %961 = vmatprep.subr.mxu0 %v266_v53  ;;  %v713_v28 = vld [vmem:[#allocation2 + $0xf50] sm:$0xff]  ;;  %v450_v29 = vld [vmem:[#allocation2 + $0x718] sm:$0xff] }
 0x103   :  { %1032 = vmatprep.subr.mxu1 %v522_v54  ;;  %962 = vmatpush1.msra.mxu0 %v265_v55  ;;  %v706_v30 = vld [vmem:[#allocation2 + $0xf18] sm:$0xff]  ;;  %v449_v31 = vld [vmem:[#allocation2 + $0x710] sm:$0xff] }
 0x104   :  { %1033 = vmatpush1.msra.mxu1 %v521_v56  ;;  %963 = vmatprep.subr.mxu0 %v258_v57  ;;  %v705_v32 = vld [vmem:[#allocation2 + $0xf10] sm:$0xff]  ;;  %v442_v33 = vld [vmem:[#allocation2 + $0x6d8] sm:$0xff] }
 0x105   :  { %1034 = vmatprep.subr.mxu1 %v514_v58  ;;  %964 = vmatpush1.msra.mxu0 %v257_v59  ;;  %v698_v34 = vld [vmem:[#allocation2 + $0xed8] sm:$0xff]  ;;  %v441_v35 = vld [vmem:[#allocation2 + $0x6d0] sm:$0xff] }
 0x106   :  { %1035 = vmatpush1.msra.mxu1 %v513_v60  ;;  %965 = vmatprep.subr.mxu0 %v250_v61  ;;  %v697_v36 = vld [vmem:[#allocation2 + $0xed0] sm:$0xff]  ;;  %v434_v37 = vld [vmem:[#allocation2 + $0x698] sm:$0xff] }
 0x107   :  { %1036 = vmatprep.subr.mxu1 %v506_v63  ;;  %966 = vmatpush1.msra.mxu0 %v249_v0  ;;  %v690_v38 = vld [vmem:[#allocation2 + $0xe98] sm:$0xff]  ;;  %v433_v39 = vld [vmem:[#allocation2 + $0x690] sm:$0xff] }
 0x108   :  { %1037 = vmatpush1.msra.mxu1 %v505_v1  ;;  %967 = vmatprep.subr.mxu0 %v242_v2  ;;  %v689_v40 = vld [vmem:[#allocation2 + $0xe90] sm:$0xff]  ;;  %v426_v42 = vld [vmem:[#allocation2 + $0x658] sm:$0xff] }
 0x109   :  { %1038 = vmatprep.subr.mxu1 %v498_v4  ;;  %968 = vmatpush1.msra.mxu0 %v241_v5  ;;  %v682_v43 = vld [vmem:[#allocation2 + $0xe58] sm:$0xff]  ;;  %v425_v44 = vld [vmem:[#allocation2 + $0x650] sm:$0xff] }
 0x10a   :  { %1039 = vmatpush1.msra.mxu1 %v497_v6  ;;  %969 = vmatprep.subr.mxu0 %v234_v7  ;;  %v681_v45 = vld [vmem:[#allocation2 + $0xe50] sm:$0xff]  ;;  %v418_v46 = vld [vmem:[#allocation2 + $0x618] sm:$0xff] }
 0x10b   :  { %1040 = vmatprep.subr.mxu1 %v490_v9  ;;  %970 = vmatpush1.msra.mxu0 %v233_v10  ;;  %v674_v47 = vld [vmem:[#allocation2 + $0xe18] sm:$0xff]  ;;  %v417_v48 = vld [vmem:[#allocation2 + $0x610] sm:$0xff] }
 0x10c   :  { %1041 = vmatpush1.msra.mxu1 %v489_v12  ;;  %971 = vmatprep.subr.mxu0 %v226_v13  ;;  %v673_v49 = vld [vmem:[#allocation2 + $0xe10] sm:$0xff]  ;;  %v410_v50 = vld [vmem:[#allocation2 + $0x5d8] sm:$0xff] }
 0x10d   :  { %1042 = vmatprep.subr.mxu1 %v482_v14  ;;  %972 = vmatpush1.msra.mxu0 %v225_v15  ;;  %v666_v51 = vld [vmem:[#allocation2 + $0xdd8] sm:$0xff]  ;;  %v409_v52 = vld [vmem:[#allocation2 + $0x5d0] sm:$0xff] }
 0x10e   :  { %1043 = vmatpush1.msra.mxu1 %v481_v16  ;;  %973 = vmatprep.subr.mxu0 %v474_v17  ;;  %v665_v53 = vld [vmem:[#allocation2 + $0xdd0] sm:$0xff]  ;;  %v402_v54 = vld [vmem:[#allocation2 + $0x598] sm:$0xff] }
 0x10f   :  { %1044 = vmatprep.subr.mxu1 %v730_v18  ;;  %974 = vmatpush2.msra.mxu0 %v473_v19  ;;  %v658_v55 = vld [vmem:[#allocation2 + $0xd98] sm:$0xff]  ;;  %v401_v56 = vld [vmem:[#allocation2 + $0x590] sm:$0xff] }
 0x110   :  { %1045 = vmatpush2.msra.mxu1 %v729_v20  ;;  %975 = vmatprep.subr.mxu0 %v466_v21  ;;  %v657_v57 = vld [vmem:[#allocation2 + $0xd90] sm:$0xff]  ;;  %v394_v58 = vld [vmem:[#allocation2 + $0x558] sm:$0xff] }
 0x111   :  { %1046 = vmatprep.subr.mxu1 %v722_v22  ;;  %976 = vmatpush2.msra.mxu0 %v465_v23  ;;  %v650_v59 = vld [vmem:[#allocation2 + $0xd58] sm:$0xff]  ;;  %v393_v60 = vld [vmem:[#allocation2 + $0x550] sm:$0xff]  ;;  %v348_v22 = vld [vmem:[#allocation2 + $0x3e8] sm:$0xff] }
 0x112   :  { %1047 = vmatpush2.msra.mxu1 %v721_v24  ;;  %977 = vmatprep.subr.mxu0 %v458_v25  ;;  %v649_v61 = vld [vmem:[#allocation2 + $0xd50] sm:$0xff]  ;;  %v386_v63 = vld [vmem:[#allocation2 + $0x518] sm:$0xff]  ;;  %v604_v23 = vld [vmem:[#allocation2 + $0xbe8] sm:$0xff] }
 0x113   :  { %1048 = vmatprep.subr.mxu1 %v714_v26  ;;  %978 = vmatpush2.msra.mxu0 %v457_v27  ;;  %v642_v0 = vld [vmem:[#allocation2 + $0xd18] sm:$0xff]  ;;  %v385_v1 = vld [vmem:[#allocation2 + $0x510] sm:$0xff]  ;;  %v347_v24 = vld [vmem:[#allocation2 + $0x3e0] sm:$0xff] }
 0x114   :  { %1049 = vmatpush2.msra.mxu1 %v713_v28  ;;  %979 = vmatprep.subr.mxu0 %v450_v29  ;;  %v641_v2 = vld [vmem:[#allocation2 + $0xd10] sm:$0xff]  ;;  %v378_v4 = vld [vmem:[#allocation2 + $0x4d8] sm:$0xff]  ;;  %v603_v25 = vld [vmem:[#allocation2 + $0xbe0] sm:$0xff] }
 0x115   :  { %1050 = vmatprep.subr.mxu1 %v706_v30  ;;  %980 = vmatpush2.msra.mxu0 %v449_v31  ;;  %v634_v5 = vld [vmem:[#allocation2 + $0xcd8] sm:$0xff]  ;;  %v377_v6 = vld [vmem:[#allocation2 + $0x4d0] sm:$0xff]  ;;  %v340_v26 = vld [vmem:[#allocation2 + $0x3a8] sm:$0xff] }
 0x116   :  { %1051 = vmatpush2.msra.mxu1 %v705_v32  ;;  %981 = vmatprep.subr.mxu0 %v442_v33  ;;  %v633_v7 = vld [vmem:[#allocation2 + $0xcd0] sm:$0xff]  ;;  %v370_v9 = vld [vmem:[#allocation2 + $0x498] sm:$0xff]  ;;  %v596_v27 = vld [vmem:[#allocation2 + $0xba8] sm:$0xff] }
 0x117   :  { %1052 = vmatprep.subr.mxu1 %v698_v34  ;;  %982 = vmatpush2.msra.mxu0 %v441_v35  ;;  %v626_v10 = vld [vmem:[#allocation2 + $0xc98] sm:$0xff]  ;;  %v369_v12 = vld [vmem:[#allocation2 + $0x490] sm:$0xff]  ;;  %v339_v28 = vld [vmem:[#allocation2 + $0x3a0] sm:$0xff] }
 0x118   :  { %1053 = vmatpush2.msra.mxu1 %v697_v36  ;;  %983 = vmatprep.subr.mxu0 %v434_v37  ;;  %v625_v13 = vld [vmem:[#allocation2 + $0xc90] sm:$0xff]  ;;  %v362_v14 = vld [vmem:[#allocation2 + $0x458] sm:$0xff]  ;;  %v595_v29 = vld [vmem:[#allocation2 + $0xba0] sm:$0xff] }
 0x119   :  { %1054 = vmatprep.subr.mxu1 %v690_v38  ;;  %984 = vmatpush2.msra.mxu0 %v433_v39  ;;  %v618_v15 = vld [vmem:[#allocation2 + $0xc58] sm:$0xff]  ;;  %v361_v16 = vld [vmem:[#allocation2 + $0x450] sm:$0xff]  ;;  %v332_v30 = vld [vmem:[#allocation2 + $0x368] sm:$0xff] }
 0x11a   :  { %1055 = vmatpush2.msra.mxu1 %v689_v40  ;;  %985 = vmatprep.subr.mxu0 %v426_v42  ;;  %v617_v17 = vld [vmem:[#allocation2 + $0xc50] sm:$0xff]  ;;  %v354_v18 = vld [vmem:[#allocation2 + $0x418] sm:$0xff]  ;;  %v588_v31 = vld [vmem:[#allocation2 + $0xb68] sm:$0xff] }
 0x11b   :  { %1056 = vmatprep.subr.mxu1 %v682_v43  ;;  %986 = vmatpush2.msra.mxu0 %v425_v44  ;;  %v610_v19 = vld [vmem:[#allocation2 + $0xc18] sm:$0xff]  ;;  %v353_v20 = vld [vmem:[#allocation2 + $0x410] sm:$0xff]  ;;  %v331_v32 = vld [vmem:[#allocation2 + $0x360] sm:$0xff] }
 0x11c   :  { %1057 = vmatpush2.msra.mxu1 %v681_v45  ;;  %987 = vmatprep.subr.mxu0 %v418_v46  ;;  %v609_v21 = vld [vmem:[#allocation2 + $0xc10] sm:$0xff]  ;;  %v587_v33 = vld [vmem:[#allocation2 + $0xb60] sm:$0xff]  ;;  %v324_v34 = vld [vmem:[#allocation2 + $0x328] sm:$0xff] }
 0x11d   :  { %1058 = vmatprep.subr.mxu1 %v674_v47  ;;  %988 = vmatpush2.msra.mxu0 %v417_v48  ;;  %v580_v35 = vld [vmem:[#allocation2 + $0xb28] sm:$0xff]  ;;  %v323_v36 = vld [vmem:[#allocation2 + $0x320] sm:$0xff] }
 0x11e   :  { %1059 = vmatpush2.msra.mxu1 %v673_v49  ;;  %989 = vmatprep.subr.mxu0 %v410_v50  ;;  %v579_v37 = vld [vmem:[#allocation2 + $0xb20] sm:$0xff]  ;;  %v316_v38 = vld [vmem:[#allocation2 + $0x2e8] sm:$0xff] }
 0x11f   :  { %1060 = vmatprep.subr.mxu1 %v666_v51  ;;  %990 = vmatpush2.msra.mxu0 %v409_v52  ;;  %v572_v39 = vld [vmem:[#allocation2 + $0xae8] sm:$0xff]  ;;  %v315_v40 = vld [vmem:[#allocation2 + $0x2e0] sm:$0xff] }
 0x120   :  { %1061 = vmatpush2.msra.mxu1 %v665_v53  ;;  %991 = vmatprep.subr.mxu0 %v402_v54  ;;  %v571_v42 = vld [vmem:[#allocation2 + $0xae0] sm:$0xff]  ;;  %v308_v43 = vld [vmem:[#allocation2 + $0x2a8] sm:$0xff] }
 0x121   :  { %1062 = vmatprep.subr.mxu1 %v658_v55  ;;  %992 = vmatpush2.msra.mxu0 %v401_v56  ;;  %v564_v44 = vld [vmem:[#allocation2 + $0xaa8] sm:$0xff]  ;;  %v307_v45 = vld [vmem:[#allocation2 + $0x2a0] sm:$0xff] }
 0x122   :  { %1063 = vmatpush2.msra.mxu1 %v657_v57  ;;  %993 = vmatprep.subr.mxu0 %v394_v58  ;;  %v563_v46 = vld [vmem:[#allocation2 + $0xaa0] sm:$0xff]  ;;  %v300_v47 = vld [vmem:[#allocation2 + $0x268] sm:$0xff] }
 0x123   :  { %1064 = vmatprep.subr.mxu1 %v650_v59  ;;  %994 = vmatpush2.msra.mxu0 %v393_v60  ;;  %v556_v48 = vld [vmem:[#allocation2 + $0xa68] sm:$0xff]  ;;  %v299_v49 = vld [vmem:[#allocation2 + $0x260] sm:$0xff] }
 0x124   :  { %1065 = vmatpush2.msra.mxu1 %v649_v61  ;;  %995 = vmatprep.subr.mxu0 %v386_v63  ;;  %v555_v50 = vld [vmem:[#allocation2 + $0xa60] sm:$0xff]  ;;  %v292_v51 = vld [vmem:[#allocation2 + $0x228] sm:$0xff] }
 0x125   :  { %1066 = vmatprep.subr.mxu1 %v642_v0  ;;  %996 = vmatpush2.msra.mxu0 %v385_v1  ;;  %v548_v52 = vld [vmem:[#allocation2 + $0xa28] sm:$0xff]  ;;  %v291_v53 = vld [vmem:[#allocation2 + $0x220] sm:$0xff] }
 0x126   :  { %1067 = vmatpush2.msra.mxu1 %v641_v2  ;;  %997 = vmatprep.subr.mxu0 %v378_v4  ;;  %v547_v54 = vld [vmem:[#allocation2 + $0xa20] sm:$0xff]  ;;  %v284_v55 = vld [vmem:[#allocation2 + $0x1e8] sm:$0xff] }
 0x127   :  { %1068 = vmatprep.subr.mxu1 %v634_v5  ;;  %998 = vmatpush2.msra.mxu0 %v377_v6  ;;  %v540_v56 = vld [vmem:[#allocation2 + $0x9e8] sm:$0xff]  ;;  %v283_v57 = vld [vmem:[#allocation2 + $0x1e0] sm:$0xff] }
 0x128   :  { %1069 = vmatpush2.msra.mxu1 %v633_v7  ;;  %999 = vmatprep.subr.mxu0 %v370_v9  ;;  %v539_v58 = vld [vmem:[#allocation2 + $0x9e0] sm:$0xff]  ;;  %v276_v59 = vld [vmem:[#allocation2 + $0x1a8] sm:$0xff] }
 0x129   :  { %1070 = vmatprep.subr.mxu1 %v626_v10  ;;  %1000 = vmatpush2.msra.mxu0 %v369_v12  ;;  %v532_v60 = vld [vmem:[#allocation2 + $0x9a8] sm:$0xff]  ;;  %v275_v61 = vld [vmem:[#allocation2 + $0x1a0] sm:$0xff] }
 0x12a   :  { %1071 = vmatpush2.msra.mxu1 %v625_v13  ;;  %1001 = vmatprep.subr.mxu0 %v362_v14  ;;  %v531_v63 = vld [vmem:[#allocation2 + $0x9a0] sm:$0xff]  ;;  %v268_v0 = vld [vmem:[#allocation2 + $0x168] sm:$0xff] }
 0x12b   :  { %1072 = vmatprep.subr.mxu1 %v618_v15  ;;  %1002 = vmatpush2.msra.mxu0 %v361_v16  ;;  %v524_v1 = vld [vmem:[#allocation2 + $0x968] sm:$0xff]  ;;  %v267_v2 = vld [vmem:[#allocation2 + $0x160] sm:$0xff] }
 0x12c   :  { %1073 = vmatpush2.msra.mxu1 %v617_v17  ;;  %1003 = vmatprep.subr.mxu0 %v354_v18  ;;  %v523_v4 = vld [vmem:[#allocation2 + $0x960] sm:$0xff]  ;;  %v260_v5 = vld [vmem:[#allocation2 + $0x128] sm:$0xff] }
 0x12d   :  { %1074 = vmatprep.subr.mxu1 %v610_v19  ;;  %1004 = vmatpush2.msra.mxu0 %v353_v20  ;;  %v516_v6 = vld [vmem:[#allocation2 + $0x928] sm:$0xff]  ;;  %v259_v7 = vld [vmem:[#allocation2 + $0x120] sm:$0xff] }
 0x12e   :  { %1005 = vmatprep.mubr.f32.mxu0 %v3698_v8  ;;  %1075 = vmatpush2.msra.mxu1 %v609_v21  ;;  %v515_v9 = vld [vmem:[#allocation2 + $0x920] sm:$0xff]  ;;  %v252_v10 = vld [vmem:[#allocation2 + $0xe8] sm:$0xff] }
 0x12f   :  { %1006 = vmatmul.mubr.f32.vlgmr.msra.gmra.mxu0 %v3692_v62  ;;  %1076 = vmatprep.mubr.f32.mxu1 %v3702_v11  ;;  %v508_v12 = vld [vmem:[#allocation2 + $0x8e8] sm:$0xff]  ;;  %v251_v13 = vld [vmem:[#allocation2 + $0xe0] sm:$0xff] }
 0x130   :  { %1083 = vmatprep.subr.mxu0 %v348_v22  ;;  %1154 = vmatprep.subr.mxu1 %v604_v23  ;;  %v507_v14 = vld [vmem:[#allocation2 + $0x8e0] sm:$0xff]  ;;  %v244_v15 = vld [vmem:[#allocation2 + $0xa8] sm:$0xff] }
 0x131   :  { %1077 = vmatmul.mubr.f32.vlgmr.msra.gmra.mxu1 %v3694_v3  ;;  %1084 = vmatpush1.msra.mxu0 %v347_v24  ;;  %v500_v16 = vld [vmem:[#allocation2 + $0x8a8] sm:$0xff]  ;;  %v243_v17 = vld [vmem:[#allocation2 + $0xa0] sm:$0xff] }
 0x132   :  { %1155 = vmatpush1.msra.mxu1 %v603_v25  ;;  %1085 = vmatprep.subr.mxu0 %v340_v26  ;;  %v499_v18 = vld [vmem:[#allocation2 + $0x8a0] sm:$0xff]  ;;  %v236_v19 = vld [vmem:[#allocation2 + $0x68] sm:$0xff] }
 0x133   :  { %1156 = vmatprep.subr.mxu1 %v596_v27  ;;  %1086 = vmatpush1.msra.mxu0 %v339_v28  ;;  %v492_v20 = vld [vmem:[#allocation2 + $0x868] sm:$0xff]  ;;  %v235_v21 = vld [vmem:[#allocation2 + $0x60] sm:$0xff] }
 0x134   :  { %1157 = vmatpush1.msra.mxu1 %v595_v29  ;;  %1087 = vmatprep.subr.mxu0 %v332_v30  ;;  %v491_v22 = vld [vmem:[#allocation2 + $0x860] sm:$0xff]  ;;  %v228_v23 = vld [vmem:[#allocation2 + $0x28] sm:$0xff] }
 0x135   :  { %1158 = vmatprep.subr.mxu1 %v588_v31  ;;  %1088 = vmatpush1.msra.mxu0 %v331_v32  ;;  %v484_v24 = vld [vmem:[#allocation2 + $0x828] sm:$0xff]  ;;  %v227_v25 = vld [vmem:[#allocation2 + $0x20] sm:$0xff] }
 0x136   :  { %1159 = vmatpush1.msra.mxu1 %v587_v33  ;;  %1089 = vmatprep.subr.mxu0 %v324_v34  ;;  %v483_v26 = vld [vmem:[#allocation2 + $0x820] sm:$0xff]  ;;  %v476_v27 = vld [vmem:[#allocation2 + $0x7e8] sm:$0xff] }
 0x137   :  { %1160 = vmatprep.subr.mxu1 %v580_v35  ;;  %1090 = vmatpush1.msra.mxu0 %v323_v36  ;;  %v732_v28 = vld [vmem:[#allocation2 + $0xfe8] sm:$0xff]  ;;  %v475_v29 = vld [vmem:[#allocation2 + $0x7e0] sm:$0xff] }
 0x138   :  { %1161 = vmatpush1.msra.mxu1 %v579_v37  ;;  %1091 = vmatprep.subr.mxu0 %v316_v38  ;;  %v731_v30 = vld [vmem:[#allocation2 + $0xfe0] sm:$0xff]  ;;  %v468_v31 = vld [vmem:[#allocation2 + $0x7a8] sm:$0xff] }
 0x139   :  { %1162 = vmatprep.subr.mxu1 %v572_v39  ;;  %1092 = vmatpush1.msra.mxu0 %v315_v40  ;;  %v724_v32 = vld [vmem:[#allocation2 + $0xfa8] sm:$0xff]  ;;  %v467_v33 = vld [vmem:[#allocation2 + $0x7a0] sm:$0xff] }
 0x13a   :  { %1163 = vmatpush1.msra.mxu1 %v571_v42  ;;  %1093 = vmatprep.subr.mxu0 %v308_v43  ;;  %v723_v34 = vld [vmem:[#allocation2 + $0xfa0] sm:$0xff]  ;;  %v460_v35 = vld [vmem:[#allocation2 + $0x768] sm:$0xff] }
 0x13b   :  { %1164 = vmatprep.subr.mxu1 %v564_v44  ;;  %1094 = vmatpush1.msra.mxu0 %v307_v45  ;;  %v716_v36 = vld [vmem:[#allocation2 + $0xf68] sm:$0xff]  ;;  %v459_v37 = vld [vmem:[#allocation2 + $0x760] sm:$0xff] }
 0x13c   :  { %1165 = vmatpush1.msra.mxu1 %v563_v46  ;;  %1095 = vmatprep.subr.mxu0 %v300_v47  ;;  %v715_v38 = vld [vmem:[#allocation2 + $0xf60] sm:$0xff]  ;;  %v452_v39 = vld [vmem:[#allocation2 + $0x728] sm:$0xff] }
 0x13d   :  { %1166 = vmatprep.subr.mxu1 %v556_v48  ;;  %1096 = vmatpush1.msra.mxu0 %v299_v49  ;;  %v708_v40 = vld [vmem:[#allocation2 + $0xf28] sm:$0xff]  ;;  %v451_v42 = vld [vmem:[#allocation2 + $0x720] sm:$0xff] }
 0x13e   :  { %1167 = vmatpush1.msra.mxu1 %v555_v50  ;;  %1097 = vmatprep.subr.mxu0 %v292_v51  ;;  %v707_v43 = vld [vmem:[#allocation2 + $0xf20] sm:$0xff]  ;;  %v444_v44 = vld [vmem:[#allocation2 + $0x6e8] sm:$0xff] }
 0x13f   :  { %1168 = vmatprep.subr.mxu1 %v548_v52  ;;  %1098 = vmatpush1.msra.mxu0 %v291_v53  ;;  %v700_v45 = vld [vmem:[#allocation2 + $0xee8] sm:$0xff]  ;;  %v443_v46 = vld [vmem:[#allocation2 + $0x6e0] sm:$0xff] }
 0x140   :  { %1169 = vmatpush1.msra.mxu1 %v547_v54  ;;  %1099 = vmatprep.subr.mxu0 %v284_v55  ;;  %v699_v47 = vld [vmem:[#allocation2 + $0xee0] sm:$0xff]  ;;  %v436_v48 = vld [vmem:[#allocation2 + $0x6a8] sm:$0xff] }
 0x141   :  { %1170 = vmatprep.subr.mxu1 %v540_v56  ;;  %1100 = vmatpush1.msra.mxu0 %v283_v57  ;;  %v692_v49 = vld [vmem:[#allocation2 + $0xea8] sm:$0xff]  ;;  %v435_v50 = vld [vmem:[#allocation2 + $0x6a0] sm:$0xff] }
 0x142   :  { %1171 = vmatpush1.msra.mxu1 %v539_v58  ;;  %1101 = vmatprep.subr.mxu0 %v276_v59  ;;  %v691_v51 = vld [vmem:[#allocation2 + $0xea0] sm:$0xff]  ;;  %v428_v52 = vld [vmem:[#allocation2 + $0x668] sm:$0xff] }
 0x143   :  { %1172 = vmatprep.subr.mxu1 %v532_v60  ;;  %1102 = vmatpush1.msra.mxu0 %v275_v61  ;;  %v684_v53 = vld [vmem:[#allocation2 + $0xe68] sm:$0xff]  ;;  %v427_v54 = vld [vmem:[#allocation2 + $0x660] sm:$0xff] }
 0x144   :  { %1173 = vmatpush1.msra.mxu1 %v531_v63  ;;  %1103 = vmatprep.subr.mxu0 %v268_v0  ;;  %v683_v55 = vld [vmem:[#allocation2 + $0xe60] sm:$0xff]  ;;  %v420_v56 = vld [vmem:[#allocation2 + $0x628] sm:$0xff] }
 0x145   :  { %1174 = vmatprep.subr.mxu1 %v524_v1  ;;  %1104 = vmatpush1.msra.mxu0 %v267_v2  ;;  %v676_v57 = vld [vmem:[#allocation2 + $0xe28] sm:$0xff]  ;;  %v419_v58 = vld [vmem:[#allocation2 + $0x620] sm:$0xff] }
 0x146   :  { %1175 = vmatpush1.msra.mxu1 %v523_v4  ;;  %1105 = vmatprep.subr.mxu0 %v260_v5  ;;  %v675_v59 = vld [vmem:[#allocation2 + $0xe20] sm:$0xff]  ;;  %v412_v60 = vld [vmem:[#allocation2 + $0x5e8] sm:$0xff] }
 0x147   :  { %1176 = vmatprep.subr.mxu1 %v516_v6  ;;  %1106 = vmatpush1.msra.mxu0 %v259_v7  ;;  %v668_v61 = vld [vmem:[#allocation2 + $0xde8] sm:$0xff]  ;;  %v411_v63 = vld [vmem:[#allocation2 + $0x5e0] sm:$0xff] }
 0x148   :  { %1177 = vmatpush1.msra.mxu1 %v515_v9  ;;  %1107 = vmatprep.subr.mxu0 %v252_v10  ;;  %v667_v0 = vld [vmem:[#allocation2 + $0xde0] sm:$0xff]  ;;  %v404_v1 = vld [vmem:[#allocation2 + $0x5a8] sm:$0xff] }
 0x149   :  { %1178 = vmatprep.subr.mxu1 %v508_v12  ;;  %1108 = vmatpush1.msra.mxu0 %v251_v13  ;;  %v660_v2 = vld [vmem:[#allocation2 + $0xda8] sm:$0xff]  ;;  %v403_v4 = vld [vmem:[#allocation2 + $0x5a0] sm:$0xff] }
 0x14a   :  { %1179 = vmatpush1.msra.mxu1 %v507_v14  ;;  %1109 = vmatprep.subr.mxu0 %v244_v15  ;;  %v659_v5 = vld [vmem:[#allocation2 + $0xda0] sm:$0xff]  ;;  %v396_v6 = vld [vmem:[#allocation2 + $0x568] sm:$0xff] }
 0x14b   :  { %1180 = vmatprep.subr.mxu1 %v500_v16  ;;  %1110 = vmatpush1.msra.mxu0 %v243_v17  ;;  %v652_v7 = vld [vmem:[#allocation2 + $0xd68] sm:$0xff]  ;;  %v395_v9 = vld [vmem:[#allocation2 + $0x560] sm:$0xff] }
 0x14c   :  { %1181 = vmatpush1.msra.mxu1 %v499_v18  ;;  %1111 = vmatprep.subr.mxu0 %v236_v19  ;;  %v651_v10 = vld [vmem:[#allocation2 + $0xd60] sm:$0xff]  ;;  %v388_v12 = vld [vmem:[#allocation2 + $0x528] sm:$0xff] }
 0x14d   :  { %1182 = vmatprep.subr.mxu1 %v492_v20  ;;  %1112 = vmatpush1.msra.mxu0 %v235_v21  ;;  %v644_v13 = vld [vmem:[#allocation2 + $0xd28] sm:$0xff]  ;;  %v387_v14 = vld [vmem:[#allocation2 + $0x520] sm:$0xff] }
 0x14e   :  { %1183 = vmatpush1.msra.mxu1 %v491_v22  ;;  %1113 = vmatprep.subr.mxu0 %v228_v23  ;;  %v643_v15 = vld [vmem:[#allocation2 + $0xd20] sm:$0xff]  ;;  %v380_v16 = vld [vmem:[#allocation2 + $0x4e8] sm:$0xff] }
 0x14f   :  { %1184 = vmatprep.subr.mxu1 %v484_v24  ;;  %1114 = vmatpush1.msra.mxu0 %v227_v25  ;;  %v636_v17 = vld [vmem:[#allocation2 + $0xce8] sm:$0xff]  ;;  %v379_v18 = vld [vmem:[#allocation2 + $0x4e0] sm:$0xff] }
 0x150   :  { %1185 = vmatpush1.msra.mxu1 %v483_v26  ;;  %1115 = vmatprep.subr.mxu0 %v476_v27  ;;  %v635_v19 = vld [vmem:[#allocation2 + $0xce0] sm:$0xff]  ;;  %v372_v20 = vld [vmem:[#allocation2 + $0x4a8] sm:$0xff] }
 0x151   :  { %1186 = vmatprep.subr.mxu1 %v732_v28  ;;  %1116 = vmatpush2.msra.mxu0 %v475_v29  ;;  %v628_v21 = vld [vmem:[#allocation2 + $0xca8] sm:$0xff]  ;;  %v371_v22 = vld [vmem:[#allocation2 + $0x4a0] sm:$0xff] }
 0x152   :  { %1187 = vmatpush2.msra.mxu1 %v731_v30  ;;  %1117 = vmatprep.subr.mxu0 %v468_v31  ;;  %v627_v23 = vld [vmem:[#allocation2 + $0xca0] sm:$0xff]  ;;  %v364_v24 = vld [vmem:[#allocation2 + $0x468] sm:$0xff] }
 0x153   :  { %1188 = vmatprep.subr.mxu1 %v724_v32  ;;  %1118 = vmatpush2.msra.mxu0 %v467_v33  ;;  %v620_v25 = vld [vmem:[#allocation2 + $0xc68] sm:$0xff]  ;;  %v363_v26 = vld [vmem:[#allocation2 + $0x460] sm:$0xff]  ;;  %v350_v32 = vld [vmem:[#allocation2 + $0x3f8] sm:$0xff] }
 0x154   :  { %1189 = vmatpush2.msra.mxu1 %v723_v34  ;;  %1119 = vmatprep.subr.mxu0 %v460_v35  ;;  %v619_v27 = vld [vmem:[#allocation2 + $0xc60] sm:$0xff]  ;;  %v356_v28 = vld [vmem:[#allocation2 + $0x428] sm:$0xff]  ;;  %v606_v33 = vld [vmem:[#allocation2 + $0xbf8] sm:$0xff] }
 0x155   :  { %1190 = vmatprep.subr.mxu1 %v716_v36  ;;  %1120 = vmatpush2.msra.mxu0 %v459_v37  ;;  %v612_v29 = vld [vmem:[#allocation2 + $0xc28] sm:$0xff]  ;;  %v355_v30 = vld [vmem:[#allocation2 + $0x420] sm:$0xff]  ;;  %v349_v34 = vld [vmem:[#allocation2 + $0x3f0] sm:$0xff] }
 0x156   :  { %1191 = vmatpush2.msra.mxu1 %v715_v38  ;;  %1121 = vmatprep.subr.mxu0 %v452_v39  ;;  %v611_v31 = vld [vmem:[#allocation2 + $0xc20] sm:$0xff]  ;;  %v605_v35 = vld [vmem:[#allocation2 + $0xbf0] sm:$0xff]  ;;  %v342_v36 = vld [vmem:[#allocation2 + $0x3b8] sm:$0xff] }
 0x157   :  { %1192 = vmatprep.subr.mxu1 %v708_v40  ;;  %1122 = vmatpush2.msra.mxu0 %v451_v42  ;;  %v598_v37 = vld [vmem:[#allocation2 + $0xbb8] sm:$0xff]  ;;  %v341_v38 = vld [vmem:[#allocation2 + $0x3b0] sm:$0xff] }
 0x158   :  { %1193 = vmatpush2.msra.mxu1 %v707_v43  ;;  %1123 = vmatprep.subr.mxu0 %v444_v44  ;;  %v597_v39 = vld [vmem:[#allocation2 + $0xbb0] sm:$0xff]  ;;  %v334_v40 = vld [vmem:[#allocation2 + $0x378] sm:$0xff] }
 0x159   :  { %1194 = vmatprep.subr.mxu1 %v700_v45  ;;  %1124 = vmatpush2.msra.mxu0 %v443_v46  ;;  %v590_v42 = vld [vmem:[#allocation2 + $0xb78] sm:$0xff]  ;;  %v333_v43 = vld [vmem:[#allocation2 + $0x370] sm:$0xff] }
 0x15a   :  { %1195 = vmatpush2.msra.mxu1 %v699_v47  ;;  %1125 = vmatprep.subr.mxu0 %v436_v48  ;;  %v589_v44 = vld [vmem:[#allocation2 + $0xb70] sm:$0xff]  ;;  %v326_v45 = vld [vmem:[#allocation2 + $0x338] sm:$0xff] }
 0x15b   :  { %1196 = vmatprep.subr.mxu1 %v692_v49  ;;  %1126 = vmatpush2.msra.mxu0 %v435_v50  ;;  %v582_v46 = vld [vmem:[#allocation2 + $0xb38] sm:$0xff]  ;;  %v325_v47 = vld [vmem:[#allocation2 + $0x330] sm:$0xff] }
 0x15c   :  { %1197 = vmatpush2.msra.mxu1 %v691_v51  ;;  %1127 = vmatprep.subr.mxu0 %v428_v52  ;;  %v581_v48 = vld [vmem:[#allocation2 + $0xb30] sm:$0xff]  ;;  %v318_v49 = vld [vmem:[#allocation2 + $0x2f8] sm:$0xff] }
 0x15d   :  { %1198 = vmatprep.subr.mxu1 %v684_v53  ;;  %1128 = vmatpush2.msra.mxu0 %v427_v54  ;;  %v574_v50 = vld [vmem:[#allocation2 + $0xaf8] sm:$0xff]  ;;  %v317_v51 = vld [vmem:[#allocation2 + $0x2f0] sm:$0xff] }
 0x15e   :  { %1199 = vmatpush2.msra.mxu1 %v683_v55  ;;  %1129 = vmatprep.subr.mxu0 %v420_v56  ;;  %v573_v52 = vld [vmem:[#allocation2 + $0xaf0] sm:$0xff]  ;;  %v310_v53 = vld [vmem:[#allocation2 + $0x2b8] sm:$0xff] }
 0x15f   :  { %1200 = vmatprep.subr.mxu1 %v676_v57  ;;  %1130 = vmatpush2.msra.mxu0 %v419_v58  ;;  %v566_v54 = vld [vmem:[#allocation2 + $0xab8] sm:$0xff]  ;;  %v309_v55 = vld [vmem:[#allocation2 + $0x2b0] sm:$0xff] }
 0x160   :  { %1201 = vmatpush2.msra.mxu1 %v675_v59  ;;  %1131 = vmatprep.subr.mxu0 %v412_v60  ;;  %v565_v56 = vld [vmem:[#allocation2 + $0xab0] sm:$0xff]  ;;  %v302_v57 = vld [vmem:[#allocation2 + $0x278] sm:$0xff] }
 0x161   :  { %1202 = vmatprep.subr.mxu1 %v668_v61  ;;  %1132 = vmatpush2.msra.mxu0 %v411_v63  ;;  %v558_v58 = vld [vmem:[#allocation2 + $0xa78] sm:$0xff]  ;;  %v301_v59 = vld [vmem:[#allocation2 + $0x270] sm:$0xff] }
 0x162   :  { %1203 = vmatpush2.msra.mxu1 %v667_v0  ;;  %1133 = vmatprep.subr.mxu0 %v404_v1  ;;  %v557_v60 = vld [vmem:[#allocation2 + $0xa70] sm:$0xff]  ;;  %v294_v61 = vld [vmem:[#allocation2 + $0x238] sm:$0xff] }
 0x163   :  { %1204 = vmatprep.subr.mxu1 %v660_v2  ;;  %1134 = vmatpush2.msra.mxu0 %v403_v4  ;;  %v550_v63 = vld [vmem:[#allocation2 + $0xa38] sm:$0xff]  ;;  %v293_v0 = vld [vmem:[#allocation2 + $0x230] sm:$0xff] }
 0x164   :  { %1205 = vmatpush2.msra.mxu1 %v659_v5  ;;  %1135 = vmatprep.subr.mxu0 %v396_v6  ;;  %v549_v1 = vld [vmem:[#allocation2 + $0xa30] sm:$0xff]  ;;  %v286_v2 = vld [vmem:[#allocation2 + $0x1f8] sm:$0xff] }
 0x165   :  { %1206 = vmatprep.subr.mxu1 %v652_v7  ;;  %1136 = vmatpush2.msra.mxu0 %v395_v9  ;;  %v542_v4 = vld [vmem:[#allocation2 + $0x9f8] sm:$0xff]  ;;  %v285_v5 = vld [vmem:[#allocation2 + $0x1f0] sm:$0xff] }
 0x166   :  { %1207 = vmatpush2.msra.mxu1 %v651_v10  ;;  %1137 = vmatprep.subr.mxu0 %v388_v12  ;;  %v541_v6 = vld [vmem:[#allocation2 + $0x9f0] sm:$0xff]  ;;  %v278_v7 = vld [vmem:[#allocation2 + $0x1b8] sm:$0xff] }
 0x167   :  { %1208 = vmatprep.subr.mxu1 %v644_v13  ;;  %1138 = vmatpush2.msra.mxu0 %v387_v14  ;;  %v534_v9 = vld [vmem:[#allocation2 + $0x9b8] sm:$0xff]  ;;  %v277_v10 = vld [vmem:[#allocation2 + $0x1b0] sm:$0xff] }
 0x168   :  { %1209 = vmatpush2.msra.mxu1 %v643_v15  ;;  %1139 = vmatprep.subr.mxu0 %v380_v16  ;;  %v533_v12 = vld [vmem:[#allocation2 + $0x9b0] sm:$0xff]  ;;  %v270_v13 = vld [vmem:[#allocation2 + $0x178] sm:$0xff] }
 0x169   :  { %1210 = vmatprep.subr.mxu1 %v636_v17  ;;  %1140 = vmatpush2.msra.mxu0 %v379_v18  ;;  %v526_v14 = vld [vmem:[#allocation2 + $0x978] sm:$0xff]  ;;  %v269_v15 = vld [vmem:[#allocation2 + $0x170] sm:$0xff] }
 0x16a   :  { %1211 = vmatpush2.msra.mxu1 %v635_v19  ;;  %1141 = vmatprep.subr.mxu0 %v372_v20  ;;  %v525_v16 = vld [vmem:[#allocation2 + $0x970] sm:$0xff]  ;;  %v262_v17 = vld [vmem:[#allocation2 + $0x138] sm:$0xff] }
 0x16b   :  { %1212 = vmatprep.subr.mxu1 %v628_v21  ;;  %1142 = vmatpush2.msra.mxu0 %v371_v22  ;;  %v518_v18 = vld [vmem:[#allocation2 + $0x938] sm:$0xff]  ;;  %v261_v19 = vld [vmem:[#allocation2 + $0x130] sm:$0xff] }
 0x16c   :  { %1213 = vmatpush2.msra.mxu1 %v627_v23  ;;  %1143 = vmatprep.subr.mxu0 %v364_v24  ;;  %v517_v20 = vld [vmem:[#allocation2 + $0x930] sm:$0xff]  ;;  %v254_v21 = vld [vmem:[#allocation2 + $0xf8] sm:$0xff] }
 0x16d   :  { %1214 = vmatprep.subr.mxu1 %v620_v25  ;;  %1144 = vmatpush2.msra.mxu0 %v363_v26  ;;  %v510_v22 = vld [vmem:[#allocation2 + $0x8f8] sm:$0xff]  ;;  %v253_v23 = vld [vmem:[#allocation2 + $0xf0] sm:$0xff] }
 0x16e   :  { %1215 = vmatpush2.msra.mxu1 %v619_v27  ;;  %1145 = vmatprep.subr.mxu0 %v356_v28  ;;  %v509_v24 = vld [vmem:[#allocation2 + $0x8f0] sm:$0xff]  ;;  %v246_v25 = vld [vmem:[#allocation2 + $0xb8] sm:$0xff] }
 0x16f   :  { %1216 = vmatprep.subr.mxu1 %v612_v29  ;;  %1146 = vmatpush2.msra.mxu0 %v355_v30  ;;  %v502_v26 = vld [vmem:[#allocation2 + $0x8b8] sm:$0xff]  ;;  %v245_v27 = vld [vmem:[#allocation2 + $0xb0] sm:$0xff] }
 0x170   :  { %1147 = vmatprep.mubr.f32.mxu0 %v3698_v8  ;;  %1217 = vmatpush2.msra.mxu1 %v611_v31  ;;  %v501_v28 = vld [vmem:[#allocation2 + $0x8b0] sm:$0xff]  ;;  %v238_v29 = vld [vmem:[#allocation2 + $0x78] sm:$0xff] }
 0x171   :  { %1148 = vmatmul.mubr.f32.vlgmr.msra.gmra.mxu0 %v3692_v62  ;;  %1218 = vmatprep.mubr.f32.mxu1 %v3702_v11  ;;  %v494_v30 = vld [vmem:[#allocation2 + $0x878] sm:$0xff]  ;;  %v237_v31 = vld [vmem:[#allocation2 + $0x70] sm:$0xff] }
 0x172   :  { %1225 = vmatprep.subr.mxu0 %v350_v32  ;;  %1296 = vmatprep.subr.mxu1 %v606_v33  ;;  %v493_v32 = vld [vmem:[#allocation2 + $0x870] sm:$0xff]  ;;  %v230_v33 = vld [vmem:[#allocation2 + $0x38] sm:$0xff] }
 0x173   :  { %1219 = vmatmul.mubr.f32.vlgmr.msra.gmra.mxu1 %v3694_v3  ;;  %1226 = vmatpush1.msra.mxu0 %v349_v34  ;;  %v486_v34 = vld [vmem:[#allocation2 + $0x838] sm:$0xff] }
 0x174   :  { %1297 = vmatpush1.msra.mxu1 %v605_v35  ;;  %1227 = vmatprep.subr.mxu0 %v342_v36  ;;  %v229_v35 = vld [vmem:[#allocation2 + $0x30] sm:$0xff] }
 0x175   :  { %1298 = vmatprep.subr.mxu1 %v598_v37  ;;  %1228 = vmatpush1.msra.mxu0 %v341_v38  ;;  %v485_v36 = vld [vmem:[#allocation2 + $0x830] sm:$0xff]  ;;  %v478_v37 = vld [vmem:[#allocation2 + $0x7f8] sm:$0xff] }
 0x176   :  { %1299 = vmatpush1.msra.mxu1 %v597_v39  ;;  %1229 = vmatprep.subr.mxu0 %v334_v40  ;;  %v734_v38 = vld [vmem:[#allocation2 + $0xff8] sm:$0xff]  ;;  %v477_v39 = vld [vmem:[#allocation2 + $0x7f0] sm:$0xff] }
 0x177   :  { %1300 = vmatprep.subr.mxu1 %v590_v42  ;;  %1230 = vmatpush1.msra.mxu0 %v333_v43  ;;  %v733_v40 = vld [vmem:[#allocation2 + $0xff0] sm:$0xff]  ;;  %v470_v42 = vld [vmem:[#allocation2 + $0x7b8] sm:$0xff] }
 0x178   :  { %1301 = vmatpush1.msra.mxu1 %v589_v44  ;;  %1231 = vmatprep.subr.mxu0 %v326_v45  ;;  %v726_v43 = vld [vmem:[#allocation2 + $0xfb8] sm:$0xff]  ;;  %v469_v44 = vld [vmem:[#allocation2 + $0x7b0] sm:$0xff] }
 0x179   :  { %1302 = vmatprep.subr.mxu1 %v582_v46  ;;  %1232 = vmatpush1.msra.mxu0 %v325_v47  ;;  %v725_v45 = vld [vmem:[#allocation2 + $0xfb0] sm:$0xff]  ;;  %v462_v46 = vld [vmem:[#allocation2 + $0x778] sm:$0xff] }
 0x17a   :  { %1303 = vmatpush1.msra.mxu1 %v581_v48  ;;  %1233 = vmatprep.subr.mxu0 %v318_v49  ;;  %v718_v47 = vld [vmem:[#allocation2 + $0xf78] sm:$0xff]  ;;  %v461_v48 = vld [vmem:[#allocation2 + $0x770] sm:$0xff] }
 0x17b   :  { %1304 = vmatprep.subr.mxu1 %v574_v50  ;;  %1234 = vmatpush1.msra.mxu0 %v317_v51  ;;  %v717_v49 = vld [vmem:[#allocation2 + $0xf70] sm:$0xff]  ;;  %v454_v50 = vld [vmem:[#allocation2 + $0x738] sm:$0xff] }
 0x17c   :  { %1305 = vmatpush1.msra.mxu1 %v573_v52  ;;  %1235 = vmatprep.subr.mxu0 %v310_v53  ;;  %v710_v51 = vld [vmem:[#allocation2 + $0xf38] sm:$0xff]  ;;  %v453_v52 = vld [vmem:[#allocation2 + $0x730] sm:$0xff] }
 0x17d   :  { %1306 = vmatprep.subr.mxu1 %v566_v54  ;;  %1236 = vmatpush1.msra.mxu0 %v309_v55  ;;  %v709_v53 = vld [vmem:[#allocation2 + $0xf30] sm:$0xff]  ;;  %v446_v54 = vld [vmem:[#allocation2 + $0x6f8] sm:$0xff] }
 0x17e   :  { %1307 = vmatpush1.msra.mxu1 %v565_v56  ;;  %1237 = vmatprep.subr.mxu0 %v302_v57  ;;  %v702_v55 = vld [vmem:[#allocation2 + $0xef8] sm:$0xff]  ;;  %v445_v56 = vld [vmem:[#allocation2 + $0x6f0] sm:$0xff] }
 0x17f   :  { %1308 = vmatprep.subr.mxu1 %v558_v58  ;;  %1238 = vmatpush1.msra.mxu0 %v301_v59  ;;  %v701_v57 = vld [vmem:[#allocation2 + $0xef0] sm:$0xff]  ;;  %v438_v58 = vld [vmem:[#allocation2 + $0x6b8] sm:$0xff] }
 0x180   :  { %1309 = vmatpush1.msra.mxu1 %v557_v60  ;;  %1239 = vmatprep.subr.mxu0 %v294_v61  ;;  %v694_v59 = vld [vmem:[#allocation2 + $0xeb8] sm:$0xff]  ;;  %v437_v60 = vld [vmem:[#allocation2 + $0x6b0] sm:$0xff] }
 0x181   :  { %1310 = vmatprep.subr.mxu1 %v550_v63  ;;  %1240 = vmatpush1.msra.mxu0 %v293_v0  ;;  %v693_v61 = vld [vmem:[#allocation2 + $0xeb0] sm:$0xff]  ;;  %v430_v63 = vld [vmem:[#allocation2 + $0x678] sm:$0xff] }
 0x182   :  { %1311 = vmatpush1.msra.mxu1 %v549_v1  ;;  %1241 = vmatprep.subr.mxu0 %v286_v2  ;;  %v686_v0 = vld [vmem:[#allocation2 + $0xe78] sm:$0xff]  ;;  %v429_v1 = vld [vmem:[#allocation2 + $0x670] sm:$0xff] }
 0x183   :  { %1312 = vmatprep.subr.mxu1 %v542_v4  ;;  %1242 = vmatpush1.msra.mxu0 %v285_v5  ;;  %v685_v2 = vld [vmem:[#allocation2 + $0xe70] sm:$0xff]  ;;  %v422_v4 = vld [vmem:[#allocation2 + $0x638] sm:$0xff] }
 0x184   :  { %1313 = vmatpush1.msra.mxu1 %v541_v6  ;;  %1243 = vmatprep.subr.mxu0 %v278_v7  ;;  %v678_v5 = vld [vmem:[#allocation2 + $0xe38] sm:$0xff]  ;;  %v421_v6 = vld [vmem:[#allocation2 + $0x630] sm:$0xff] }
 0x185   :  { %1314 = vmatprep.subr.mxu1 %v534_v9  ;;  %1244 = vmatpush1.msra.mxu0 %v277_v10  ;;  %v677_v7 = vld [vmem:[#allocation2 + $0xe30] sm:$0xff]  ;;  %v414_v9 = vld [vmem:[#allocation2 + $0x5f8] sm:$0xff] }
 0x186   :  { %1315 = vmatpush1.msra.mxu1 %v533_v12  ;;  %1245 = vmatprep.subr.mxu0 %v270_v13  ;;  %v670_v10 = vld [vmem:[#allocation2 + $0xdf8] sm:$0xff]  ;;  %v413_v12 = vld [vmem:[#allocation2 + $0x5f0] sm:$0xff] }
 0x187   :  { %1316 = vmatprep.subr.mxu1 %v526_v14  ;;  %1246 = vmatpush1.msra.mxu0 %v269_v15  ;;  %v669_v13 = vld [vmem:[#allocation2 + $0xdf0] sm:$0xff]  ;;  %v406_v14 = vld [vmem:[#allocation2 + $0x5b8] sm:$0xff] }
 0x188   :  { %1317 = vmatpush1.msra.mxu1 %v525_v16  ;;  %1247 = vmatprep.subr.mxu0 %v262_v17  ;;  %v662_v15 = vld [vmem:[#allocation2 + $0xdb8] sm:$0xff]  ;;  %v405_v16 = vld [vmem:[#allocation2 + $0x5b0] sm:$0xff] }
 0x189   :  { %1318 = vmatprep.subr.mxu1 %v518_v18  ;;  %1248 = vmatpush1.msra.mxu0 %v261_v19  ;;  %v661_v17 = vld [vmem:[#allocation2 + $0xdb0] sm:$0xff]  ;;  %v398_v18 = vld [vmem:[#allocation2 + $0x578] sm:$0xff] }
 0x18a   :  { %1319 = vmatpush1.msra.mxu1 %v517_v20  ;;  %1249 = vmatprep.subr.mxu0 %v254_v21  ;;  %v654_v19 = vld [vmem:[#allocation2 + $0xd78] sm:$0xff]  ;;  %v397_v20 = vld [vmem:[#allocation2 + $0x570] sm:$0xff] }
 0x18b   :  { %1320 = vmatprep.subr.mxu1 %v510_v22  ;;  %1250 = vmatpush1.msra.mxu0 %v253_v23  ;;  %v653_v21 = vld [vmem:[#allocation2 + $0xd70] sm:$0xff]  ;;  %v390_v22 = vld [vmem:[#allocation2 + $0x538] sm:$0xff] }
 0x18c   :  { %1321 = vmatpush1.msra.mxu1 %v509_v24  ;;  %1251 = vmatprep.subr.mxu0 %v246_v25  ;;  %v646_v23 = vld [vmem:[#allocation2 + $0xd38] sm:$0xff]  ;;  %v389_v24 = vld [vmem:[#allocation2 + $0x530] sm:$0xff] }
 0x18d   :  { %1322 = vmatprep.subr.mxu1 %v502_v26  ;;  %1252 = vmatpush1.msra.mxu0 %v245_v27  ;;  %v645_v25 = vld [vmem:[#allocation2 + $0xd30] sm:$0xff]  ;;  %v382_v26 = vld [vmem:[#allocation2 + $0x4f8] sm:$0xff] }
 0x18e   :  { %1323 = vmatpush1.msra.mxu1 %v501_v28  ;;  %1253 = vmatprep.subr.mxu0 %v238_v29  ;;  %v638_v27 = vld [vmem:[#allocation2 + $0xcf8] sm:$0xff]  ;;  %v3717_v28 = vsub.s32 1, %v3686_v41  ;;  %v381_v29 = vld [vmem:[#allocation2 + $0x4f0] sm:$0xff] }
 0x18f   :  { %1324 = vmatprep.subr.mxu1 %v494_v30  ;;  %1254 = vmatpush1.msra.mxu0 %v237_v31  ;;  %v637_v30 = vld [vmem:[#allocation2 + $0xcf0] sm:$0xff]  ;;  %v374_v31 = vld [vmem:[#allocation2 + $0x4b8] sm:$0xff] }
 0x190   :  { %1325 = vmatpush1.msra.mxu1 %v493_v32  ;;  %1255 = vmatprep.subr.mxu0 %v230_v33  ;;  %v630_v32 = vld [vmem:[#allocation2 + $0xcb8] sm:$0xff]  ;;  %v373_v33 = vld [vmem:[#allocation2 + $0x4b0] sm:$0xff] }
 0x191   :  { %1326 = vmatprep.subr.mxu1 %v486_v34  ;;  %1256 = vmatpush1.msra.mxu0 %v229_v35  ;;  %v629_v34 = vld [vmem:[#allocation2 + $0xcb0] sm:$0xff]  ;;  %v3719_v35 = vld [vmem:[#allocation4] sm:$0xff] }
 0x192   :  { %1327 = vmatpush1.msra.mxu1 %v485_v36  ;;  %1257 = vmatprep.subr.mxu0 %v478_v37  ;;  %v366_v36 = vld [vmem:[#allocation2 + $0x478] sm:$0xff] }
 0x193   :  { %1328 = vmatprep.subr.mxu1 %v734_v38  ;;  %1258 = vmatpush2.msra.mxu0 %v477_v39  ;;  %v622_v37 = vld [vmem:[#allocation2 + $0xc78] sm:$0xff]  ;;  %v744_v38 = vrot.slane %v3719_v35, %v3717_v28  ;;  %v365_v39 = vld [vmem:[#allocation2 + $0x470] sm:$0xff] }
 0x194   :  { %1329 = vmatpush2.msra.mxu1 %v733_v40  ;;  %1259 = vmatprep.subr.mxu0 %v470_v42  ;;  %v621_v40 = vld [vmem:[#allocation2 + $0xc70] sm:$0xff] }
 0x195   :  { %1330 = vmatprep.subr.mxu1 %v726_v43  ;;  %1260 = vmatpush2.msra.mxu0 %v469_v44  ;;  %v358_v43 = vld [vmem:[#allocation2 + $0x438] sm:$0xff] }
 0x196   :  { %1331 = vmatpush2.msra.mxu1 %v725_v45  ;;  %1261 = vmatprep.subr.mxu0 %v462_v46  ;;  %v614_v44 = vld [vmem:[#allocation2 + $0xc38] sm:$0xff]  ;;  %v357_v45 = vld [vmem:[#allocation2 + $0x430] sm:$0xff] }
 0x197   :  { %1332 = vmatprep.subr.mxu1 %v718_v47  ;;  %1262 = vmatpush2.msra.mxu0 %v461_v48  ;;  %v613_v48 = vld [vmem:[#allocation2 + $0xc30] sm:$0xff] }
 0x198   :  { %1333 = vmatpush2.msra.mxu1 %v717_v49  ;;  %1263 = vmatprep.subr.mxu0 %v454_v50 }
 0x199   :  { %1334 = vmatprep.subr.mxu1 %v710_v51  ;;  %1264 = vmatpush2.msra.mxu0 %v453_v52  ;;  %v1502_v51 = vld [vmem:[#allocation7 + $0x1e8] sm:$0xff]  ;;  %v3728_v52 = vld [vmem:[#allocation6] sm:$0xff] }
 0x19a   :  { %1335 = vmatpush2.msra.mxu1 %v709_v53  ;;  %1265 = vmatprep.subr.mxu0 %v446_v54  ;;  %v1630_v54 = vld [vmem:[#allocation7 + $0x5e8] sm:$0xff] }
 0x19b   :  { %1336 = vmatprep.subr.mxu1 %v702_v55  ;;  %1266 = vmatpush2.msra.mxu0 %v445_v56  ;;  %v1501_v55 = vld [vmem:[#allocation7 + $0x1e0] sm:$0xff]  ;;  %v1400_v56 = vrot.slane %v3728_v52, %v3717_v28 }
 0x19c   :  { %1337 = vmatpush2.msra.mxu1 %v701_v57  ;;  %1267 = vmatprep.subr.mxu0 %v438_v58  ;;  %v1629_v57 = vld [vmem:[#allocation7 + $0x5e0] sm:$0xff]  ;;  %v1498_v58 = vld [vmem:[#allocation7 + $0x1c8] sm:$0xff] }
 0x19d   :  { %1338 = vmatprep.subr.mxu1 %v694_v59  ;;  %1268 = vmatpush2.msra.mxu0 %v437_v60  ;;  %v1626_v59 = vld [vmem:[#allocation7 + $0x5c8] sm:$0xff]  ;;  %v1497_v60 = vld [vmem:[#allocation7 + $0x1c0] sm:$0xff] }
 0x19e   :  { %1339 = vmatpush2.msra.mxu1 %v693_v61  ;;  %1269 = vmatprep.subr.mxu0 %v430_v63  ;;  %v1625_v61 = vld [vmem:[#allocation7 + $0x5c0] sm:$0xff]  ;;  %v1494_v63 = vld [vmem:[#allocation7 + $0x1a8] sm:$0xff] }
 0x19f   :  { %1340 = vmatprep.subr.mxu1 %v686_v0  ;;  %1270 = vmatpush2.msra.mxu0 %v429_v1  ;;  %v1493_v0 = vld [vmem:[#allocation7 + $0x1a0] sm:$0xff] }
 0x1a0   :  { %1341 = vmatpush2.msra.mxu1 %v685_v2  ;;  %1271 = vmatprep.subr.mxu0 %v422_v4  ;;  %v1621_v2 = vld [vmem:[#allocation7 + $0x5a0] sm:$0xff] }
 0x1a1   :  { %1342 = vmatprep.subr.mxu1 %v678_v5  ;;  %1272 = vmatpush2.msra.mxu0 %v421_v6  ;;  %v1489_v4 = vld [vmem:[#allocation7 + $0x180] sm:$0xff]  ;;  %v1618_v5 = vld [vmem:[#allocation7 + $0x588] sm:$0xff] }
 0x1a2   :  { %1343 = vmatpush2.msra.mxu1 %v677_v7  ;;  %1273 = vmatprep.subr.mxu0 %v414_v9  ;;  %v1486_v6 = vld [vmem:[#allocation7 + $0x168] sm:$0xff]  ;;  %v1617_v7 = vld [vmem:[#allocation7 + $0x580] sm:$0xff] }
 0x1a3   :  { %1344 = vmatprep.subr.mxu1 %v670_v10  ;;  %1274 = vmatpush2.msra.mxu0 %v413_v12  ;;  %v1485_v9 = vld [vmem:[#allocation7 + $0x160] sm:$0xff]  ;;  %v1614_v10 = vld [vmem:[#allocation7 + $0x568] sm:$0xff] }
 0x1a4   :  { %1345 = vmatpush2.msra.mxu1 %v669_v13  ;;  %1275 = vmatprep.subr.mxu0 %v406_v14  ;;  %v1482_v12 = vld [vmem:[#allocation7 + $0x148] sm:$0xff]  ;;  %v1613_v13 = vld [vmem:[#allocation7 + $0x560] sm:$0xff] }
 0x1a5   :  { %1346 = vmatprep.subr.mxu1 %v662_v15  ;;  %1276 = vmatpush2.msra.mxu0 %v405_v16  ;;  %v1481_v14 = vld [vmem:[#allocation7 + $0x140] sm:$0xff]  ;;  %v1610_v15 = vld [vmem:[#allocation7 + $0x548] sm:$0xff] }
 0x1a6   :  { %1347 = vmatpush2.msra.mxu1 %v661_v17  ;;  %1277 = vmatprep.subr.mxu0 %v398_v18  ;;  %v1478_v16 = vld [vmem:[#allocation7 + $0x128] sm:$0xff]  ;;  %v1609_v17 = vld [vmem:[#allocation7 + $0x540] sm:$0xff] }
 0x1a7   :  { %1348 = vmatprep.subr.mxu1 %v654_v19  ;;  %1278 = vmatpush2.msra.mxu0 %v397_v20  ;;  %v1477_v18 = vld [vmem:[#allocation7 + $0x120] sm:$0xff]  ;;  %v1606_v19 = vld [vmem:[#allocation7 + $0x528] sm:$0xff] }
 0x1a8   :  { %1349 = vmatpush2.msra.mxu1 %v653_v21  ;;  %1279 = vmatprep.subr.mxu0 %v390_v22  ;;  %v1474_v20 = vld [vmem:[#allocation7 + $0x108] sm:$0xff]  ;;  %v1605_v21 = vld [vmem:[#allocation7 + $0x520] sm:$0xff] }
 0x1a9   :  { %1350 = vmatprep.subr.mxu1 %v646_v23  ;;  %1280 = vmatpush2.msra.mxu0 %v389_v24  ;;  %v1473_v22 = vld [vmem:[#allocation7 + $0x100] sm:$0xff]  ;;  %v1602_v23 = vld [vmem:[#allocation7 + $0x508] sm:$0xff] }
 0x1aa   :  { %1351 = vmatpush2.msra.mxu1 %v645_v25  ;;  %1281 = vmatprep.subr.mxu0 %v382_v26  ;;  %v1470_v24 = vld [vmem:[#allocation7 + $0xe8] sm:$0xff]  ;;  %v1601_v25 = vld [vmem:[#allocation7 + $0x500] sm:$0xff] }
 0x1ab   :  { %1352 = vmatprep.subr.mxu1 %v638_v27  ;;  %1282 = vmatpush2.msra.mxu0 %v381_v29  ;;  %v1469_v26 = vld [vmem:[#allocation7 + $0xe0] sm:$0xff]  ;;  %v1598_v27 = vld [vmem:[#allocation7 + $0x4e8] sm:$0xff] }
 0x1ac   :  { %1353 = vmatpush2.msra.mxu1 %v637_v30  ;;  %1283 = vmatprep.subr.mxu0 %v374_v31  ;;  %v1466_v29 = vld [vmem:[#allocation7 + $0xc8] sm:$0xff]  ;;  %v1597_v30 = vld [vmem:[#allocation7 + $0x4e0] sm:$0xff] }
 0x1ad   :  { %1354 = vmatprep.subr.mxu1 %v630_v32  ;;  %v3723_v42 = vpop.f32.mrf.mxu0  ;;  %1284 = vmatpush2.msra.mxu0 %v373_v33  ;;  %v1465_v31 = vld [vmem:[#allocation7 + $0xc0] sm:$0xff]  ;;  %v1594_v32 = vld [vmem:[#allocation7 + $0x4c8] sm:$0xff] }
 0x1ae   :  { %1355 = vmatpush2.msra.mxu1 %v629_v34  ;;  %1285 = vmatprep.subr.mxu0 %v366_v36  ;;  %v1462_v33 = vld [vmem:[#allocation7 + $0xa8] sm:$0xff]  ;;  %v1593_v34 = vld [vmem:[#allocation7 + $0x4c0] sm:$0xff] }
 0x1af   :  { %1356 = vmatprep.subr.mxu1 %v622_v37  ;;  %v3725_v46 = vpop.f32.mrf.mxu1  ;;  %v867_v47 = vpop.f32.mrf.mxu0  ;;  %1286 = vmatpush2.msra.mxu0 %v365_v39  ;;  %v1461_v36 = vld [vmem:[#allocation7 + $0xa0] sm:$0xff]  ;;  %v1590_v37 = vld [vmem:[#allocation7 + $0x4a8] sm:$0xff] }
 0x1b0   :  { %1357 = vmatpush2.msra.mxu1 %v621_v40  ;;  %v868_v49 = vadd.f32 %v867_v47, %v744_v38  ;;  %1287 = vmatprep.subr.mxu0 %v358_v43  ;;  %v1458_v38 = vld [vmem:[#allocation7 + $0x88] sm:$0xff]  ;;  %v1589_v39 = vld [vmem:[#allocation7 + $0x4a0] sm:$0xff] }
 0x1b1   :  { %1358 = vmatprep.subr.mxu1 %v614_v44  ;;  %v938_v50 = vpop.f32.mrf.mxu1  ;;  %1288 = vmatpush2.msra.mxu0 %v357_v45  ;;  %v1457_v40 = vld [vmem:[#allocation7 + $0x80] sm:$0xff]  ;;  %v1586_v43 = vld [vmem:[#allocation7 + $0x488] sm:$0xff] }
 0x1b2   :  { %1289 = vmatprep.mubr.f32.mxu0 %v3698_v8  ;;  %v939_v53 = vadd.f32 %v938_v50, %v868_v49  ;;  %1359 = vmatpush2.msra.mxu1 %v613_v48  ;;  %v1454_v44 = vld [vmem:[#allocation7 + $0x68] sm:$0xff]  ;;  %v1585_v45 = vld [vmem:[#allocation7 + $0x480] sm:$0xff] }
 0x1b3   :  { %1360 = vmatprep.mubr.f32.mxu1 %v3702_v11  ;;  %1290 = vmatmul.mubr.f32.vlgmr.msra.gmra.mxu0 %v3692_v62  ;;  %v1622_v62 = vld [vmem:[#allocation7 + $0x5a8] sm:$0xff]  ;;  %v1453_v47 = vld [vmem:[#allocation7 + $0x60] sm:$0xff] }
 0x1b4   :  { %1361 = vmatmul.mubr.f32.vlgmr.msra.gmra.mxu1 %v3694_v3  ;;  %vm1368_vm0 = vcmp.ge.f32.partialorder %v939_v53, 0.0  ;;  %v1376_v8 = vmul.f32 0.2, %v939_v53  ;;  %1975 = vmatprep.subr.mxu0 %v1502_v51  ;;  %v1490_v3 = vld [vmem:[#allocation7 + $0x188] sm:$0xff]  ;;  %v1581_v50 = vld [vmem:[#allocation7 + $0x460] sm:$0xff] }
 0x1b5   :  { %2046 = vmatprep.subr.mxu1 %v1630_v54  ;;  %1976 = vmatpush1.msra.mxu0 %v1501_v55  ;;  %v1582_v48 = vld [vmem:[#allocation7 + $0x468] sm:$0xff]  ;;  %v1449_v51 = vld [vmem:[#allocation7 + $0x40] sm:$0xff] }
 0x1b6   :  { %v1384_v11 = vsel %vm1368_vm0, %v939_v53, %v1376_v8  ;;  %2047 = vmatpush1.msra.mxu1 %v1629_v57  ;;  %1977 = vmatprep.subr.mxu0 %v1498_v58  ;;  %v1450_v49 = vld [vmem:[#allocation7 + $0x48] sm:$0xff]  ;;  %v1577_v55 = vld [vmem:[#allocation7 + $0x440] sm:$0xff] }
 0x1b7   :  { %v3735_v1 = vadd.f32 %v1400_v56, %v1384_v11  ;;  %2048 = vmatprep.subr.mxu1 %v1626_v59  ;;  %1978 = vmatpush1.msra.mxu0 %v1497_v60  ;;  %v1578_v53 = vld [vmem:[#allocation7 + $0x448] sm:$0xff]  ;;  %v1445_v56 = vld [vmem:[#allocation7 + $0x20] sm:$0xff] }
 0x1b8   :  { %2049 = vmatpush1.msra.mxu1 %v1625_v61  ;;  %1979 = vmatprep.subr.mxu0 %v1494_v63  ;;  %v1446_v54 = vld [vmem:[#allocation7 + $0x28] sm:$0xff]  ;;  %v1573_v8 = vld [vmem:[#allocation7 + $0x420] sm:$0xff] }
 0x1b9   :  { %2039 = vmatprep.mubr.f32.mxu0 %v3735_v1  ;;  %1980 = vmatpush1.msra.mxu0 %v1493_v0  ;;  %v1574_v57 = vld [vmem:[#allocation7 + $0x428] sm:$0xff]  ;;  %v1441_v59 = vld [vmem:[#allocation7] sm:$0xff] }
 0x1ba   :  { %2050 = vmatprep.subr.mxu1 %v1622_v62  ;;  %1981 = vmatprep.subr.mxu0 %v1490_v3  ;;  %v1442_v58 = vld [vmem:[#allocation7 + $0x8] sm:$0xff]  ;;  %v1569_v63 = vld [vmem:[#allocation7 + $0x400] sm:$0xff] }
 0x1bb   :  { %2051 = vmatpush1.msra.mxu1 %v1621_v2  ;;  %1982 = vmatpush1.msra.mxu0 %v1489_v4  ;;  %v1570_v60 = vld [vmem:[#allocation7 + $0x408] sm:$0xff]  ;;  %v1565_v11 = vld [vmem:[#allocation7 + $0x3e0] sm:$0xff] }
 0x1bc   :  { %2052 = vmatprep.subr.mxu1 %v1618_v5  ;;  %1983 = vmatprep.subr.mxu0 %v1486_v6  ;;  %v1566_v61 = vld [vmem:[#allocation7 + $0x3e8] sm:$0xff]  ;;  %v1693_v3 = vld [vmem:[#allocation7 + $0x7e0] sm:$0xff] }
 0x1bd   :  { %2053 = vmatpush1.msra.mxu1 %v1617_v7  ;;  %1984 = vmatpush1.msra.mxu0 %v1485_v9  ;;  %v1694_v0 = vld [vmem:[#allocation7 + $0x7e8] sm:$0xff]  ;;  %v1561_v2 = vld [vmem:[#allocation7 + $0x3c0] sm:$0xff] }
 0x1be   :  { %2054 = vmatprep.subr.mxu1 %v1614_v10  ;;  %1985 = vmatprep.subr.mxu0 %v1482_v12  ;;  %v1562_v62 = vld [vmem:[#allocation7 + $0x3c8] sm:$0xff]  ;;  %v1689_v6 = vld [vmem:[#allocation7 + $0x7c0] sm:$0xff] }
 0x1bf   :  { %2055 = vmatpush1.msra.mxu1 %v1613_v13  ;;  %1986 = vmatpush1.msra.mxu0 %v1481_v14  ;;  %v1690_v4 = vld [vmem:[#allocation7 + $0x7c8] sm:$0xff]  ;;  %v1557_v7 = vld [vmem:[#allocation7 + $0x3a0] sm:$0xff] }
 0x1c0   :  { %2056 = vmatprep.subr.mxu1 %v1610_v15  ;;  %1987 = vmatprep.subr.mxu0 %v1478_v16  ;;  %v1558_v5 = vld [vmem:[#allocation7 + $0x3a8] sm:$0xff]  ;;  %v1685_v12 = vld [vmem:[#allocation7 + $0x7a0] sm:$0xff] }
 0x1c1   :  { %2057 = vmatpush1.msra.mxu1 %v1609_v17  ;;  %1988 = vmatpush1.msra.mxu0 %v1477_v18  ;;  %v1686_v9 = vld [vmem:[#allocation7 + $0x7a8] sm:$0xff]  ;;  %v1553_v13 = vld [vmem:[#allocation7 + $0x380] sm:$0xff] }
 0x1c2   :  { %2058 = vmatprep.subr.mxu1 %v1606_v19  ;;  %1989 = vmatprep.subr.mxu0 %v1474_v20  ;;  %v1554_v10 = vld [vmem:[#allocation7 + $0x388] sm:$0xff]  ;;  %v1681_v16 = vld [vmem:[#allocation7 + $0x780] sm:$0xff]  ;;  %v3739_v19 = vsub.s32 0, %v3686_v41 }
 0x1c3   :  { %2059 = vmatpush1.msra.mxu1 %v1605_v21  ;;  %1990 = vmatpush1.msra.mxu0 %v1473_v22  ;;  %v1682_v14 = vld [vmem:[#allocation7 + $0x788] sm:$0xff]  ;;  %v1549_v17 = vld [vmem:[#allocation7 + $0x360] sm:$0xff] }
 0x1c4   :  { %2060 = vmatprep.subr.mxu1 %v1602_v23  ;;  %1991 = vmatprep.subr.mxu0 %v1470_v24  ;;  %v1550_v15 = vld [vmem:[#allocation7 + $0x368] sm:$0xff]  ;;  %v1677_v21 = vld [vmem:[#allocation7 + $0x760] sm:$0xff] }
 0x1c5   :  { %2061 = vmatpush1.msra.mxu1 %v1601_v25  ;;  %1992 = vmatpush1.msra.mxu0 %v1469_v26  ;;  %v1678_v18 = vld [vmem:[#allocation7 + $0x768] sm:$0xff]  ;;  %v1545_v22 = vld [vmem:[#allocation7 + $0x340] sm:$0xff] }
 0x1c6   :  { %2062 = vmatprep.subr.mxu1 %v1598_v27  ;;  %1993 = vmatprep.subr.mxu0 %v1466_v29  ;;  %v1546_v20 = vld [vmem:[#allocation7 + $0x348] sm:$0xff]  ;;  %v1673_v25 = vld [vmem:[#allocation7 + $0x740] sm:$0xff]  ;;  %v740_v29 = vrot.slane %v3719_v35, %v3739_v19 }
 0x1c7   :  { %2063 = vmatpush1.msra.mxu1 %v1597_v30  ;;  %1994 = vmatpush1.msra.mxu0 %v1465_v31  ;;  %v1674_v23 = vld [vmem:[#allocation7 + $0x748] sm:$0xff]  ;;  %v1541_v26 = vld [vmem:[#allocation7 + $0x320] sm:$0xff] }
 0x1c8   :  { %2064 = vmatprep.subr.mxu1 %v1594_v32  ;;  %1995 = vmatprep.subr.mxu0 %v1462_v33  ;;  %v1542_v24 = vld [vmem:[#allocation7 + $0x328] sm:$0xff]  ;;  %v1669_v31 = vld [vmem:[#allocation7 + $0x720] sm:$0xff] }
 0x1c9   :  { %2065 = vmatpush1.msra.mxu1 %v1593_v34  ;;  %1996 = vmatpush1.msra.mxu0 %v1461_v36  ;;  %v1670_v27 = vld [vmem:[#allocation7 + $0x728] sm:$0xff]  ;;  %v1537_v32 = vld [vmem:[#allocation7 + $0x300] sm:$0xff] }
 0x1ca   :  { %2066 = vmatprep.subr.mxu1 %v1590_v37  ;;  %1997 = vmatprep.subr.mxu0 %v1458_v38  ;;  %v1538_v30 = vld [vmem:[#allocation7 + $0x308] sm:$0xff]  ;;  %v1665_v36 = vld [vmem:[#allocation7 + $0x700] sm:$0xff] }
 0x1cb   :  { %2067 = vmatpush1.msra.mxu1 %v1589_v39  ;;  %1998 = vmatpush1.msra.mxu0 %v1457_v40  ;;  %v1666_v33 = vld [vmem:[#allocation7 + $0x708] sm:$0xff]  ;;  %v1533_v37 = vld [vmem:[#allocation7 + $0x2e0] sm:$0xff]  ;;  %v866_v39 = vadd.f32 %v3723_v42, %v740_v29 }
 0x1cc   :  { %2068 = vmatprep.subr.mxu1 %v1586_v43  ;;  %1999 = vmatprep.subr.mxu0 %v1454_v44  ;;  %v1534_v34 = vld [vmem:[#allocation7 + $0x2e8] sm:$0xff]  ;;  %v1661_v43 = vld [vmem:[#allocation7 + $0x6e0] sm:$0xff] }
 0x1cd   :  { %2069 = vmatpush1.msra.mxu1 %v1585_v45  ;;  %2000 = vmatpush1.msra.mxu0 %v1453_v47  ;;  %v1662_v38 = vld [vmem:[#allocation7 + $0x6e8] sm:$0xff]  ;;  %v1529_v44 = vld [vmem:[#allocation7 + $0x2c0] sm:$0xff] }
 0x1ce   :  { %2070 = vmatprep.subr.mxu1 %v1582_v48  ;;  %2001 = vmatprep.subr.mxu0 %v1450_v49  ;;  %v1530_v40 = vld [vmem:[#allocation7 + $0x2c8] sm:$0xff]  ;;  %v1657_v48 = vld [vmem:[#allocation7 + $0x6c0] sm:$0xff] }
 0x1cf   :  { %2071 = vmatpush1.msra.mxu1 %v1581_v50  ;;  %2002 = vmatpush1.msra.mxu0 %v1449_v51  ;;  %v1658_v45 = vld [vmem:[#allocation7 + $0x6c8] sm:$0xff]  ;;  %v1525_v49 = vld [vmem:[#allocation7 + $0x2a0] sm:$0xff]  ;;  %v937_v51 = vadd.f32 %v3725_v46, %v866_v39 }
 0x1d0   :  { %2072 = vmatprep.subr.mxu1 %v1578_v53  ;;  %2003 = vmatprep.subr.mxu0 %v1446_v54  ;;  %v1526_v47 = vld [vmem:[#allocation7 + $0x2a8] sm:$0xff]  ;;  %v3746_v53 = vsub.s32 2, %v3686_v41  ;;  %v1653_v54 = vld [vmem:[#allocation7 + $0x6a0] sm:$0xff] }
 0x1d1   :  { %2073 = vmatpush1.msra.mxu1 %v1577_v55  ;;  %2004 = vmatpush1.msra.mxu0 %v1445_v56  ;;  %v1654_v50 = vld [vmem:[#allocation7 + $0x6a8] sm:$0xff]  ;;  %v1521_v55 = vld [vmem:[#allocation7 + $0x280] sm:$0xff]  ;;  %vm1367_vm1 = vcmp.ge.f32.partialorder %v937_v51, 0.0 }
 0x1d2   :  { %2074 = vmatprep.subr.mxu1 %v1574_v57  ;;  %2005 = vmatprep.subr.mxu0 %v1442_v58  ;;  %v1522_v42 = vld [vmem:[#allocation7 + $0x288] sm:$0xff]  ;;  %v3749_v58 = vsub.s32 3, %v3686_v41  ;;  %v1517_v46 = vld [vmem:[#allocation7 + $0x260] sm:$0xff] }
 0x1d3   :  { %2075 = vmatpush1.msra.mxu1 %v1573_v8  ;;  %2006 = vmatpush1.msra.mxu0 %v1441_v59  ;;  %v1650_v56 = vld [vmem:[#allocation7 + $0x688] sm:$0xff]  ;;  %v1649_v8 = vld [vmem:[#allocation7 + $0x680] sm:$0xff] }
 0x1d4   :  { %2076 = vmatprep.subr.mxu1 %v1570_v60  ;;  %2007 = vmatprep.subr.mxu0 %v1566_v61  ;;  %v1518_v57 = vld [vmem:[#allocation7 + $0x268] sm:$0xff]  ;;  %v1375_v60 = vmul.f32 0.2, %v937_v51  ;;  %v1757_v29 = vld [vmem:[#allocation7 + $0x9e0] sm:$0xff] }
 0x1d5   :  { %2077 = vmatpush1.msra.mxu1 %v1569_v63  ;;  %2008 = vmatpush2.msra.mxu0 %v1565_v11  ;;  %v1646_v59 = vld [vmem:[#allocation7 + $0x668] sm:$0xff]  ;;  %v748_v63 = vrot.slane %v3719_v35, %v3746_v53  ;;  %v1645_v11 = vld [vmem:[#allocation7 + $0x660] sm:$0xff] }
 0x1d6   :  { %2078 = vmatprep.subr.mxu1 %v1694_v0  ;;  %2009 = vmatprep.subr.mxu0 %v1562_v62  ;;  %v1514_v61 = vld [vmem:[#allocation7 + $0x248] sm:$0xff]  ;;  %v1513_v0 = vld [vmem:[#allocation7 + $0x240] sm:$0xff] }
 0x1d7   :  { %2079 = vmatpush2.msra.mxu1 %v1693_v3  ;;  %2010 = vmatpush2.msra.mxu0 %v1561_v2  ;;  %v1642_v62 = vld [vmem:[#allocation7 + $0x648] sm:$0xff]  ;;  %v752_v2 = vrot.slane %v3719_v35, %v3749_v58  ;;  %v1749_v39 = vld [vmem:[#allocation7 + $0x9a0] sm:$0xff] }
 0x1d8   :  { %2080 = vmatprep.subr.mxu1 %v1690_v4  ;;  %2011 = vmatprep.subr.mxu0 %v1558_v5  ;;  %v1510_v3 = vld [vmem:[#allocation7 + $0x228] sm:$0xff]  ;;  %v1641_v4 = vld [vmem:[#allocation7 + $0x640] sm:$0xff]  ;;  %v1396_v5 = vrot.slane %v3728_v52, %v3739_v19 }
 0x1d9   :  { %2081 = vmatpush2.msra.mxu1 %v1689_v6  ;;  %2012 = vmatpush2.msra.mxu0 %v1557_v7  ;;  %v1509_v6 = vld [vmem:[#allocation7 + $0x220] sm:$0xff] }
 0x1da   :  { %2082 = vmatprep.subr.mxu1 %v1686_v9  ;;  %2013 = vmatprep.subr.mxu0 %v1554_v10  ;;  %v1638_v9 = vld [vmem:[#allocation7 + $0x628] sm:$0xff]  ;;  %v1383_v10 = vsel %vm1367_vm1, %v937_v51, %v1375_v60 }
 0x1db   :  { %2083 = vmatpush2.msra.mxu1 %v1685_v12  ;;  %2014 = vmatpush2.msra.mxu0 %v1553_v13  ;;  %v1506_v12 = vld [vmem:[#allocation7 + $0x208] sm:$0xff] }
 0x1dc   :  { %2084 = vmatprep.subr.mxu1 %v1682_v14  ;;  %2015 = vmatprep.subr.mxu0 %v1550_v15  ;;  %v1637_v14 = vld [vmem:[#allocation7 + $0x620] sm:$0xff]  ;;  %v1738_v51 = vld [vmem:[#allocation7 + $0x948] sm:$0xff] }
 0x1dd   :  { %2085 = vmatpush2.msra.mxu1 %v1681_v16  ;;  %2016 = vmatpush2.msra.mxu0 %v1549_v17  ;;  %v1505_v15 = vld [vmem:[#allocation7 + $0x200] sm:$0xff]  ;;  %v1634_v17 = vld [vmem:[#allocation7 + $0x608] sm:$0xff] }
 0x1de   :  { %2086 = vmatprep.subr.mxu1 %v1678_v18  ;;  %2017 = vmatprep.subr.mxu0 %v1546_v20  ;;  %v1870_v60 = vld [vmem:[#allocation7 + $0xd68] sm:$0xff] }
 0x1df   :  { %2087 = vmatpush2.msra.mxu1 %v1677_v21  ;;  %2018 = vmatpush2.msra.mxu0 %v1545_v22  ;;  %v1633_v21 = vld [vmem:[#allocation7 + $0x600] sm:$0xff]  ;;  %v3758_v22 = vadd.f32 %v1396_v5, %v1383_v10 }
 0x1e0   :  { %2088 = vmatprep.subr.mxu1 %v1674_v23  ;;  %2019 = vmatprep.subr.mxu0 %v1542_v24  ;;  %v1758_v24 = vld [vmem:[#allocation7 + $0x9e8] sm:$0xff]  ;;  %v1721_v5 = vld [vmem:[#allocation7 + $0x8c0] sm:$0xff] }
 0x1e1   :  { %2089 = vmatpush2.msra.mxu1 %v1673_v25  ;;  %2020 = vmatpush2.msra.mxu0 %v1541_v26  ;;  %v1886_v25 = vld [vmem:[#allocation7 + $0xde8] sm:$0xff]  ;;  %v1717_v10 = vld [vmem:[#allocation7 + $0x8a0] sm:$0xff] }
 0x1e2   :  { %2090 = vmatprep.subr.mxu1 %v1670_v27  ;;  %2021 = vmatprep.subr.mxu0 %v1538_v30  ;;  %v1408_v30 = vrot.slane %v3728_v52, %v3749_v58 }
 0x1e3   :  { %2091 = vmatpush2.msra.mxu1 %v1669_v31  ;;  %2022 = vmatpush2.msra.mxu0 %v1537_v32  ;;  %v1754_v31 = vld [vmem:[#allocation7 + $0x9c8] sm:$0xff]  ;;  %v1404_v32 = vrot.slane %v3728_v52, %v3746_v53  ;;  %v1885_v52 = vld [vmem:[#allocation7 + $0xde0] sm:$0xff] }
 0x1e4   :  { %2092 = vmatprep.subr.mxu1 %v1666_v33  ;;  %2023 = vmatprep.subr.mxu0 %v1534_v34  ;;  %v1753_v34 = vld [vmem:[#allocation7 + $0x9c0] sm:$0xff] }
 0x1e5   :  { %2093 = vmatpush2.msra.mxu1 %v1665_v36  ;;  %2024 = vmatpush2.msra.mxu0 %v1533_v37  ;;  %v1750_v37 = vld [vmem:[#allocation7 + $0x9a8] sm:$0xff] }
 0x1e6   :  { %2094 = vmatprep.subr.mxu1 %v1662_v38  ;;  %2025 = vmatprep.subr.mxu0 %v1530_v40 }
 0x1e7   :  { %2095 = vmatpush2.msra.mxu1 %v1661_v43  ;;  %2026 = vmatpush2.msra.mxu0 %v1529_v44  ;;  %v1746_v43 = vld [vmem:[#allocation7 + $0x988] sm:$0xff] }
 0x1e8   :  { %2096 = vmatprep.subr.mxu1 %v1658_v45  ;;  %2027 = vmatprep.subr.mxu0 %v1526_v47  ;;  %v1745_v45 = vld [vmem:[#allocation7 + $0x980] sm:$0xff]  ;;  %v1742_v47 = vld [vmem:[#allocation7 + $0x968] sm:$0xff] }
 0x1e9   :  { %2097 = vmatpush2.msra.mxu1 %v1657_v48  ;;  %2028 = vmatpush2.msra.mxu0 %v1525_v49  ;;  %v1882_v48 = vld [vmem:[#allocation7 + $0xdc8] sm:$0xff]  ;;  %v1741_v49 = vld [vmem:[#allocation7 + $0x960] sm:$0xff] }
 0x1ea   :  { %2098 = vmatprep.subr.mxu1 %v1654_v50  ;;  %2029 = vmatprep.subr.mxu0 %v1522_v42  ;;  %v1881_v50 = vld [vmem:[#allocation7 + $0xdc0] sm:$0xff]  ;;  %v1878_v42 = vld [vmem:[#allocation7 + $0xda8] sm:$0xff] }
 0x1eb   :  { %2099 = vmatpush2.msra.mxu1 %v1653_v54  ;;  %2030 = vmatpush2.msra.mxu0 %v1521_v55  ;;  %v1737_v54 = vld [vmem:[#allocation7 + $0x940] sm:$0xff] }
 0x1ec   :  { %2100 = vmatprep.subr.mxu1 %v1650_v56  ;;  %2031 = vmatprep.subr.mxu0 %v1518_v57  ;;  %v1877_v55 = vld [vmem:[#allocation7 + $0xda0] sm:$0xff]  ;;  %v1734_v56 = vld [vmem:[#allocation7 + $0x928] sm:$0xff] }
 0x1ed   :  { %2101 = vmatpush2.msra.mxu1 %v1649_v8  ;;  %2032 = vmatpush2.msra.mxu0 %v1517_v46  ;;  %v1874_v57 = vld [vmem:[#allocation7 + $0xd88] sm:$0xff]  ;;  %v1733_v8 = vld [vmem:[#allocation7 + $0x920] sm:$0xff] }
 0x1ee   :  { %2102 = vmatprep.subr.mxu1 %v1646_v59  ;;  %2033 = vmatprep.subr.mxu0 %v1514_v61  ;;  %v1873_v46 = vld [vmem:[#allocation7 + $0xd80] sm:$0xff]  ;;  %v1730_v59 = vld [vmem:[#allocation7 + $0x908] sm:$0xff] }
 0x1ef   :  { %v1007_v7 = vpop.f32.mrf.mxu0  ;;  %2103 = vmatpush2.msra.mxu1 %v1645_v11  ;;  %2034 = vmatpush2.msra.mxu0 %v1513_v0  ;;  %v1729_v61 = vld [vmem:[#allocation7 + $0x900] sm:$0xff]  ;;  %v1726_v11 = vld [vmem:[#allocation7 + $0x8e8] sm:$0xff] }
 0x1f0   :  { %v1008_v13 = vadd.f32 %v1007_v7, %v748_v63  ;;  %2104 = vmatprep.subr.mxu1 %v1642_v62  ;;  %2035 = vmatprep.subr.mxu0 %v1510_v3  ;;  %v1869_v63 = vld [vmem:[#allocation7 + $0xd60] sm:$0xff]  ;;  %v1866_v0 = vld [vmem:[#allocation7 + $0xd48] sm:$0xff] }
 0x1f1   :  { %v1078_v35 = vpop.f32.mrf.mxu1  ;;  %v1009_v16 = vpop.f32.mrf.mxu0  ;;  %2105 = vmatpush2.msra.mxu1 %v1641_v4  ;;  %2036 = vmatpush2.msra.mxu0 %v1509_v6  ;;  %v1725_v62 = vld [vmem:[#allocation7 + $0x8e0] sm:$0xff]  ;;  %v1862_v4 = vld [vmem:[#allocation7 + $0xd28] sm:$0xff] }
 0x1f2   :  { %v1079_v18 = vadd.f32 %v1078_v35, %v1008_v13  ;;  %v1010_v20 = vadd.f32 %v1009_v16, %v752_v2  ;;  %2106 = vmatprep.subr.mxu1 %v1638_v9  ;;  %2037 = vmatprep.subr.mxu0 %v1506_v12  ;;  %v1865_v3 = vld [vmem:[#allocation7 + $0xd40] sm:$0xff]  ;;  %v1722_v2 = vld [vmem:[#allocation7 + $0x8c8] sm:$0xff] }
 0x1f3   :  { %v1080_v23 = vpop.f32.mrf.mxu1  ;;  %2107 = vmatpush2.msra.mxu1 %v1637_v14  ;;  %2038 = vmatpush2.msra.mxu0 %v1505_v15  ;;  %v1861_v6 = vld [vmem:[#allocation7 + $0xd20] sm:$0xff]  ;;  %v1718_v7 = vld [vmem:[#allocation7 + $0x8a8] sm:$0xff] }
 0x1f4   :  { %vm1369_vm2 = vcmp.ge.f32.partialorder %v1079_v18, 0.0  ;;  %v1377_v26 = vmul.f32 0.2, %v1079_v18  ;;  %v1081_v27 = vadd.f32 %v1080_v23, %v1010_v20  ;;  %2108 = vmatprep.subr.mxu1 %v1634_v17  ;;  %2040 = vmatmul.mubr.f32.vlgmr.msra.gmra.mxu0 %v3758_v22  ;;  %v1858_v9 = vld [vmem:[#allocation7 + $0xd08] sm:$0xff]  ;;  %v1857_v12 = vld [vmem:[#allocation7 + $0xd00] sm:$0xff] }
 0x1f5   :  { %2109 = vmatpush2.msra.mxu1 %v1633_v21  ;;  %2117 = vmatprep.subr.mxu0 %v1758_v24  ;;  %v1714_v13 = vld [vmem:[#allocation7 + $0x888] sm:$0xff]  ;;  %v1713_v15 = vld [vmem:[#allocation7 + $0x880] sm:$0xff] }
 0x1f6   :  { %vm1370_vm3 = vcmp.ge.f32.partialorder %v1081_v27, 0.0  ;;  %v1378_v33 = vmul.f32 0.2, %v1081_v27  ;;  %2188 = vmatprep.subr.mxu1 %v1886_v25  ;;  %v1385_v36 = vsel %vm1369_vm2, %v1079_v18, %v1377_v26  ;;  %2118 = vmatpush1.msra.mxu0 %v1757_v29  ;;  %v1854_v14 = vld [vmem:[#allocation7 + $0xce8] sm:$0xff]  ;;  %v1853_v35 = vld [vmem:[#allocation7 + $0xce0] sm:$0xff] }
 0x1f7   :  { %2119 = vmatprep.subr.mxu0 %v1754_v31  ;;  %v3767_v44 = vadd.f32 %v1404_v32, %v1385_v36  ;;  %v1710_v16 = vld [vmem:[#allocation7 + $0x868] sm:$0xff]  ;;  %v1709_v18 = vld [vmem:[#allocation7 + $0x860] sm:$0xff] }
 0x1f8   :  { %v1386_v38 = vsel %vm1370_vm3, %v1081_v27, %v1378_v33  ;;  %2120 = vmatpush1.msra.mxu0 %v1753_v34  ;;  %v1850_v17 = vld [vmem:[#allocation7 + $0xcc8] sm:$0xff]  ;;  %v1849_v20 = vld [vmem:[#allocation7 + $0xcc0] sm:$0xff] }
 0x1f9   :  { %v3765_v40 = vadd.f32 %v1408_v30, %v1386_v38  ;;  %2121 = vmatprep.subr.mxu0 %v1750_v37  ;;  %v1706_v21 = vld [vmem:[#allocation7 + $0x848] sm:$0xff]  ;;  %v1705_v24 = vld [vmem:[#allocation7 + $0x840] sm:$0xff] }
 0x1fa   :  { %2122 = vmatpush1.msra.mxu0 %v1749_v39  ;;  %v1846_v23 = vld [vmem:[#allocation7 + $0xca8] sm:$0xff]  ;;  %v1845_v25 = vld [vmem:[#allocation7 + $0xca0] sm:$0xff] }
 0x1fb   :  { %2110 = vmatprep.mubr.f32.mxu1 %v3765_v40  ;;  %2123 = vmatprep.subr.mxu0 %v1746_v43  ;;  %v1702_v26 = vld [vmem:[#allocation7 + $0x828] sm:$0xff]  ;;  %v1701_v29 = vld [vmem:[#allocation7 + $0x820] sm:$0xff] }
 0x1fc   :  { %2111 = vmatmul.mubr.f32.vlgmr.msra.gmra.mxu1 %v3767_v44  ;;  %2124 = vmatpush1.msra.mxu0 %v1745_v45  ;;  %v1842_v27 = vld [vmem:[#allocation7 + $0xc88] sm:$0xff]  ;;  %v1841_v30 = vld [vmem:[#allocation7 + $0xc80] sm:$0xff] }
 0x1fd   :  { %2189 = vmatpush1.msra.mxu1 %v1885_v52  ;;  %2125 = vmatprep.subr.mxu0 %v1742_v47  ;;  %v1698_v31 = vld [vmem:[#allocation7 + $0x808] sm:$0xff]  ;;  %v1697_v33 = vld [vmem:[#allocation7 + $0x800] sm:$0xff] }
 0x1fe   :  { %2190 = vmatprep.subr.mxu1 %v1882_v48  ;;  %2126 = vmatpush1.msra.mxu0 %v1741_v49  ;;  %v1838_v32 = vld [vmem:[#allocation7 + $0xc68] sm:$0xff]  ;;  %v1837_v34 = vld [vmem:[#allocation7 + $0xc60] sm:$0xff] }
 0x1ff   :  { %2191 = vmatpush1.msra.mxu1 %v1881_v50  ;;  %2127 = vmatprep.subr.mxu0 %v1738_v51  ;;  %v1822_v36 = vld [vmem:[#allocation7 + $0xbe8] sm:$0xff]  ;;  %v1821_v38 = vld [vmem:[#allocation7 + $0xbe0] sm:$0xff] }
 0x200   :  { %2192 = vmatprep.subr.mxu1 %v1878_v42  ;;  %2128 = vmatpush1.msra.mxu0 %v1737_v54  ;;  %v1834_v37 = vld [vmem:[#allocation7 + $0xc48] sm:$0xff]  ;;  %v1833_v39 = vld [vmem:[#allocation7 + $0xc40] sm:$0xff] }
 0x201   :  { %2193 = vmatpush1.msra.mxu1 %v1877_v55  ;;  %2129 = vmatprep.subr.mxu0 %v1734_v56  ;;  %v1818_v43 = vld [vmem:[#allocation7 + $0xbc8] sm:$0xff]  ;;  %v1817_v52 = vld [vmem:[#allocation7 + $0xbc0] sm:$0xff] }
 0x202   :  { %2194 = vmatprep.subr.mxu1 %v1874_v57  ;;  %2130 = vmatpush1.msra.mxu0 %v1733_v8  ;;  %v1830_v45 = vld [vmem:[#allocation7 + $0xc28] sm:$0xff]  ;;  %v1829_v47 = vld [vmem:[#allocation7 + $0xc20] sm:$0xff] }
 0x203   :  { %2195 = vmatpush1.msra.mxu1 %v1873_v46  ;;  %2131 = vmatprep.subr.mxu0 %v1730_v59  ;;  %v1814_v48 = vld [vmem:[#allocation7 + $0xba8] sm:$0xff]  ;;  %v1813_v50 = vld [vmem:[#allocation7 + $0xba0] sm:$0xff] }
 0x204   :  { %2196 = vmatprep.subr.mxu1 %v1870_v60  ;;  %2132 = vmatpush1.msra.mxu0 %v1729_v61  ;;  %v1826_v49 = vld [vmem:[#allocation7 + $0xc08] sm:$0xff]  ;;  %v1825_v51 = vld [vmem:[#allocation7 + $0xc00] sm:$0xff] }
 0x205   :  { %2197 = vmatpush1.msra.mxu1 %v1869_v63  ;;  %2133 = vmatprep.subr.mxu0 %v1726_v11  ;;  %v1810_v42 = vld [vmem:[#allocation7 + $0xb88] sm:$0xff]  ;;  %v1809_v55 = vld [vmem:[#allocation7 + $0xb80] sm:$0xff] }
 0x206   :  { %2198 = vmatprep.subr.mxu1 %v1866_v0  ;;  %2134 = vmatpush1.msra.mxu0 %v1725_v62  ;;  %v1950_v54 = vld [vmem:[#allocation7 + $0xfe8] sm:$0xff]  ;;  %v1949_v56 = vld [vmem:[#allocation7 + $0xfe0] sm:$0xff] }
 0x207   :  { %2199 = vmatpush1.msra.mxu1 %v1865_v3  ;;  %2135 = vmatprep.subr.mxu0 %v1722_v2  ;;  %v1806_v57 = vld [vmem:[#allocation7 + $0xb68] sm:$0xff]  ;;  %v1805_v46 = vld [vmem:[#allocation7 + $0xb60] sm:$0xff] }
 0x208   :  { %2200 = vmatprep.subr.mxu1 %v1862_v4  ;;  %2136 = vmatpush1.msra.mxu0 %v1721_v5  ;;  %v1946_v8 = vld [vmem:[#allocation7 + $0xfc8] sm:$0xff]  ;;  %v1945_v59 = vld [vmem:[#allocation7 + $0xfc0] sm:$0xff] }
 0x209   :  { %2201 = vmatpush1.msra.mxu1 %v1861_v6  ;;  %2137 = vmatprep.subr.mxu0 %v1718_v7  ;;  %v1802_v60 = vld [vmem:[#allocation7 + $0xb48] sm:$0xff]  ;;  %v1801_v63 = vld [vmem:[#allocation7 + $0xb40] sm:$0xff] }
 0x20a   :  { %2202 = vmatprep.subr.mxu1 %v1858_v9  ;;  %2138 = vmatpush1.msra.mxu0 %v1717_v10  ;;  %v1942_v61 = vld [vmem:[#allocation7 + $0xfa8] sm:$0xff]  ;;  %v1941_v11 = vld [vmem:[#allocation7 + $0xfa0] sm:$0xff] }
 0x20b   :  { %2203 = vmatpush1.msra.mxu1 %v1857_v12  ;;  %2139 = vmatprep.subr.mxu0 %v1714_v13  ;;  %v1798_v0 = vld [vmem:[#allocation7 + $0xb28] sm:$0xff]  ;;  %v1797_v3 = vld [vmem:[#allocation7 + $0xb20] sm:$0xff] }
 0x20c   :  { %2204 = vmatprep.subr.mxu1 %v1854_v14  ;;  %2140 = vmatpush1.msra.mxu0 %v1713_v15  ;;  %v1938_v62 = vld [vmem:[#allocation7 + $0xf88] sm:$0xff]  ;;  %v1937_v2 = vld [vmem:[#allocation7 + $0xf80] sm:$0xff] }
 0x20d   :  { %2205 = vmatpush1.msra.mxu1 %v1853_v35  ;;  %2141 = vmatprep.subr.mxu0 %v1710_v16  ;;  %v1794_v4 = vld [vmem:[#allocation7 + $0xb08] sm:$0xff]  ;;  %v1793_v6 = vld [vmem:[#allocation7 + $0xb00] sm:$0xff] }
 0x20e   :  { %2206 = vmatprep.subr.mxu1 %v1850_v17  ;;  %2142 = vmatpush1.msra.mxu0 %v1709_v18  ;;  %v1934_v5 = vld [vmem:[#allocation7 + $0xf68] sm:$0xff]  ;;  %v1933_v7 = vld [vmem:[#allocation7 + $0xf60] sm:$0xff] }
 0x20f   :  { %2207 = vmatpush1.msra.mxu1 %v1849_v20  ;;  %2143 = vmatprep.subr.mxu0 %v1706_v21  ;;  %v1790_v9 = vld [vmem:[#allocation7 + $0xae8] sm:$0xff]  ;;  %v1789_v12 = vld [vmem:[#allocation7 + $0xae0] sm:$0xff] }
 0x210   :  { %2208 = vmatprep.subr.mxu1 %v1846_v23  ;;  %2144 = vmatpush1.msra.mxu0 %v1705_v24  ;;  %v1930_v10 = vld [vmem:[#allocation7 + $0xf48] sm:$0xff]  ;;  %v1929_v13 = vld [vmem:[#allocation7 + $0xf40] sm:$0xff] }
 0x211   :  { %2209 = vmatpush1.msra.mxu1 %v1845_v25  ;;  %2145 = vmatprep.subr.mxu0 %v1702_v26  ;;  %v1786_v14 = vld [vmem:[#allocation7 + $0xac8] sm:$0xff]  ;;  %v1785_v35 = vld [vmem:[#allocation7 + $0xac0] sm:$0xff]  ;;  %v755_v25 = vsub.s32 4, %v3686_v41 }
 0x212   :  { %2210 = vmatprep.subr.mxu1 %v1842_v27  ;;  %2146 = vmatpush1.msra.mxu0 %v1701_v29  ;;  %v1926_v15 = vld [vmem:[#allocation7 + $0xf28] sm:$0xff]  ;;  %v1925_v16 = vld [vmem:[#allocation7 + $0xf20] sm:$0xff] }
 0x213   :  { %2211 = vmatpush1.msra.mxu1 %v1841_v30  ;;  %2147 = vmatprep.subr.mxu0 %v1698_v31  ;;  %v1782_v17 = vld [vmem:[#allocation7 + $0xaa8] sm:$0xff]  ;;  %v1781_v20 = vld [vmem:[#allocation7 + $0xaa0] sm:$0xff]  ;;  %v759_v31 = vsub.s32 5, %v3686_v41 }
 0x214   :  { %2212 = vmatprep.subr.mxu1 %v1838_v32  ;;  %2148 = vmatpush1.msra.mxu0 %v1697_v33  ;;  %v1922_v18 = vld [vmem:[#allocation7 + $0xf08] sm:$0xff]  ;;  %v1921_v21 = vld [vmem:[#allocation7 + $0xf00] sm:$0xff] }
 0x215   :  { %2213 = vmatpush1.msra.mxu1 %v1837_v34  ;;  %2149 = vmatprep.subr.mxu0 %v1822_v36  ;;  %v1778_v23 = vld [vmem:[#allocation7 + $0xa88] sm:$0xff]  ;;  %v1777_v26 = vld [vmem:[#allocation7 + $0xa80] sm:$0xff] }
 0x216   :  { %2214 = vmatprep.subr.mxu1 %v1834_v37  ;;  %2150 = vmatpush2.msra.mxu0 %v1821_v38  ;;  %v1918_v24 = vld [vmem:[#allocation7 + $0xee8] sm:$0xff]  ;;  %v1917_v27 = vld [vmem:[#allocation7 + $0xee0] sm:$0xff]  ;;  %v3773_v37 = vld [vmem:[#allocation4] sm:$0xff] }
 0x217   :  { %2215 = vmatpush1.msra.mxu1 %v1833_v39  ;;  %2151 = vmatprep.subr.mxu0 %v1818_v43  ;;  %v1774_v29 = vld [vmem:[#allocation7 + $0xa68] sm:$0xff]  ;;  %v1773_v32 = vld [vmem:[#allocation7 + $0xa60] sm:$0xff]  ;;  %v756_v38 = vrot.slane %v3773_v37, %v755_v25 }
 0x218   :  { %2216 = vmatprep.subr.mxu1 %v1830_v45  ;;  %2152 = vmatpush2.msra.mxu0 %v1817_v52  ;;  %v1914_v30 = vld [vmem:[#allocation7 + $0xec8] sm:$0xff]  ;;  %v1913_v33 = vld [vmem:[#allocation7 + $0xec0] sm:$0xff] }
 0x219   :  { %2217 = vmatpush1.msra.mxu1 %v1829_v47  ;;  %2153 = vmatprep.subr.mxu0 %v1814_v48  ;;  %v1770_v34 = vld [vmem:[#allocation7 + $0xa48] sm:$0xff]  ;;  %v1769_v39 = vld [vmem:[#allocation7 + $0xa40] sm:$0xff]  ;;  %v760_v47 = vrot.slane %v3773_v37, %v759_v31 }
 0x21a   :  { %2218 = vmatprep.subr.mxu1 %v1826_v49  ;;  %2154 = vmatpush2.msra.mxu0 %v1813_v50  ;;  %v1910_v36 = vld [vmem:[#allocation7 + $0xea8] sm:$0xff]  ;;  %v1909_v43 = vld [vmem:[#allocation7 + $0xea0] sm:$0xff] }
 0x21b   :  { %2219 = vmatpush1.msra.mxu1 %v1825_v51  ;;  %2155 = vmatprep.subr.mxu0 %v1810_v42  ;;  %v1766_v45 = vld [vmem:[#allocation7 + $0xa28] sm:$0xff]  ;;  %v1765_v48 = vld [vmem:[#allocation7 + $0xa20] sm:$0xff] }
 0x21c   :  { %2220 = vmatprep.subr.mxu1 %v1950_v54  ;;  %2156 = vmatpush2.msra.mxu0 %v1809_v55  ;;  %v1906_v52 = vld [vmem:[#allocation7 + $0xe88] sm:$0xff]  ;;  %v1905_v49 = vld [vmem:[#allocation7 + $0xe80] sm:$0xff] }
 0x21d   :  { %2221 = vmatpush2.msra.mxu1 %v1949_v56  ;;  %2157 = vmatprep.subr.mxu0 %v1806_v57  ;;  %v1762_v51 = vld [vmem:[#allocation7 + $0xa08] sm:$0xff]  ;;  %v1761_v55 = vld [vmem:[#allocation7 + $0xa00] sm:$0xff] }
 0x21e   :  { %2222 = vmatprep.subr.mxu1 %v1946_v8  ;;  %2158 = vmatpush2.msra.mxu0 %v1805_v46  ;;  %v1902_v42 = vld [vmem:[#allocation7 + $0xe68] sm:$0xff]  ;;  %v1901_v56 = vld [vmem:[#allocation7 + $0xe60] sm:$0xff]  ;;  %v1504_v46 = vld [vmem:[#allocation7 + $0x1f8] sm:$0xff] }
 0x21f   :  { %2223 = vmatpush2.msra.mxu1 %v1945_v59  ;;  %2159 = vmatprep.subr.mxu0 %v1802_v60  ;;  %v1898_v59 = vld [vmem:[#allocation7 + $0xe48] sm:$0xff] }
 0x220   :  { %2224 = vmatprep.subr.mxu1 %v1942_v61  ;;  %2160 = vmatpush2.msra.mxu0 %v1801_v63  ;;  %v1897_v63 = vld [vmem:[#allocation7 + $0xe40] sm:$0xff] }
 0x221   :  { %2225 = vmatpush2.msra.mxu1 %v1941_v11  ;;  %2161 = vmatprep.subr.mxu0 %v1798_v0  ;;  %v1894_v0 = vld [vmem:[#allocation7 + $0xe28] sm:$0xff] }
 0x222   :  { %2226 = vmatprep.subr.mxu1 %v1938_v62  ;;  %2162 = vmatpush2.msra.mxu0 %v1797_v3 }
 0x223   :  { %2227 = vmatpush2.msra.mxu1 %v1937_v2  ;;  %2163 = vmatprep.subr.mxu0 %v1794_v4  ;;  %v1893_v2 = vld [vmem:[#allocation7 + $0xe20] sm:$0xff]  ;;  %v3779_v4 = vld [vmem:[#allocation6] sm:$0xff] }
 0x224   :  { %2228 = vmatprep.subr.mxu1 %v1934_v5  ;;  %2164 = vmatpush2.msra.mxu0 %v1793_v6  ;;  %v1416_v5 = vrot.slane %v3779_v4, %v759_v31  ;;  %v1890_v6 = vld [vmem:[#allocation7 + $0xe08] sm:$0xff]  ;;  %v1479_v31 = vld [vmem:[#allocation7 + $0x130] sm:$0xff] }
 0x225   :  { %2229 = vmatpush2.msra.mxu1 %v1933_v7  ;;  %2165 = vmatprep.subr.mxu0 %v1790_v9  ;;  %v1412_v7 = vrot.slane %v3779_v4, %v755_v25  ;;  %v1488_v25 = vld [vmem:[#allocation7 + $0x178] sm:$0xff] }
 0x226   :  { %2230 = vmatprep.subr.mxu1 %v1930_v10  ;;  %2166 = vmatpush2.msra.mxu0 %v1789_v12  ;;  %v1889_v10 = vld [vmem:[#allocation7 + $0xe00] sm:$0xff] }
 0x227   :  { %2231 = vmatpush2.msra.mxu1 %v1929_v13  ;;  %2167 = vmatprep.subr.mxu0 %v1786_v14  ;;  %v1632_v13 = vld [vmem:[#allocation7 + $0x5f8] sm:$0xff] }
 0x228   :  { %2232 = vmatprep.subr.mxu1 %v1926_v15  ;;  %2168 = vmatpush2.msra.mxu0 %v1785_v35 }
 0x229   :  { %2233 = vmatpush2.msra.mxu1 %v1925_v16  ;;  %2169 = vmatprep.subr.mxu0 %v1782_v17  ;;  %v1503_v16 = vld [vmem:[#allocation7 + $0x1f0] sm:$0xff]  ;;  %v1500_v17 = vld [vmem:[#allocation7 + $0x1d8] sm:$0xff] }
 0x22a   :  { %2234 = vmatprep.subr.mxu1 %v1922_v18  ;;  %2170 = vmatpush2.msra.mxu0 %v1781_v20  ;;  %v1499_v18 = vld [vmem:[#allocation7 + $0x1d0] sm:$0xff]  ;;  %v1496_v20 = vld [vmem:[#allocation7 + $0x1b8] sm:$0xff] }
 0x22b   :  { %2235 = vmatpush2.msra.mxu1 %v1921_v21  ;;  %2171 = vmatprep.subr.mxu0 %v1778_v23  ;;  %v1495_v21 = vld [vmem:[#allocation7 + $0x1b0] sm:$0xff]  ;;  %v1492_v23 = vld [vmem:[#allocation7 + $0x198] sm:$0xff] }
 0x22c   :  { %2236 = vmatprep.subr.mxu1 %v1918_v24  ;;  %2172 = vmatpush2.msra.mxu0 %v1777_v26  ;;  %v1491_v24 = vld [vmem:[#allocation7 + $0x190] sm:$0xff] }
 0x22d   :  { %2237 = vmatpush2.msra.mxu1 %v1917_v27  ;;  %2173 = vmatprep.subr.mxu0 %v1774_v29  ;;  %v1487_v26 = vld [vmem:[#allocation7 + $0x170] sm:$0xff]  ;;  %v1484_v27 = vld [vmem:[#allocation7 + $0x158] sm:$0xff] }
 0x22e   :  { %2238 = vmatprep.subr.mxu1 %v1914_v30  ;;  %2174 = vmatpush2.msra.mxu0 %v1773_v32  ;;  %v1483_v29 = vld [vmem:[#allocation7 + $0x150] sm:$0xff]  ;;  %v1480_v30 = vld [vmem:[#allocation7 + $0x138] sm:$0xff] }
 0x22f   :  { %2239 = vmatpush2.msra.mxu1 %v1913_v33  ;;  %2175 = vmatprep.subr.mxu0 %v1770_v34  ;;  %v1475_v32 = vld [vmem:[#allocation7 + $0x110] sm:$0xff]  ;;  %v1472_v33 = vld [vmem:[#allocation7 + $0xf8] sm:$0xff] }
 0x230   :  { %2240 = vmatprep.subr.mxu1 %v1910_v36  ;;  %2176 = vmatpush2.msra.mxu0 %v1769_v39  ;;  %v1471_v34 = vld [vmem:[#allocation7 + $0xf0] sm:$0xff]  ;;  %v1468_v36 = vld [vmem:[#allocation7 + $0xd8] sm:$0xff] }
 0x231   :  { %v1149_v50 = vpop.f32.mrf.mxu0  ;;  %2241 = vmatpush2.msra.mxu1 %v1909_v43  ;;  %2177 = vmatprep.subr.mxu0 %v1766_v45  ;;  %v1464_v39 = vld [vmem:[#allocation7 + $0xb8] sm:$0xff]  ;;  %v1463_v43 = vld [vmem:[#allocation7 + $0xb0] sm:$0xff] }
 0x232   :  { %v1150_v54 = vadd.f32 %v1149_v50, %v756_v38  ;;  %2242 = vmatprep.subr.mxu1 %v1906_v52  ;;  %2178 = vmatpush2.msra.mxu0 %v1765_v48  ;;  %v1467_v38 = vld [vmem:[#allocation7 + $0xd0] sm:$0xff]  ;;  %v1460_v45 = vld [vmem:[#allocation7 + $0x98] sm:$0xff] }
 0x233   :  { %v1220_v57 = vpop.f32.mrf.mxu1  ;;  %v1151_v8 = vpop.f32.mrf.mxu0  ;;  %2243 = vmatpush2.msra.mxu1 %v1905_v49  ;;  %2179 = vmatprep.subr.mxu0 %v1762_v51  ;;  %v1459_v52 = vld [vmem:[#allocation7 + $0x90] sm:$0xff]  ;;  %v1452_v49 = vld [vmem:[#allocation7 + $0x58] sm:$0xff] }
 0x234   :  { %v1221_v60 = vadd.f32 %v1220_v57, %v1150_v54  ;;  %v1152_v61 = vadd.f32 %v1151_v8, %v760_v47  ;;  %2244 = vmatprep.subr.mxu1 %v1902_v42  ;;  %2180 = vmatpush2.msra.mxu0 %v1761_v55  ;;  %v1456_v47 = vld [vmem:[#allocation7 + $0x78] sm:$0xff]  ;;  %v1455_v48 = vld [vmem:[#allocation7 + $0x70] sm:$0xff] }
 0x235   :  { %v1222_v11 = vpop.f32.mrf.mxu1  ;;  %2245 = vmatpush2.msra.mxu1 %v1901_v56  ;;  %2259 = vmatprep.subr.mxu0 %v1504_v46  ;;  %v1451_v50 = vld [vmem:[#allocation7 + $0x50] sm:$0xff]  ;;  %v1448_v51 = vld [vmem:[#allocation7 + $0x38] sm:$0xff] }
 0x236   :  { %vm1371_vm4 = vcmp.ge.f32.partialorder %v1221_v60, 0.0  ;;  %v1379_v62 = vmul.f32 0.2, %v1221_v60  ;;  %v1223_v3 = vadd.f32 %v1222_v11, %v1152_v61  ;;  %2246 = vmatprep.subr.mxu1 %v1898_v59  ;;  %v1447_v42 = vld [vmem:[#allocation7 + $0x30] sm:$0xff]  ;;  %v1444_v54 = vld [vmem:[#allocation7 + $0x18] sm:$0xff] }
 0x237   :  { %2247 = vmatpush2.msra.mxu1 %v1897_v63  ;;  %v1443_v55 = vld [vmem:[#allocation7 + $0x10] sm:$0xff]  ;;  %v1568_v56 = vld [vmem:[#allocation7 + $0x3f8] sm:$0xff] }
 0x238   :  { %vm1372_vm5 = vcmp.ge.f32.partialorder %v1223_v3, 0.0  ;;  %v1380_v9 = vmul.f32 0.2, %v1223_v3  ;;  %2248 = vmatprep.subr.mxu1 %v1894_v0  ;;  %v1387_v12 = vsel %vm1371_vm4, %v1221_v60, %v1379_v62  ;;  %v1567_v57 = vld [vmem:[#allocation7 + $0x3f0] sm:$0xff]  ;;  %v1564_v8 = vld [vmem:[#allocation7 + $0x3d8] sm:$0xff] }
 0x239   :  { %2249 = vmatpush2.msra.mxu1 %v1893_v2  ;;  %v3787_v35 = vadd.f32 %v1412_v7, %v1387_v12  ;;  %v1563_v46 = vld [vmem:[#allocation7 + $0x3d0] sm:$0xff]  ;;  %v1560_v59 = vld [vmem:[#allocation7 + $0x3b8] sm:$0xff] }
 0x23a   :  { %v1388_v14 = vsel %vm1372_vm5, %v1223_v3, %v1380_v9  ;;  %2250 = vmatprep.subr.mxu1 %v1890_v6  ;;  %v1559_v60 = vld [vmem:[#allocation7 + $0x3b0] sm:$0xff]  ;;  %v1556_v61 = vld [vmem:[#allocation7 + $0x398] sm:$0xff] }
 0x23b   :  { %v3785_v15 = vadd.f32 %v1416_v5, %v1388_v14  ;;  %2251 = vmatpush2.msra.mxu1 %v1889_v10  ;;  %v1555_v63 = vld [vmem:[#allocation7 + $0x390] sm:$0xff]  ;;  %v1552_v11 = vld [vmem:[#allocation7 + $0x378] sm:$0xff] }
 0x23c   :  { %2330 = vmatprep.subr.mxu1 %v1632_v13  ;;  %v1551_v0 = vld [vmem:[#allocation7 + $0x370] sm:$0xff]  ;;  %v1548_v62 = vld [vmem:[#allocation7 + $0x358] sm:$0xff]  ;;  %v763_v13 = vsub.s32 6, %v3686_v41 }
 0x23d   :  { %2181 = vmatprep.mubr.f32.mxu0 %v3785_v15  ;;  %v1547_v3 = vld [vmem:[#allocation7 + $0x350] sm:$0xff]  ;;  %v1544_v2 = vld [vmem:[#allocation7 + $0x338] sm:$0xff] }
 0x23e   :  { %2182 = vmatmul.mubr.f32.vlgmr.msra.gmra.mxu0 %v3787_v35  ;;  %v1543_v5 = vld [vmem:[#allocation7 + $0x330] sm:$0xff]  ;;  %v1540_v6 = vld [vmem:[#allocation7 + $0x318] sm:$0xff] }
 0x23f   :  { %2260 = vmatpush1.msra.mxu0 %v1503_v16  ;;  %2323 = vmatprep.mubr.f32.mxu0 %v3735_v1  ;;  %v1476_v1 = vld [vmem:[#allocation7 + $0x118] sm:$0xff]  ;;  %v1539_v7 = vld [vmem:[#allocation7 + $0x310] sm:$0xff] }
 0x240   :  { %2261 = vmatprep.subr.mxu0 %v1500_v17  ;;  %v1536_v9 = vld [vmem:[#allocation7 + $0x2f8] sm:$0xff]  ;;  %v1535_v10 = vld [vmem:[#allocation7 + $0x2f0] sm:$0xff]  ;;  %v767_v17 = vsub.s32 7, %v3686_v41 }
 0x241   :  { %2262 = vmatpush1.msra.mxu0 %v1499_v18  ;;  %v1532_v12 = vld [vmem:[#allocation7 + $0x2d8] sm:$0xff]  ;;  %v1531_v14 = vld [vmem:[#allocation7 + $0x2d0] sm:$0xff] }
 0x242   :  { %2263 = vmatprep.subr.mxu0 %v1496_v20  ;;  %v1528_v16 = vld [vmem:[#allocation7 + $0x2b8] sm:$0xff]  ;;  %v1527_v18 = vld [vmem:[#allocation7 + $0x2b0] sm:$0xff]  ;;  %v764_v20 = vrot.slane %v3773_v37, %v763_v13 }
 0x243   :  { %2264 = vmatpush1.msra.mxu0 %v1495_v21  ;;  %v1524_v21 = vld [vmem:[#allocation7 + $0x298] sm:$0xff] }
 0x244   :  { %2265 = vmatprep.subr.mxu0 %v1492_v23  ;;  %v1523_v23 = vld [vmem:[#allocation7 + $0x290] sm:$0xff] }
 0x245   :  { %2266 = vmatpush1.msra.mxu0 %v1491_v24  ;;  %v768_v24 = vrot.slane %v3773_v37, %v767_v17 }
 0x246   :  { %2267 = vmatprep.subr.mxu0 %v1488_v25  ;;  %v1520_v25 = vld [vmem:[#allocation7 + $0x278] sm:$0xff] }
 0x247   :  { %2268 = vmatpush1.msra.mxu0 %v1487_v26 }
 0x248   :  { %2269 = vmatprep.subr.mxu0 %v1484_v27 }
 0x249   :  { %2270 = vmatpush1.msra.mxu0 %v1483_v29  ;;  %v1519_v29 = vld [vmem:[#allocation7 + $0x270] sm:$0xff] }
 0x24a   :  { %2271 = vmatprep.subr.mxu0 %v1480_v30 }
 0x24b   :  { %2272 = vmatpush1.msra.mxu0 %v1479_v31  ;;  %v1516_v31 = vld [vmem:[#allocation7 + $0x258] sm:$0xff] }
 0x24c   :  { %2273 = vmatprep.subr.mxu0 %v1476_v1  ;;  %v1515_v1 = vld [vmem:[#allocation7 + $0x250] sm:$0xff] }
 0x24d   :  { %2274 = vmatpush1.msra.mxu0 %v1475_v32 }
 0x24e   :  { %2275 = vmatprep.subr.mxu0 %v1472_v33 }
 0x24f   :  { %2276 = vmatpush1.msra.mxu0 %v1471_v34  ;;  %v1512_v34 = vld [vmem:[#allocation7 + $0x238] sm:$0xff] }
 0x250   :  { %2277 = vmatprep.subr.mxu0 %v1468_v36 }
 0x251   :  { %2278 = vmatpush1.msra.mxu0 %v1467_v38  ;;  %v1511_v38 = vld [vmem:[#allocation7 + $0x230] sm:$0xff] }
 0x252   :  { %2279 = vmatprep.subr.mxu0 %v1464_v39 }
 0x253   :  { %2280 = vmatpush1.msra.mxu0 %v1463_v43  ;;  %v1508_v43 = vld [vmem:[#allocation7 + $0x218] sm:$0xff] }
 0x254   :  { %2281 = vmatprep.subr.mxu0 %v1460_v45  ;;  %v1507_v45 = vld [vmem:[#allocation7 + $0x210] sm:$0xff] }
 0x255   :  { %2282 = vmatpush1.msra.mxu0 %v1459_v52  ;;  %v1424_v52 = vrot.slane %v3779_v4, %v767_v17  ;;  %v1731_v17 = vld [vmem:[#allocation7 + $0x910] sm:$0xff] }
 0x256   :  { %2283 = vmatprep.subr.mxu0 %v1456_v47  ;;  %v1420_v47 = vrot.slane %v3779_v4, %v763_v13  ;;  %v1628_v4 = vld [vmem:[#allocation7 + $0x5d8] sm:$0xff] }
 0x257   :  { %2284 = vmatpush1.msra.mxu0 %v1455_v48  ;;  %v1608_v13 = vld [vmem:[#allocation7 + $0x538] sm:$0xff] }
 0x258   :  { %2285 = vmatprep.subr.mxu0 %v1452_v49  ;;  %v1760_v49 = vld [vmem:[#allocation7 + $0x9f8] sm:$0xff] }
 0x259   :  { %2286 = vmatpush1.msra.mxu0 %v1451_v50 }
 0x25a   :  { %2287 = vmatprep.subr.mxu0 %v1448_v51  ;;  %v1759_v51 = vld [vmem:[#allocation7 + $0x9f0] sm:$0xff] }
 0x25b   :  { %2288 = vmatpush1.msra.mxu0 %v1447_v42 }
 0x25c   :  { %2289 = vmatprep.subr.mxu0 %v1444_v54  ;;  %v1756_v54 = vld [vmem:[#allocation7 + $0x9d8] sm:$0xff] }
 0x25d   :  { %2290 = vmatpush1.msra.mxu0 %v1443_v55 }
 0x25e   :  { %2291 = vmatprep.subr.mxu0 %v1568_v56  ;;  %v1755_v56 = vld [vmem:[#allocation7 + $0x9d0] sm:$0xff] }
 0x25f   :  { %2292 = vmatpush2.msra.mxu0 %v1567_v57 }
 0x260   :  { %2293 = vmatprep.subr.mxu0 %v1564_v8  ;;  %v1631_v8 = vld [vmem:[#allocation7 + $0x5f0] sm:$0xff] }
 0x261   :  { %2294 = vmatpush2.msra.mxu0 %v1563_v46  ;;  %v1752_v46 = vld [vmem:[#allocation7 + $0x9b8] sm:$0xff] }
 0x262   :  { %2295 = vmatprep.subr.mxu0 %v1560_v59  ;;  %v1627_v59 = vld [vmem:[#allocation7 + $0x5d0] sm:$0xff] }
 0x263   :  { %2296 = vmatpush2.msra.mxu0 %v1559_v60  ;;  %v1751_v60 = vld [vmem:[#allocation7 + $0x9b0] sm:$0xff] }
 0x264   :  { %2297 = vmatprep.subr.mxu0 %v1556_v61  ;;  %v1748_v61 = vld [vmem:[#allocation7 + $0x998] sm:$0xff] }
 0x265   :  { %2298 = vmatpush2.msra.mxu0 %v1555_v63  ;;  %v1623_v63 = vld [vmem:[#allocation7 + $0x5b0] sm:$0xff] }
 0x266   :  { %2299 = vmatprep.subr.mxu0 %v1552_v11  ;;  %v1747_v11 = vld [vmem:[#allocation7 + $0x990] sm:$0xff] }
 0x267   :  { %2300 = vmatpush2.msra.mxu0 %v1551_v0  ;;  %v1744_v0 = vld [vmem:[#allocation7 + $0x978] sm:$0xff] }
 0x268   :  { %2301 = vmatprep.subr.mxu0 %v1548_v62  ;;  %v1619_v62 = vld [vmem:[#allocation7 + $0x590] sm:$0xff] }
 0x269   :  { %2302 = vmatpush2.msra.mxu0 %v1547_v3  ;;  %v1743_v3 = vld [vmem:[#allocation7 + $0x970] sm:$0xff] }
 0x26a   :  { %2303 = vmatprep.subr.mxu0 %v1544_v2  ;;  %v1616_v2 = vld [vmem:[#allocation7 + $0x578] sm:$0xff] }
 0x26b   :  { %2304 = vmatpush2.msra.mxu0 %v1543_v5  ;;  %v1740_v5 = vld [vmem:[#allocation7 + $0x958] sm:$0xff] }
 0x26c   :  { %2305 = vmatprep.subr.mxu0 %v1540_v6  ;;  %v1739_v6 = vld [vmem:[#allocation7 + $0x950] sm:$0xff] }
 0x26d   :  { %2306 = vmatpush2.msra.mxu0 %v1539_v7  ;;  %v1612_v7 = vld [vmem:[#allocation7 + $0x558] sm:$0xff] }
 0x26e   :  { %2307 = vmatprep.subr.mxu0 %v1536_v9  ;;  %v1736_v9 = vld [vmem:[#allocation7 + $0x938] sm:$0xff] }
 0x26f   :  { %2308 = vmatpush2.msra.mxu0 %v1535_v10  ;;  %v1611_v10 = vld [vmem:[#allocation7 + $0x550] sm:$0xff] }
 0x270   :  { %2309 = vmatprep.subr.mxu0 %v1532_v12  ;;  %v1735_v12 = vld [vmem:[#allocation7 + $0x930] sm:$0xff] }
 0x271   :  { %2310 = vmatpush2.msra.mxu0 %v1531_v14  ;;  %v1732_v14 = vld [vmem:[#allocation7 + $0x918] sm:$0xff] }
 0x272   :  { %2311 = vmatprep.subr.mxu0 %v1528_v16  ;;  %v1607_v16 = vld [vmem:[#allocation7 + $0x530] sm:$0xff] }
 0x273   :  { %2312 = vmatpush2.msra.mxu0 %v1527_v18  ;;  %v1291_v26 = vpop.f32.mrf.mxu0  ;;  %v1604_v18 = vld [vmem:[#allocation7 + $0x518] sm:$0xff] }
 0x274   :  { %v1362_v27 = vpop.f32.mrf.mxu1  ;;  %2313 = vmatprep.subr.mxu0 %v1524_v21  ;;  %v1292_v30 = vadd.f32 %v1291_v26, %v764_v20  ;;  %v1728_v20 = vld [vmem:[#allocation7 + $0x8f8] sm:$0xff]  ;;  %v1603_v21 = vld [vmem:[#allocation7 + $0x510] sm:$0xff] }
 0x275   :  { %2314 = vmatpush2.msra.mxu0 %v1523_v23  ;;  %v1293_v41 = vpop.f32.mrf.mxu0  ;;  %v1727_v23 = vld [vmem:[#allocation7 + $0x8f0] sm:$0xff] }
 0x276   :  { %2315 = vmatprep.subr.mxu0 %v1520_v25  ;;  %v1363_v32 = vadd.f32 %v1362_v27, %v1292_v30  ;;  %v1294_v33 = vadd.f32 %v1293_v41, %v768_v24  ;;  %v1364_v36 = vpop.f32.mrf.mxu1  ;;  %v1600_v24 = vld [vmem:[#allocation7 + $0x4f8] sm:$0xff]  ;;  %v1599_v26 = vld [vmem:[#allocation7 + $0x4f0] sm:$0xff] }
 0x277   :  { %2316 = vmatpush2.msra.mxu0 %v1519_v29  ;;  %v1724_v25 = vld [vmem:[#allocation7 + $0x8d8] sm:$0xff]  ;;  %v1723_v27 = vld [vmem:[#allocation7 + $0x8d0] sm:$0xff] }
 0x278   :  { %2317 = vmatprep.subr.mxu0 %v1516_v31  ;;  %vm1373_vm6 = vcmp.ge.f32.partialorder %v1363_v32, 0.0  ;;  %v1381_v37 = vmul.f32 0.2, %v1363_v32  ;;  %v1365_v39 = vadd.f32 %v1364_v36, %v1294_v33  ;;  %v1596_v29 = vld [vmem:[#allocation7 + $0x4d8] sm:$0xff]  ;;  %v1595_v31 = vld [vmem:[#allocation7 + $0x4d0] sm:$0xff] }
 0x279   :  { %2318 = vmatpush2.msra.mxu0 %v1515_v1  ;;  %v1720_v30 = vld [vmem:[#allocation7 + $0x8b8] sm:$0xff]  ;;  %v1719_v41 = vld [vmem:[#allocation7 + $0x8b0] sm:$0xff] }
 0x27a   :  { %2319 = vmatprep.subr.mxu0 %v1512_v34  ;;  %vm1374_vm7 = vcmp.ge.f32.partialorder %v1365_v39, 0.0  ;;  %v1382_v48 = vmul.f32 0.2, %v1365_v39  ;;  %v1389_v50 = vsel %vm1373_vm6, %v1363_v32, %v1381_v37  ;;  %v1592_v1 = vld [vmem:[#allocation7 + $0x4b8] sm:$0xff]  ;;  %v1591_v33 = vld [vmem:[#allocation7 + $0x4b0] sm:$0xff] }
 0x27b   :  { %2320 = vmatpush2.msra.mxu0 %v1511_v38  ;;  %v3801_v57 = vadd.f32 %v1420_v47, %v1389_v50  ;;  %v1716_v32 = vld [vmem:[#allocation7 + $0x898] sm:$0xff]  ;;  %v1715_v34 = vld [vmem:[#allocation7 + $0x890] sm:$0xff] }
 0x27c   :  { %2321 = vmatprep.subr.mxu0 %v1508_v43  ;;  %v1390_v42 = vsel %vm1374_vm7, %v1365_v39, %v1382_v48  ;;  %v1588_v36 = vld [vmem:[#allocation7 + $0x498] sm:$0xff]  ;;  %v1587_v37 = vld [vmem:[#allocation7 + $0x490] sm:$0xff] }
 0x27d   :  { %2322 = vmatpush2.msra.mxu0 %v1507_v45  ;;  %v3798_v55 = vadd.f32 %v1424_v52, %v1390_v42  ;;  %v1712_v38 = vld [vmem:[#allocation7 + $0x878] sm:$0xff]  ;;  %v1711_v39 = vld [vmem:[#allocation7 + $0x870] sm:$0xff] }
 0x27e   :  { %2324 = vmatmul.mubr.f32.vlgmr.msra.gmra.mxu0 %v3758_v22  ;;  %2401 = vmatprep.subr.mxu0 %v1760_v49  ;;  %v1624_v22 = vld [vmem:[#allocation7 + $0x5b8] sm:$0xff]  ;;  %v1583_v52 = vld [vmem:[#allocation7 + $0x470] sm:$0xff] }
 0x27f   :  { %2402 = vmatpush1.msra.mxu0 %v1759_v51  ;;  %2465 = vmatprep.mubr.f32.mxu0 %v3785_v15  ;;  %v1620_v15 = vld [vmem:[#allocation7 + $0x598] sm:$0xff]  ;;  %v1707_v47 = vld [vmem:[#allocation7 + $0x850] sm:$0xff] }
 0x280   :  { %2252 = vmatprep.mubr.f32.mxu1 %v3798_v55  ;;  %2403 = vmatprep.subr.mxu0 %v1756_v54  ;;  %v1584_v43 = vld [vmem:[#allocation7 + $0x478] sm:$0xff]  ;;  %v1579_v50 = vld [vmem:[#allocation7 + $0x450] sm:$0xff] }
 0x281   :  { %2253 = vmatmul.mubr.f32.vlgmr.msra.gmra.mxu1 %v3801_v57  ;;  %2404 = vmatpush1.msra.mxu0 %v1755_v56  ;;  %v1708_v45 = vld [vmem:[#allocation7 + $0x858] sm:$0xff]  ;;  %v1703_v51 = vld [vmem:[#allocation7 + $0x830] sm:$0xff] }
 0x282   :  { %2331 = vmatpush1.msra.mxu1 %v1631_v8  ;;  %2394 = vmatprep.mubr.f32.mxu1 %v3765_v40  ;;  %v1615_v40 = vld [vmem:[#allocation7 + $0x570] sm:$0xff]  ;;  %v1580_v48 = vld [vmem:[#allocation7 + $0x458] sm:$0xff] }
 0x283   :  { %2332 = vmatprep.subr.mxu1 %v1628_v4  ;;  %2405 = vmatprep.subr.mxu0 %v1752_v46  ;;  %v1704_v49 = vld [vmem:[#allocation7 + $0x838] sm:$0xff]  ;;  %v1575_v56 = vld [vmem:[#allocation7 + $0x430] sm:$0xff] }
 0x284   :  { %2333 = vmatpush1.msra.mxu1 %v1627_v59  ;;  %2406 = vmatpush1.msra.mxu0 %v1751_v60  ;;  %v1576_v42 = vld [vmem:[#allocation7 + $0x438] sm:$0xff]  ;;  %v1699_v8 = vld [vmem:[#allocation7 + $0x810] sm:$0xff] }
 0x285   :  { %2334 = vmatprep.subr.mxu1 %v1624_v22  ;;  %2407 = vmatprep.subr.mxu0 %v1748_v61  ;;  %v1700_v54 = vld [vmem:[#allocation7 + $0x818] sm:$0xff]  ;;  %v1571_v59 = vld [vmem:[#allocation7 + $0x410] sm:$0xff] }
 0x286   :  { %2335 = vmatpush1.msra.mxu1 %v1623_v63  ;;  %2408 = vmatpush1.msra.mxu0 %v1747_v11  ;;  %v1572_v4 = vld [vmem:[#allocation7 + $0x418] sm:$0xff]  ;;  %v1823_v60 = vld [vmem:[#allocation7 + $0xbf0] sm:$0xff] }
 0x287   :  { %2336 = vmatprep.subr.mxu1 %v1620_v15  ;;  %2409 = vmatprep.subr.mxu0 %v1744_v0  ;;  %v1824_v46 = vld [vmem:[#allocation7 + $0xbf8] sm:$0xff]  ;;  %v1695_v63 = vld [vmem:[#allocation7 + $0x7f0] sm:$0xff] }
 0x288   :  { %2337 = vmatpush1.msra.mxu1 %v1619_v62  ;;  %2410 = vmatpush1.msra.mxu0 %v1743_v3  ;;  %v1696_v22 = vld [vmem:[#allocation7 + $0x7f8] sm:$0xff]  ;;  %v1819_v11 = vld [vmem:[#allocation7 + $0xbd0] sm:$0xff] }
 0x289   :  { %2338 = vmatprep.subr.mxu1 %v1616_v2  ;;  %2411 = vmatprep.subr.mxu0 %v1740_v5  ;;  %v1820_v61 = vld [vmem:[#allocation7 + $0xbd8] sm:$0xff]  ;;  %v1691_v62 = vld [vmem:[#allocation7 + $0x7d0] sm:$0xff] }
 0x28a   :  { %2339 = vmatpush1.msra.mxu1 %v1615_v40  ;;  %2412 = vmatpush1.msra.mxu0 %v1739_v6  ;;  %v1692_v15 = vld [vmem:[#allocation7 + $0x7d8] sm:$0xff]  ;;  %v1815_v3 = vld [vmem:[#allocation7 + $0xbb0] sm:$0xff] }
 0x28b   :  { %2340 = vmatprep.subr.mxu1 %v1612_v7  ;;  %2413 = vmatprep.subr.mxu0 %v1736_v9  ;;  %v1816_v0 = vld [vmem:[#allocation7 + $0xbb8] sm:$0xff]  ;;  %v1687_v40 = vld [vmem:[#allocation7 + $0x7b0] sm:$0xff] }
 0x28c   :  { %2341 = vmatpush1.msra.mxu1 %v1611_v10  ;;  %2414 = vmatpush1.msra.mxu0 %v1735_v12  ;;  %v1688_v2 = vld [vmem:[#allocation7 + $0x7b8] sm:$0xff]  ;;  %v1811_v6 = vld [vmem:[#allocation7 + $0xb90] sm:$0xff] }
 0x28d   :  { %2342 = vmatprep.subr.mxu1 %v1608_v13  ;;  %2415 = vmatprep.subr.mxu0 %v1732_v14  ;;  %v1812_v5 = vld [vmem:[#allocation7 + $0xb98] sm:$0xff]  ;;  %v1683_v10 = vld [vmem:[#allocation7 + $0x790] sm:$0xff] }
 0x28e   :  { %2343 = vmatpush1.msra.mxu1 %v1607_v16  ;;  %2416 = vmatpush1.msra.mxu0 %v1731_v17  ;;  %v1684_v7 = vld [vmem:[#allocation7 + $0x798] sm:$0xff]  ;;  %v1807_v12 = vld [vmem:[#allocation7 + $0xb70] sm:$0xff] }
 0x28f   :  { %2344 = vmatprep.subr.mxu1 %v1604_v18  ;;  %2417 = vmatprep.subr.mxu0 %v1728_v20  ;;  %v1808_v9 = vld [vmem:[#allocation7 + $0xb78] sm:$0xff]  ;;  %v1679_v16 = vld [vmem:[#allocation7 + $0x770] sm:$0xff] }
 0x290   :  { %2345 = vmatpush1.msra.mxu1 %v1603_v21  ;;  %2418 = vmatpush1.msra.mxu0 %v1727_v23  ;;  %v1680_v13 = vld [vmem:[#allocation7 + $0x778] sm:$0xff]  ;;  %v1803_v17 = vld [vmem:[#allocation7 + $0xb50] sm:$0xff] }
 0x291   :  { %2346 = vmatprep.subr.mxu1 %v1600_v24  ;;  %2419 = vmatprep.subr.mxu0 %v1724_v25  ;;  %v1804_v14 = vld [vmem:[#allocation7 + $0xb58] sm:$0xff]  ;;  %v1675_v21 = vld [vmem:[#allocation7 + $0x750] sm:$0xff] }
 0x292   :  { %2347 = vmatpush1.msra.mxu1 %v1599_v26  ;;  %2420 = vmatpush1.msra.mxu0 %v1723_v27  ;;  %v1676_v18 = vld [vmem:[#allocation7 + $0x758] sm:$0xff]  ;;  %v1799_v23 = vld [vmem:[#allocation7 + $0xb30] sm:$0xff] }
 0x293   :  { %2348 = vmatprep.subr.mxu1 %v1596_v29  ;;  %2421 = vmatprep.subr.mxu0 %v1720_v30  ;;  %v1800_v20 = vld [vmem:[#allocation7 + $0xb38] sm:$0xff]  ;;  %v1671_v26 = vld [vmem:[#allocation7 + $0x730] sm:$0xff] }
 0x294   :  { %2349 = vmatpush1.msra.mxu1 %v1595_v31  ;;  %2422 = vmatpush1.msra.mxu0 %v1719_v41  ;;  %v1672_v24 = vld [vmem:[#allocation7 + $0x738] sm:$0xff]  ;;  %v1795_v27 = vld [vmem:[#allocation7 + $0xb10] sm:$0xff] }
 0x295   :  { %2350 = vmatprep.subr.mxu1 %v1592_v1  ;;  %2423 = vmatprep.subr.mxu0 %v1716_v32  ;;  %v1796_v25 = vld [vmem:[#allocation7 + $0xb18] sm:$0xff]  ;;  %v1667_v31 = vld [vmem:[#allocation7 + $0x710] sm:$0xff] }
 0x296   :  { %2351 = vmatpush1.msra.mxu1 %v1591_v33  ;;  %2424 = vmatpush1.msra.mxu0 %v1715_v34  ;;  %v1668_v29 = vld [vmem:[#allocation7 + $0x718] sm:$0xff]  ;;  %v1791_v41 = vld [vmem:[#allocation7 + $0xaf0] sm:$0xff] }
 0x297   :  { %2352 = vmatprep.subr.mxu1 %v1588_v36  ;;  %2425 = vmatprep.subr.mxu0 %v1712_v38  ;;  %v1792_v30 = vld [vmem:[#allocation7 + $0xaf8] sm:$0xff]  ;;  %v1663_v33 = vld [vmem:[#allocation7 + $0x6f0] sm:$0xff] }
 0x298   :  { %2353 = vmatpush1.msra.mxu1 %v1587_v37  ;;  %2426 = vmatpush1.msra.mxu0 %v1711_v39  ;;  %v1664_v1 = vld [vmem:[#allocation7 + $0x6f8] sm:$0xff]  ;;  %v1787_v34 = vld [vmem:[#allocation7 + $0xad0] sm:$0xff] }
 0x299   :  { %2354 = vmatprep.subr.mxu1 %v1584_v43  ;;  %2427 = vmatprep.subr.mxu0 %v1708_v45  ;;  %v1788_v32 = vld [vmem:[#allocation7 + $0xad8] sm:$0xff]  ;;  %v1659_v37 = vld [vmem:[#allocation7 + $0x6d0] sm:$0xff] }
 0x29a   :  { %2355 = vmatpush1.msra.mxu1 %v1583_v52  ;;  %2428 = vmatpush1.msra.mxu0 %v1707_v47  ;;  %v1660_v36 = vld [vmem:[#allocation7 + $0x6d8] sm:$0xff]  ;;  %v1783_v39 = vld [vmem:[#allocation7 + $0xab0] sm:$0xff] }
 0x29b   :  { %2356 = vmatprep.subr.mxu1 %v1580_v48  ;;  %2429 = vmatprep.subr.mxu0 %v1704_v49  ;;  %v1784_v38 = vld [vmem:[#allocation7 + $0xab8] sm:$0xff]  ;;  %v1655_v52 = vld [vmem:[#allocation7 + $0x6b0] sm:$0xff] }
 0x29c   :  { %2357 = vmatpush1.msra.mxu1 %v1579_v50  ;;  %2430 = vmatpush1.msra.mxu0 %v1703_v51  ;;  %v1656_v43 = vld [vmem:[#allocation7 + $0x6b8] sm:$0xff]  ;;  %v1779_v47 = vld [vmem:[#allocation7 + $0xa90] sm:$0xff] }
 0x29d   :  { %2358 = vmatprep.subr.mxu1 %v1576_v42  ;;  %2431 = vmatprep.subr.mxu0 %v1700_v54  ;;  %v1780_v45 = vld [vmem:[#allocation7 + $0xa98] sm:$0xff]  ;;  %v1651_v50 = vld [vmem:[#allocation7 + $0x690] sm:$0xff] }
 0x29e   :  { %2359 = vmatpush1.msra.mxu1 %v1575_v56  ;;  %2432 = vmatpush1.msra.mxu0 %v1699_v8  ;;  %v1652_v48 = vld [vmem:[#allocation7 + $0x698] sm:$0xff]  ;;  %v1775_v51 = vld [vmem:[#allocation7 + $0xa70] sm:$0xff] }
 0x29f   :  { %2360 = vmatprep.subr.mxu1 %v1572_v4  ;;  %2433 = vmatprep.subr.mxu0 %v1824_v46  ;;  %v1776_v49 = vld [vmem:[#allocation7 + $0xa78] sm:$0xff]  ;;  %v1647_v56 = vld [vmem:[#allocation7 + $0x670] sm:$0xff] }
 0x2a0   :  { %2361 = vmatpush1.msra.mxu1 %v1571_v59  ;;  %2434 = vmatpush2.msra.mxu0 %v1823_v60  ;;  %v1648_v42 = vld [vmem:[#allocation7 + $0x678] sm:$0xff]  ;;  %v1771_v8 = vld [vmem:[#allocation7 + $0xa50] sm:$0xff] }
 0x2a1   :  { %2362 = vmatprep.subr.mxu1 %v1696_v22  ;;  %2435 = vmatprep.subr.mxu0 %v1820_v61  ;;  %v1772_v54 = vld [vmem:[#allocation7 + $0xa58] sm:$0xff]  ;;  %v1643_v59 = vld [vmem:[#allocation7 + $0x650] sm:$0xff] }
 0x2a2   :  { %2363 = vmatpush2.msra.mxu1 %v1695_v63  ;;  %2436 = vmatpush2.msra.mxu0 %v1819_v11  ;;  %v1644_v4 = vld [vmem:[#allocation7 + $0x658] sm:$0xff]  ;;  %v1767_v60 = vld [vmem:[#allocation7 + $0xa30] sm:$0xff] }
 0x2a3   :  { %2364 = vmatprep.subr.mxu1 %v1692_v15  ;;  %2437 = vmatprep.subr.mxu0 %v1816_v0  ;;  %v1768_v46 = vld [vmem:[#allocation7 + $0xa38] sm:$0xff]  ;;  %v1639_v63 = vld [vmem:[#allocation7 + $0x630] sm:$0xff] }
 0x2a4   :  { %2365 = vmatpush2.msra.mxu1 %v1691_v62  ;;  %2438 = vmatpush2.msra.mxu0 %v1815_v3  ;;  %v1640_v22 = vld [vmem:[#allocation7 + $0x638] sm:$0xff]  ;;  %v1763_v11 = vld [vmem:[#allocation7 + $0xa10] sm:$0xff]  ;;  %v2612_v62 = vld [vmem:[#allocation12 + $0xf8] sm:$0xff] }
 0x2a5   :  { %2366 = vmatprep.subr.mxu1 %v1688_v2  ;;  %2439 = vmatprep.subr.mxu0 %v1812_v5  ;;  %v1764_v61 = vld [vmem:[#allocation7 + $0xa18] sm:$0xff]  ;;  %v1635_v0 = vld [vmem:[#allocation7 + $0x610] sm:$0xff] }
 0x2a6   :  { %2367 = vmatpush2.msra.mxu1 %v1687_v40  ;;  %2440 = vmatpush2.msra.mxu0 %v1811_v6  ;;  %v1636_v15 = vld [vmem:[#allocation7 + $0x618] sm:$0xff]  ;;  %v1887_v2 = vld [vmem:[#allocation7 + $0xdf0] sm:$0xff] }
 0x2a7   :  { %2368 = vmatprep.subr.mxu1 %v1684_v7  ;;  %2441 = vmatprep.subr.mxu0 %v1808_v9  ;;  %v1888_v3 = vld [vmem:[#allocation7 + $0xdf8] sm:$0xff]  ;;  %v1883_v6 = vld [vmem:[#allocation7 + $0xdd0] sm:$0xff] }
 0x2a8   :  { %2369 = vmatpush2.msra.mxu1 %v1683_v10  ;;  %2442 = vmatpush2.msra.mxu0 %v1807_v12  ;;  %v1884_v5 = vld [vmem:[#allocation7 + $0xdd8] sm:$0xff]  ;;  %v2610_v7 = vld [vmem:[#allocation12 + $0xe8] sm:$0xff]  ;;  %v2609_v10 = vld [vmem:[#allocation12 + $0xe0] sm:$0xff] }
 0x2a9   :  { %2370 = vmatprep.subr.mxu1 %v1680_v13  ;;  %2443 = vmatprep.subr.mxu0 %v1804_v14  ;;  %v2611_v40 = vld [vmem:[#allocation12 + $0xf0] sm:$0xff]  ;;  %v1879_v12 = vld [vmem:[#allocation7 + $0xdb0] sm:$0xff]  ;;  %v2608_v13 = vld [vmem:[#allocation12 + $0xd8] sm:$0xff] }
 0x2aa   :  { %2371 = vmatpush2.msra.mxu1 %v1679_v16  ;;  %2444 = vmatpush2.msra.mxu0 %v1803_v17  ;;  %v1880_v9 = vld [vmem:[#allocation7 + $0xdb8] sm:$0xff]  ;;  %v1875_v16 = vld [vmem:[#allocation7 + $0xd90] sm:$0xff] }
 0x2ab   :  { %2372 = vmatprep.subr.mxu1 %v1676_v18  ;;  %2445 = vmatprep.subr.mxu0 %v1800_v20  ;;  %v2607_v14 = vld [vmem:[#allocation12 + $0xd0] sm:$0xff]  ;;  %v2605_v18 = vld [vmem:[#allocation12 + $0xc0] sm:$0xff]  ;;  %v2604_v20 = vld [vmem:[#allocation12 + $0xb8] sm:$0xff] }
 0x2ac   :  { %2373 = vmatpush2.msra.mxu1 %v1675_v21  ;;  %2446 = vmatpush2.msra.mxu0 %v1799_v23  ;;  %v1872_v17 = vld [vmem:[#allocation7 + $0xd78] sm:$0xff] }
 0x2ad   :  { %2374 = vmatprep.subr.mxu1 %v1672_v24  ;;  %2447 = vmatprep.subr.mxu0 %v1796_v25  ;;  %v1868_v21 = vld [vmem:[#allocation7 + $0xd58] sm:$0xff]  ;;  %v1867_v24 = vld [vmem:[#allocation7 + $0xd50] sm:$0xff] }
 0x2ae   :  { %2375 = vmatpush2.msra.mxu1 %v1671_v26  ;;  %2448 = vmatpush2.msra.mxu0 %v1795_v27  ;;  %v2603_v23 = vld [vmem:[#allocation12 + $0xb0] sm:$0xff]  ;;  %v2602_v25 = vld [vmem:[#allocation12 + $0xa8] sm:$0xff]  ;;  %v2601_v27 = vld [vmem:[#allocation12 + $0xa0] sm:$0xff] }
 0x2af   :  { %2376 = vmatprep.subr.mxu1 %v1668_v29  ;;  %2449 = vmatprep.subr.mxu0 %v1792_v30  ;;  %v1864_v26 = vld [vmem:[#allocation7 + $0xd38] sm:$0xff]  ;;  %v1863_v29 = vld [vmem:[#allocation7 + $0xd30] sm:$0xff]  ;;  %v2600_v30 = vld [vmem:[#allocation12 + $0x98] sm:$0xff] }
 0x2b0   :  { %2377 = vmatpush2.msra.mxu1 %v1667_v31  ;;  %2450 = vmatpush2.msra.mxu0 %v1791_v41  ;;  %v1860_v31 = vld [vmem:[#allocation7 + $0xd18] sm:$0xff] }
 0x2b1   :  { %2378 = vmatprep.subr.mxu1 %v1664_v1  ;;  %2451 = vmatprep.subr.mxu0 %v1788_v32  ;;  %v2599_v41 = vld [vmem:[#allocation12 + $0x90] sm:$0xff]  ;;  %v1859_v1 = vld [vmem:[#allocation7 + $0xd10] sm:$0xff] }
 0x2b2   :  { %2379 = vmatpush2.msra.mxu1 %v1663_v33  ;;  %2452 = vmatpush2.msra.mxu0 %v1787_v34  ;;  %v2598_v32 = vld [vmem:[#allocation12 + $0x88] sm:$0xff]  ;;  %v1856_v33 = vld [vmem:[#allocation7 + $0xcf8] sm:$0xff]  ;;  %v2597_v34 = vld [vmem:[#allocation12 + $0x80] sm:$0xff] }
 0x2b3   :  { %2380 = vmatprep.subr.mxu1 %v1660_v36  ;;  %2453 = vmatprep.subr.mxu0 %v1784_v38  ;;  %v1855_v36 = vld [vmem:[#allocation7 + $0xcf0] sm:$0xff]  ;;  %v2596_v38 = vld [vmem:[#allocation12 + $0x78] sm:$0xff] }
 0x2b4   :  { %2381 = vmatpush2.msra.mxu1 %v1659_v37  ;;  %2454 = vmatpush2.msra.mxu0 %v1783_v39  ;;  %v1852_v37 = vld [vmem:[#allocation7 + $0xcd8] sm:$0xff] }
 0x2b5   :  { %2382 = vmatprep.subr.mxu1 %v1656_v43  ;;  %2455 = vmatprep.subr.mxu0 %v1780_v45  ;;  %v2595_v39 = vld [vmem:[#allocation12 + $0x70] sm:$0xff]  ;;  %v1851_v43 = vld [vmem:[#allocation7 + $0xcd0] sm:$0xff] }
 0x2b6   :  { %2383 = vmatpush2.msra.mxu1 %v1655_v52  ;;  %2456 = vmatpush2.msra.mxu0 %v1779_v47  ;;  %v2594_v45 = vld [vmem:[#allocation12 + $0x68] sm:$0xff]  ;;  %v1848_v52 = vld [vmem:[#allocation7 + $0xcb8] sm:$0xff]  ;;  %v2593_v47 = vld [vmem:[#allocation12 + $0x60] sm:$0xff] }
 0x2b7   :  { %2384 = vmatprep.subr.mxu1 %v1652_v48  ;;  %2457 = vmatprep.subr.mxu0 %v1776_v49  ;;  %v1847_v48 = vld [vmem:[#allocation7 + $0xcb0] sm:$0xff]  ;;  %v2592_v49 = vld [vmem:[#allocation12 + $0x58] sm:$0xff] }
 0x2b8   :  { %2385 = vmatpush2.msra.mxu1 %v1651_v50  ;;  %2458 = vmatpush2.msra.mxu0 %v1775_v51  ;;  %v1844_v50 = vld [vmem:[#allocation7 + $0xc98] sm:$0xff] }
 0x2b9   :  { %2386 = vmatprep.subr.mxu1 %v1648_v42  ;;  %2459 = vmatprep.subr.mxu0 %v1772_v54  ;;  %v2591_v51 = vld [vmem:[#allocation12 + $0x50] sm:$0xff]  ;;  %v1843_v42 = vld [vmem:[#allocation7 + $0xc90] sm:$0xff] }
 0x2ba   :  { %2387 = vmatpush2.msra.mxu1 %v1647_v56  ;;  %2460 = vmatpush2.msra.mxu0 %v1771_v8  ;;  %v2590_v54 = vld [vmem:[#allocation12 + $0x48] sm:$0xff]  ;;  %v1840_v56 = vld [vmem:[#allocation7 + $0xc78] sm:$0xff]  ;;  %v2589_v8 = vld [vmem:[#allocation12 + $0x40] sm:$0xff] }
 0x2bb   :  { %2388 = vmatprep.subr.mxu1 %v1644_v4  ;;  %2461 = vmatprep.subr.mxu0 %v1768_v46  ;;  %v1839_v4 = vld [vmem:[#allocation7 + $0xc70] sm:$0xff]  ;;  %v2588_v46 = vld [vmem:[#allocation12 + $0x38] sm:$0xff] }
 0x2bc   :  { %2389 = vmatpush2.msra.mxu1 %v1643_v59  ;;  %2462 = vmatpush2.msra.mxu0 %v1767_v60  ;;  %v1836_v59 = vld [vmem:[#allocation7 + $0xc58] sm:$0xff] }
 0x2bd   :  { %2390 = vmatprep.subr.mxu1 %v1640_v22  ;;  %2463 = vmatprep.subr.mxu0 %v1764_v61  ;;  %v2587_v60 = vld [vmem:[#allocation12 + $0x30] sm:$0xff]  ;;  %v1835_v22 = vld [vmem:[#allocation7 + $0xc50] sm:$0xff] }
 0x2be   :  { %2391 = vmatpush2.msra.mxu1 %v1639_v63  ;;  %2464 = vmatpush2.msra.mxu0 %v1763_v11  ;;  %v2586_v61 = vld [vmem:[#allocation12 + $0x28] sm:$0xff]  ;;  %v1832_v63 = vld [vmem:[#allocation7 + $0xc38] sm:$0xff]  ;;  %v2585_v11 = vld [vmem:[#allocation12 + $0x20] sm:$0xff] }
 0x2bf   :  { %2392 = vmatprep.subr.mxu1 %v1636_v15  ;;  %2466 = vmatmul.mubr.f32.vlgmr.msra.gmra.mxu0 %v3787_v35  ;;  %v1876_v35 = vld [vmem:[#allocation7 + $0xd98] sm:$0xff]  ;;  %v1831_v15 = vld [vmem:[#allocation7 + $0xc30] sm:$0xff] }
 0x2c0   :  { %2393 = vmatpush2.msra.mxu1 %v1635_v0  ;;  %2721 = vmatprep.subr.mxu0 %v2612_v62  ;;  %v2584_v0 = vld [vmem:[#allocation12 + $0x18] sm:$0xff]  ;;  %v1828_v62 = vld [vmem:[#allocation7 + $0xc18] sm:$0xff] }
 0x2c1   :  { %2395 = vmatmul.mubr.f32.vlgmr.msra.gmra.mxu1 %v3767_v44  ;;  %2472 = vmatprep.subr.mxu1 %v1888_v3  ;;  %v2606_v44 = vld [vmem:[#allocation12 + $0xc8] sm:$0xff]  ;;  %v2583_v3 = vld [vmem:[#allocation12 + $0x10] sm:$0xff] }
 0x2c2   :  { %2473 = vmatpush1.msra.mxu1 %v1887_v2  ;;  %2536 = vmatprep.mubr.f32.mxu1 %v3798_v55  ;;  %v1871_v55 = vld [vmem:[#allocation7 + $0xd70] sm:$0xff] }
 0x2c3   :  { %2474 = vmatprep.subr.mxu1 %v1884_v5  ;;  %2722 = vmatpush1.msra.mxu0 %v2611_v40  ;;  %v1827_v2 = vld [vmem:[#allocation7 + $0xc10] sm:$0xff]  ;;  %v1952_v40 = vld [vmem:[#allocation7 + $0xff8] sm:$0xff] }
 0x2c4   :  { %2475 = vmatpush1.msra.mxu1 %v1883_v6  ;;  %2723 = vmatprep.subr.mxu0 %v2610_v7  ;;  %v2582_v5 = vld [vmem:[#allocation12 + $0x8] sm:$0xff]  ;;  %v2581_v6 = vld [vmem:[#allocation12] sm:$0xff] }
 0x2c5   :  { %2476 = vmatprep.subr.mxu1 %v1880_v9  ;;  %2724 = vmatpush1.msra.mxu0 %v2609_v10  ;;  %v1951_v7 = vld [vmem:[#allocation7 + $0xff0] sm:$0xff]  ;;  %v2644_v9 = vld [vmem:[#allocation12 + $0x1f8] sm:$0xff]  ;;  %v1948_v10 = vld [vmem:[#allocation7 + $0xfd8] sm:$0xff] }
 0x2c6   :  { %2477 = vmatpush1.msra.mxu1 %v1879_v12  ;;  %2725 = vmatprep.subr.mxu0 %v2608_v13  ;;  %v2643_v12 = vld [vmem:[#allocation12 + $0x1f0] sm:$0xff]  ;;  %v1947_v13 = vld [vmem:[#allocation7 + $0xfd0] sm:$0xff] }
 0x2c7   :  { %2478 = vmatprep.subr.mxu1 %v1876_v35  ;;  %2726 = vmatpush1.msra.mxu0 %v2607_v14  ;;  %v2642_v35 = vld [vmem:[#allocation12 + $0x1e8] sm:$0xff]  ;;  %v1944_v14 = vld [vmem:[#allocation7 + $0xfb8] sm:$0xff] }
 0x2c8   :  { %2479 = vmatpush1.msra.mxu1 %v1875_v16  ;;  %2727 = vmatprep.subr.mxu0 %v2606_v44  ;;  %v2641_v16 = vld [vmem:[#allocation12 + $0x1e0] sm:$0xff]  ;;  %v1943_v44 = vld [vmem:[#allocation7 + $0xfb0] sm:$0xff] }
 0x2c9   :  { %2480 = vmatprep.subr.mxu1 %v1872_v17  ;;  %2728 = vmatpush1.msra.mxu0 %v2605_v18  ;;  %v2640_v17 = vld [vmem:[#allocation12 + $0x1d8] sm:$0xff]  ;;  %v1940_v18 = vld [vmem:[#allocation7 + $0xf98] sm:$0xff] }
 0x2ca   :  { %2481 = vmatpush1.msra.mxu1 %v1871_v55  ;;  %2729 = vmatprep.subr.mxu0 %v2604_v20  ;;  %v2639_v55 = vld [vmem:[#allocation12 + $0x1d0] sm:$0xff]  ;;  %v1939_v20 = vld [vmem:[#allocation7 + $0xf90] sm:$0xff] }
 0x2cb   :  { %2482 = vmatprep.subr.mxu1 %v1868_v21  ;;  %2730 = vmatpush1.msra.mxu0 %v2603_v23  ;;  %v2638_v21 = vld [vmem:[#allocation12 + $0x1c8] sm:$0xff]  ;;  %v1936_v23 = vld [vmem:[#allocation7 + $0xf78] sm:$0xff] }
 0x2cc   :  { %2483 = vmatpush1.msra.mxu1 %v1867_v24  ;;  %2731 = vmatprep.subr.mxu0 %v2602_v25  ;;  %v2637_v24 = vld [vmem:[#allocation12 + $0x1c0] sm:$0xff]  ;;  %v1935_v25 = vld [vmem:[#allocation7 + $0xf70] sm:$0xff] }
 0x2cd   :  { %2484 = vmatprep.subr.mxu1 %v1864_v26  ;;  %2732 = vmatpush1.msra.mxu0 %v2601_v27  ;;  %v2636_v26 = vld [vmem:[#allocation12 + $0x1b8] sm:$0xff]  ;;  %v1932_v27 = vld [vmem:[#allocation7 + $0xf58] sm:$0xff] }
 0x2ce   :  { %2485 = vmatpush1.msra.mxu1 %v1863_v29  ;;  %2733 = vmatprep.subr.mxu0 %v2600_v30  ;;  %v2635_v29 = vld [vmem:[#allocation12 + $0x1b0] sm:$0xff]  ;;  %v1931_v30 = vld [vmem:[#allocation7 + $0xf50] sm:$0xff] }
 0x2cf   :  { %2486 = vmatprep.subr.mxu1 %v1860_v31  ;;  %2734 = vmatpush1.msra.mxu0 %v2599_v41  ;;  %v2634_v31 = vld [vmem:[#allocation12 + $0x1a8] sm:$0xff]  ;;  %v1928_v41 = vld [vmem:[#allocation7 + $0xf38] sm:$0xff] }
 0x2d0   :  { %2487 = vmatpush1.msra.mxu1 %v1859_v1  ;;  %2735 = vmatprep.subr.mxu0 %v2598_v32  ;;  %v2633_v1 = vld [vmem:[#allocation12 + $0x1a0] sm:$0xff]  ;;  %v1927_v32 = vld [vmem:[#allocation7 + $0xf30] sm:$0xff] }
 0x2d1   :  { %2488 = vmatprep.subr.mxu1 %v1856_v33  ;;  %2736 = vmatpush1.msra.mxu0 %v2597_v34  ;;  %v2632_v33 = vld [vmem:[#allocation12 + $0x198] sm:$0xff]  ;;  %v1924_v34 = vld [vmem:[#allocation7 + $0xf18] sm:$0xff] }
 0x2d2   :  { %2489 = vmatpush1.msra.mxu1 %v1855_v36  ;;  %2737 = vmatprep.subr.mxu0 %v2596_v38  ;;  %v2631_v36 = vld [vmem:[#allocation12 + $0x190] sm:$0xff]  ;;  %v1923_v38 = vld [vmem:[#allocation7 + $0xf10] sm:$0xff] }
 0x2d3   :  { %2490 = vmatprep.subr.mxu1 %v1852_v37  ;;  %2738 = vmatpush1.msra.mxu0 %v2595_v39  ;;  %v2630_v37 = vld [vmem:[#allocation12 + $0x188] sm:$0xff]  ;;  %v1920_v39 = vld [vmem:[#allocation7 + $0xef8] sm:$0xff] }
 0x2d4   :  { %2491 = vmatpush1.msra.mxu1 %v1851_v43  ;;  %2739 = vmatprep.subr.mxu0 %v2594_v45  ;;  %v2629_v43 = vld [vmem:[#allocation12 + $0x180] sm:$0xff]  ;;  %v1919_v45 = vld [vmem:[#allocation7 + $0xef0] sm:$0xff] }
 0x2d5   :  { %2492 = vmatprep.subr.mxu1 %v1848_v52  ;;  %2740 = vmatpush1.msra.mxu0 %v2593_v47  ;;  %v2628_v52 = vld [vmem:[#allocation12 + $0x178] sm:$0xff]  ;;  %v1916_v47 = vld [vmem:[#allocation7 + $0xed8] sm:$0xff] }
 0x2d6   :  { %2493 = vmatpush1.msra.mxu1 %v1847_v48  ;;  %2741 = vmatprep.subr.mxu0 %v2592_v49  ;;  %v2627_v48 = vld [vmem:[#allocation12 + $0x170] sm:$0xff]  ;;  %v1915_v49 = vld [vmem:[#allocation7 + $0xed0] sm:$0xff] }
 0x2d7   :  { %2494 = vmatprep.subr.mxu1 %v1844_v50  ;;  %2742 = vmatpush1.msra.mxu0 %v2591_v51  ;;  %v2626_v50 = vld [vmem:[#allocation12 + $0x168] sm:$0xff]  ;;  %v1912_v51 = vld [vmem:[#allocation7 + $0xeb8] sm:$0xff] }
 0x2d8   :  { %2495 = vmatpush1.msra.mxu1 %v1843_v42  ;;  %2743 = vmatprep.subr.mxu0 %v2590_v54  ;;  %v2625_v42 = vld [vmem:[#allocation12 + $0x160] sm:$0xff]  ;;  %v1911_v54 = vld [vmem:[#allocation7 + $0xeb0] sm:$0xff] }
 0x2d9   :  { %2496 = vmatprep.subr.mxu1 %v1840_v56  ;;  %2744 = vmatpush1.msra.mxu0 %v2589_v8  ;;  %v2624_v56 = vld [vmem:[#allocation12 + $0x158] sm:$0xff]  ;;  %v1908_v8 = vld [vmem:[#allocation7 + $0xe98] sm:$0xff] }
 0x2da   :  { %2497 = vmatpush1.msra.mxu1 %v1839_v4  ;;  %2745 = vmatprep.subr.mxu0 %v2588_v46  ;;  %v2623_v4 = vld [vmem:[#allocation12 + $0x150] sm:$0xff]  ;;  %v1907_v46 = vld [vmem:[#allocation7 + $0xe90] sm:$0xff] }
 0x2db   :  { %2498 = vmatprep.subr.mxu1 %v1836_v59  ;;  %2746 = vmatpush1.msra.mxu0 %v2587_v60  ;;  %v2622_v59 = vld [vmem:[#allocation12 + $0x148] sm:$0xff]  ;;  %v1904_v60 = vld [vmem:[#allocation7 + $0xe78] sm:$0xff] }
 0x2dc   :  { %2499 = vmatpush1.msra.mxu1 %v1835_v22  ;;  %2747 = vmatprep.subr.mxu0 %v2586_v61  ;;  %v2621_v22 = vld [vmem:[#allocation12 + $0x140] sm:$0xff]  ;;  %v1903_v61 = vld [vmem:[#allocation7 + $0xe70] sm:$0xff] }
 0x2dd   :  { %2500 = vmatprep.subr.mxu1 %v1832_v63  ;;  %2748 = vmatpush1.msra.mxu0 %v2585_v11  ;;  %v2620_v63 = vld [vmem:[#allocation12 + $0x138] sm:$0xff]  ;;  %v1900_v11 = vld [vmem:[#allocation7 + $0xe58] sm:$0xff] }
 0x2de   :  { %2501 = vmatpush1.msra.mxu1 %v1831_v15  ;;  %2749 = vmatprep.subr.mxu0 %v2584_v0  ;;  %v2619_v15 = vld [vmem:[#allocation12 + $0x130] sm:$0xff]  ;;  %v1899_v0 = vld [vmem:[#allocation7 + $0xe50] sm:$0xff] }
 0x2df   :  { %2502 = vmatprep.subr.mxu1 %v1828_v62  ;;  %2750 = vmatpush1.msra.mxu0 %v2583_v3  ;;  %v2618_v62 = vld [vmem:[#allocation12 + $0x128] sm:$0xff]  ;;  %v1896_v3 = vld [vmem:[#allocation7 + $0xe38] sm:$0xff] }
 0x2e0   :  { %2503 = vmatpush1.msra.mxu1 %v1827_v2  ;;  %2751 = vmatprep.subr.mxu0 %v2582_v5  ;;  %v2617_v2 = vld [vmem:[#allocation12 + $0x120] sm:$0xff]  ;;  %v1895_v5 = vld [vmem:[#allocation7 + $0xe30] sm:$0xff] }
 0x2e1   :  { %2504 = vmatprep.subr.mxu1 %v1952_v40  ;;  %2752 = vmatpush1.msra.mxu0 %v2581_v6  ;;  %v2616_v40 = vld [vmem:[#allocation12 + $0x118] sm:$0xff]  ;;  %v1892_v6 = vld [vmem:[#allocation7 + $0xe18] sm:$0xff] }
 0x2e2   :  { %2505 = vmatpush2.msra.mxu1 %v1951_v7  ;;  %2753 = vmatprep.subr.mxu0 %v2644_v9  ;;  %v2615_v7 = vld [vmem:[#allocation12 + $0x110] sm:$0xff]  ;;  %v1891_v9 = vld [vmem:[#allocation7 + $0xe10] sm:$0xff] }
 0x2e3   :  { %2506 = vmatprep.subr.mxu1 %v1948_v10  ;;  %2754 = vmatpush2.msra.mxu0 %v2643_v12  ;;  %v2614_v10 = vld [vmem:[#allocation12 + $0x108] sm:$0xff]  ;;  %v2613_v12 = vld [vmem:[#allocation12 + $0x100] sm:$0xff] }
 0x2e4   :  { %2507 = vmatpush2.msra.mxu1 %v1947_v13  ;;  %2755 = vmatprep.subr.mxu0 %v2642_v35  ;;  %v2676_v13 = vld [vmem:[#allocation12 + $0x2f8] sm:$0xff]  ;;  %v2675_v35 = vld [vmem:[#allocation12 + $0x2f0] sm:$0xff] }
 0x2e5   :  { %2508 = vmatprep.subr.mxu1 %v1944_v14  ;;  %2756 = vmatpush2.msra.mxu0 %v2641_v16  ;;  %v2674_v14 = vld [vmem:[#allocation12 + $0x2e8] sm:$0xff]  ;;  %v2673_v16 = vld [vmem:[#allocation12 + $0x2e0] sm:$0xff] }
 0x2e6   :  { %2509 = vmatpush2.msra.mxu1 %v1943_v44  ;;  %2757 = vmatprep.subr.mxu0 %v2640_v17  ;;  %v2672_v44 = vld [vmem:[#allocation12 + $0x2d8] sm:$0xff]  ;;  %v2671_v17 = vld [vmem:[#allocation12 + $0x2d0] sm:$0xff] }
 0x2e7   :  { %2510 = vmatprep.subr.mxu1 %v1940_v18  ;;  %2758 = vmatpush2.msra.mxu0 %v2639_v55  ;;  %v2670_v18 = vld [vmem:[#allocation12 + $0x2c8] sm:$0xff]  ;;  %v2669_v55 = vld [vmem:[#allocation12 + $0x2c0] sm:$0xff] }
 0x2e8   :  { %2511 = vmatpush2.msra.mxu1 %v1939_v20  ;;  %2759 = vmatprep.subr.mxu0 %v2638_v21  ;;  %v2668_v20 = vld [vmem:[#allocation12 + $0x2b8] sm:$0xff]  ;;  %v2667_v21 = vld [vmem:[#allocation12 + $0x2b0] sm:$0xff] }
 0x2e9   :  { %2512 = vmatprep.subr.mxu1 %v1936_v23  ;;  %2760 = vmatpush2.msra.mxu0 %v2637_v24  ;;  %v2665_v23 = vld [vmem:[#allocation12 + $0x2a0] sm:$0xff]  ;;  %v2664_v24 = vld [vmem:[#allocation12 + $0x298] sm:$0xff] }
 0x2ea   :  { %2513 = vmatpush2.msra.mxu1 %v1935_v25  ;;  %2761 = vmatprep.subr.mxu0 %v2636_v26  ;;  %v2663_v25 = vld [vmem:[#allocation12 + $0x290] sm:$0xff]  ;;  %v2662_v26 = vld [vmem:[#allocation12 + $0x288] sm:$0xff] }
 0x2eb   :  { %2514 = vmatprep.subr.mxu1 %v1932_v27  ;;  %2762 = vmatpush2.msra.mxu0 %v2635_v29  ;;  %v2661_v27 = vld [vmem:[#allocation12 + $0x280] sm:$0xff]  ;;  %v2660_v29 = vld [vmem:[#allocation12 + $0x278] sm:$0xff] }
 0x2ec   :  { %2515 = vmatpush2.msra.mxu1 %v1931_v30  ;;  %2763 = vmatprep.subr.mxu0 %v2634_v31  ;;  %v2659_v30 = vld [vmem:[#allocation12 + $0x270] sm:$0xff]  ;;  %v2658_v31 = vld [vmem:[#allocation12 + $0x268] sm:$0xff] }
 0x2ed   :  { %2516 = vmatprep.subr.mxu1 %v1928_v41  ;;  %2764 = vmatpush2.msra.mxu0 %v2633_v1  ;;  %v2657_v41 = vld [vmem:[#allocation12 + $0x260] sm:$0xff]  ;;  %v2656_v1 = vld [vmem:[#allocation12 + $0x258] sm:$0xff] }
 0x2ee   :  { %2517 = vmatpush2.msra.mxu1 %v1927_v32  ;;  %2765 = vmatprep.subr.mxu0 %v2632_v33  ;;  %v2655_v32 = vld [vmem:[#allocation12 + $0x250] sm:$0xff]  ;;  %v2654_v33 = vld [vmem:[#allocation12 + $0x248] sm:$0xff] }
 0x2ef   :  { %2518 = vmatprep.subr.mxu1 %v1924_v34  ;;  %2766 = vmatpush2.msra.mxu0 %v2631_v36  ;;  %v2653_v34 = vld [vmem:[#allocation12 + $0x240] sm:$0xff]  ;;  %v2652_v36 = vld [vmem:[#allocation12 + $0x238] sm:$0xff] }
 0x2f0   :  { %2519 = vmatpush2.msra.mxu1 %v1923_v38  ;;  %2767 = vmatprep.subr.mxu0 %v2630_v37  ;;  %v2651_v38 = vld [vmem:[#allocation12 + $0x230] sm:$0xff]  ;;  %v2650_v37 = vld [vmem:[#allocation12 + $0x228] sm:$0xff] }
 0x2f1   :  { %2520 = vmatprep.subr.mxu1 %v1920_v39  ;;  %2768 = vmatpush2.msra.mxu0 %v2629_v43  ;;  %v2649_v39 = vld [vmem:[#allocation12 + $0x220] sm:$0xff]  ;;  %v2648_v43 = vld [vmem:[#allocation12 + $0x218] sm:$0xff] }
 0x2f2   :  { %2521 = vmatpush2.msra.mxu1 %v1919_v45  ;;  %2769 = vmatprep.subr.mxu0 %v2628_v52  ;;  %v2647_v45 = vld [vmem:[#allocation12 + $0x210] sm:$0xff]  ;;  %v2646_v52 = vld [vmem:[#allocation12 + $0x208] sm:$0xff] }
 0x2f3   :  { %2522 = vmatprep.subr.mxu1 %v1916_v47  ;;  %2770 = vmatpush2.msra.mxu0 %v2627_v48  ;;  %v2645_v47 = vld [vmem:[#allocation12 + $0x200] sm:$0xff]  ;;  %v2708_v48 = vld [vmem:[#allocation12 + $0x3f8] sm:$0xff] }
 0x2f4   :  { %2523 = vmatpush2.msra.mxu1 %v1915_v49  ;;  %2771 = vmatprep.subr.mxu0 %v2626_v50  ;;  %v2707_v49 = vld [vmem:[#allocation12 + $0x3f0] sm:$0xff]  ;;  %v2706_v50 = vld [vmem:[#allocation12 + $0x3e8] sm:$0xff] }
 0x2f5   :  { %2524 = vmatprep.subr.mxu1 %v1912_v51  ;;  %2772 = vmatpush2.msra.mxu0 %v2625_v42  ;;  %v2705_v51 = vld [vmem:[#allocation12 + $0x3e0] sm:$0xff]  ;;  %v2704_v42 = vld [vmem:[#allocation12 + $0x3d8] sm:$0xff] }
 0x2f6   :  { %2525 = vmatpush2.msra.mxu1 %v1911_v54  ;;  %2773 = vmatprep.subr.mxu0 %v2624_v56  ;;  %v2703_v54 = vld [vmem:[#allocation12 + $0x3d0] sm:$0xff]  ;;  %v2702_v56 = vld [vmem:[#allocation12 + $0x3c8] sm:$0xff] }
 0x2f7   :  { %2526 = vmatprep.subr.mxu1 %v1908_v8  ;;  %2774 = vmatpush2.msra.mxu0 %v2623_v4  ;;  %v2701_v8 = vld [vmem:[#allocation12 + $0x3c0] sm:$0xff]  ;;  %v2700_v4 = vld [vmem:[#allocation12 + $0x3b8] sm:$0xff] }
 0x2f8   :  { %2527 = vmatpush2.msra.mxu1 %v1907_v46  ;;  %2775 = vmatprep.subr.mxu0 %v2622_v59  ;;  %v2699_v46 = vld [vmem:[#allocation12 + $0x3b0] sm:$0xff]  ;;  %v2698_v59 = vld [vmem:[#allocation12 + $0x3a8] sm:$0xff] }
 0x2f9   :  { %2528 = vmatprep.subr.mxu1 %v1904_v60  ;;  %2776 = vmatpush2.msra.mxu0 %v2621_v22  ;;  %v2697_v60 = vld [vmem:[#allocation12 + $0x3a0] sm:$0xff]  ;;  %v2696_v22 = vld [vmem:[#allocation12 + $0x398] sm:$0xff] }
 0x2fa   :  { %2529 = vmatpush2.msra.mxu1 %v1903_v61  ;;  %2777 = vmatprep.subr.mxu0 %v2620_v63  ;;  %v2695_v61 = vld [vmem:[#allocation12 + $0x390] sm:$0xff]  ;;  %v2694_v63 = vld [vmem:[#allocation12 + $0x388] sm:$0xff] }
 0x2fb   :  { %2530 = vmatprep.subr.mxu1 %v1900_v11  ;;  %2778 = vmatpush2.msra.mxu0 %v2619_v15  ;;  %v2693_v11 = vld [vmem:[#allocation12 + $0x380] sm:$0xff]  ;;  %v2692_v15 = vld [vmem:[#allocation12 + $0x378] sm:$0xff] }
 0x2fc   :  { %2531 = vmatpush2.msra.mxu1 %v1899_v0  ;;  %2779 = vmatprep.subr.mxu0 %v2618_v62  ;;  %v3811_v0 = vld [vmem:[#allocation9] sm:$0xf]  ;;  %v2041_v62 = vpop.f32.mrf.mxu0 }
 0x2fd   :  { %2532 = vmatprep.subr.mxu1 %v1896_v3  ;;  %2780 = vmatpush2.msra.mxu0 %v2617_v2  ;;  %v2691_v3 = vld [vmem:[#allocation12 + $0x370] sm:$0xff]  ;;  %v2690_v2 = vld [vmem:[#allocation12 + $0x368] sm:$0xff] }
 0x2fe   :  { %2533 = vmatpush2.msra.mxu1 %v1895_v5  ;;  %2781 = vmatprep.subr.mxu0 %v2616_v40  ;;  %v2689_v5 = vld [vmem:[#allocation12 + $0x360] sm:$0xff]  ;;  %v1958_v40 = vrot.slane %v3811_v0, %v3739_v19 }
 0x2ff   :  { %2534 = vmatprep.subr.mxu1 %v1892_v6  ;;  %2782 = vmatpush2.msra.mxu0 %v2615_v7  ;;  %v2688_v6 = vld [vmem:[#allocation12 + $0x358] sm:$0xff]  ;;  %v2043_v7 = vpop.f32.mrf.mxu0 }
 0x300   :  { %2535 = vmatpush2.msra.mxu1 %v1891_v9  ;;  %2783 = vmatprep.subr.mxu0 %v2614_v10  ;;  %v2112_v9 = vpop.f32.mrf.mxu1  ;;  %v1962_v10 = vrot.slane %v3811_v0, %v3717_v28 }
 0x301   :  { %2537 = vmatmul.mubr.f32.vlgmr.msra.gmra.mxu1 %v3801_v57  ;;  %2784 = vmatpush2.msra.mxu0 %v2613_v12  ;;  %v2666_v57 = vld [vmem:[#allocation12 + $0x2a8] sm:$0xff]  ;;  %v2183_v12 = vpop.f32.mrf.mxu0 }
 0x302   :  { %2792 = vmatprep.subr.mxu1 %v2676_v13  ;;  %v2042_v13 = vadd.f32 %v2041_v62, %v1958_v40  ;;  %v2890_v62 = vld [vmem:[#allocation16 + $0x38] sm:$0xff] }
 0x303   :  { %2793 = vmatpush1.msra.mxu1 %v2675_v35  ;;  %v2114_v35 = vpop.f32.mrf.mxu1 }
 0x304   :  { %2794 = vmatprep.subr.mxu1 %v2674_v14  ;;  %v2044_v14 = vadd.f32 %v2043_v7, %v1962_v10 }
 0x305   :  { %2795 = vmatpush1.msra.mxu1 %v2673_v16  ;;  %v2113_v16 = vadd.f32 %v2112_v9, %v2042_v13  ;;  %v1970_v9 = vrot.slane %v3811_v0, %v3749_v58 }
 0x306   :  { %2796 = vmatprep.subr.mxu1 %v2672_v44  ;;  %v2185_v44 = vpop.f32.mrf.mxu0 }
 0x307   :  { %2797 = vmatpush1.msra.mxu1 %v2671_v17  ;;  %v2115_v17 = vadd.f32 %v2114_v35, %v2044_v14 }
 0x308   :  { %2798 = vmatprep.subr.mxu1 %v2670_v18  ;;  %v2184_v18 = vadd.f32 %v2183_v12, %v2113_v16 }
 0x309   :  { %2799 = vmatpush1.msra.mxu1 %v2669_v55  ;;  %v2687_v55 = vld [vmem:[#allocation12 + $0x350] sm:$0xff] }
 0x30a   :  { %2800 = vmatprep.subr.mxu1 %v2668_v20 }
 0x30b   :  { %2801 = vmatpush1.msra.mxu1 %v2667_v21  ;;  %v2686_v21 = vld [vmem:[#allocation12 + $0x348] sm:$0xff] }
 0x30c   :  { %2802 = vmatprep.subr.mxu1 %v2666_v57  ;;  %v2186_v57 = vadd.f32 %v2185_v44, %v2115_v17 }
 0x30d   :  { %2803 = vmatpush1.msra.mxu1 %v2665_v23 }
 0x30e   :  { %2804 = vmatprep.subr.mxu1 %v2664_v24  ;;  %v2685_v24 = vld [vmem:[#allocation12 + $0x340] sm:$0xff] }
 0x30f   :  { %2805 = vmatpush1.msra.mxu1 %v2663_v25  ;;  %v3817_v25 = vld [vmem:[#allocation10] sm:$0xf] }
 0x310   :  { %2806 = vmatprep.subr.mxu1 %v2662_v26 }
 0x311   :  { %2807 = vmatpush1.msra.mxu1 %v2661_v27  ;;  %v2684_v27 = vld [vmem:[#allocation12 + $0x338] sm:$0xff] }
 0x312   :  { %2808 = vmatprep.subr.mxu1 %v2660_v29 }
 0x313   :  { %2809 = vmatpush1.msra.mxu1 %v2659_v30 }
 0x314   :  { %2810 = vmatprep.subr.mxu1 %v2658_v31  ;;  %v2683_v31 = vld [vmem:[#allocation12 + $0x330] sm:$0xff] }
 0x315   :  { %2811 = vmatpush1.msra.mxu1 %v2657_v41  ;;  %v2564_v41 = vrot.slane %v3817_v25, %v3717_v28 }
 0x316   :  { %2812 = vmatprep.subr.mxu1 %v2656_v1  ;;  %v2682_v1 = vld [vmem:[#allocation12 + $0x328] sm:$0xff] }
 0x317   :  { %2813 = vmatpush1.msra.mxu1 %v2655_v32  ;;  %v2560_v32 = vrot.slane %v3817_v25, %v3739_v19 }
 0x318   :  { %2814 = vmatprep.subr.mxu1 %v2654_v33 }
 0x319   :  { %2815 = vmatpush1.msra.mxu1 %v2653_v34  ;;  %v2681_v34 = vld [vmem:[#allocation12 + $0x320] sm:$0xff] }
 0x31a   :  { %2816 = vmatprep.subr.mxu1 %v2652_v36 }
 0x31b   :  { %2817 = vmatpush1.msra.mxu1 %v2651_v38  ;;  %v2680_v38 = vld [vmem:[#allocation12 + $0x318] sm:$0xff] }
 0x31c   :  { %2818 = vmatprep.subr.mxu1 %v2650_v37  ;;  %v2679_v37 = vld [vmem:[#allocation12 + $0x310] sm:$0xff] }
 0x31d   :  { %2819 = vmatpush1.msra.mxu1 %v2649_v39  ;;  %v2678_v39 = vld [vmem:[#allocation12 + $0x308] sm:$0xff] }
 0x31e   :  { %2820 = vmatprep.subr.mxu1 %v2648_v43 }
 0x31f   :  { %2821 = vmatpush1.msra.mxu1 %v2647_v45  ;;  %v2677_v45 = vld [vmem:[#allocation12 + $0x300] sm:$0xff] }
 0x320   :  { %2822 = vmatprep.subr.mxu1 %v2646_v52 }
 0x321   :  { %2823 = vmatpush1.msra.mxu1 %v2645_v47 }
 0x322   :  { %2824 = vmatprep.subr.mxu1 %v2708_v48  ;;  %v2914_v48 = vld [vmem:[#allocation16 + $0xf8] sm:$0xff] }
 0x323   :  { %2825 = vmatpush2.msra.mxu1 %v2707_v49  ;;  %v2898_v49 = vld [vmem:[#allocation16 + $0x78] sm:$0xff]  ;;  %3118 = vmatprep.subr.mxu0 %v2914_v48  ;;  %v3015_v48 = vld [vmem:[#allocation21 + $0x60] sm:$0xff] }
 0x324   :  { %2826 = vmatprep.subr.mxu1 %v2706_v50  ;;  %v2913_v50 = vld [vmem:[#allocation16 + $0xf0] sm:$0xff] }
 0x325   :  { %2827 = vmatpush2.msra.mxu1 %v2705_v51  ;;  %v2897_v51 = vld [vmem:[#allocation16 + $0x70] sm:$0xff] }
 0x326   :  { %2828 = vmatprep.subr.mxu1 %v2704_v42  ;;  %v2912_v42 = vld [vmem:[#allocation16 + $0xe8] sm:$0xff] }
 0x327   :  { %2829 = vmatpush2.msra.mxu1 %v2703_v54  ;;  %v2896_v54 = vld [vmem:[#allocation16 + $0x68] sm:$0xff] }
 0x328   :  { %2830 = vmatprep.subr.mxu1 %v2702_v56  ;;  %v2911_v56 = vld [vmem:[#allocation16 + $0xe0] sm:$0xff] }
 0x329   :  { %2831 = vmatpush2.msra.mxu1 %v2701_v8  ;;  %v2895_v8 = vld [vmem:[#allocation16 + $0x60] sm:$0xff] }
 0x32a   :  { %2832 = vmatprep.subr.mxu1 %v2700_v4  ;;  %v2910_v4 = vld [vmem:[#allocation16 + $0xd8] sm:$0xff] }
 0x32b   :  { %2833 = vmatpush2.msra.mxu1 %v2699_v46  ;;  %v2894_v46 = vld [vmem:[#allocation16 + $0x58] sm:$0xff] }
 0x32c   :  { %2834 = vmatprep.subr.mxu1 %v2698_v59  ;;  %v2909_v59 = vld [vmem:[#allocation16 + $0xd0] sm:$0xff] }
 0x32d   :  { %2835 = vmatpush2.msra.mxu1 %v2697_v60  ;;  %v2893_v60 = vld [vmem:[#allocation16 + $0x50] sm:$0xff] }
 0x32e   :  { %2836 = vmatprep.subr.mxu1 %v2696_v22  ;;  %v2908_v22 = vld [vmem:[#allocation16 + $0xc8] sm:$0xff] }
 0x32f   :  { %2837 = vmatpush2.msra.mxu1 %v2695_v61  ;;  %v2892_v61 = vld [vmem:[#allocation16 + $0x48] sm:$0xff] }
 0x330   :  { %2838 = vmatprep.subr.mxu1 %v2694_v63  ;;  %v2907_v63 = vld [vmem:[#allocation16 + $0xc0] sm:$0xff] }
 0x331   :  { %2839 = vmatpush2.msra.mxu1 %v2693_v11  ;;  %v2891_v11 = vld [vmem:[#allocation16 + $0x40] sm:$0xff] }
 0x332   :  { %2840 = vmatprep.subr.mxu1 %v2692_v15  ;;  %v2906_v15 = vld [vmem:[#allocation16 + $0xb8] sm:$0xff] }
 0x333   :  { %2841 = vmatpush2.msra.mxu1 %v2691_v3  ;;  %v2905_v3 = vld [vmem:[#allocation16 + $0xb0] sm:$0xff] }
 0x334   :  { %2842 = vmatprep.subr.mxu1 %v2690_v2  ;;  %v2889_v2 = vld [vmem:[#allocation16 + $0x30] sm:$0xff] }
 0x335   :  { %2843 = vmatpush2.msra.mxu1 %v2689_v5  ;;  %v2904_v5 = vld [vmem:[#allocation16 + $0xa8] sm:$0xff] }
 0x336   :  { %2844 = vmatprep.subr.mxu1 %v2688_v6  ;;  %v1966_v6 = vrot.slane %v3811_v0, %v3746_v53  ;;  %v2568_v0 = vrot.slane %v3817_v25, %v3746_v53  ;;  %v2885_v53 = vld [vmem:[#allocation16 + $0x10] sm:$0xff] }
 0x337   :  { %2845 = vmatpush2.msra.mxu1 %v2687_v55 }
 0x338   :  { %2846 = vmatprep.subr.mxu1 %v2686_v21 }
 0x339   :  { %2847 = vmatpush2.msra.mxu1 %v2685_v24 }
 0x33a   :  { %2848 = vmatprep.subr.mxu1 %v2684_v27 }
 0x33b   :  { %2849 = vmatpush2.msra.mxu1 %v2683_v31 }
 0x33c   :  { %2850 = vmatprep.subr.mxu1 %v2682_v1  ;;  %v2888_v1 = vld [vmem:[#allocation16 + $0x28] sm:$0xff] }
 0x33d   :  { %2851 = vmatpush2.msra.mxu1 %v2681_v34  ;;  %v2902_v34 = vld [vmem:[#allocation16 + $0x98] sm:$0xff] }
 0x33e   :  { %2852 = vmatprep.subr.mxu1 %v2680_v38  ;;  %v2325_v40 = vpop.f32.mrf.mxu0  ;;  %v2884_v38 = vld [vmem:[#allocation16 + $0x8] sm:$0xff] }
 0x33f   :  { %2853 = vmatpush2.msra.mxu1 %v2679_v37  ;;  %v2326_v12 = vadd.f32 %v2325_v40, %v1966_v6  ;;  %v2899_v37 = vld [vmem:[#allocation16 + $0x80] sm:$0xff] }
 0x340   :  { %2854 = vmatprep.subr.mxu1 %v2678_v39  ;;  %v2327_v10 = vpop.f32.mrf.mxu0  ;;  %v2883_v39 = vld [vmem:[#allocation16] sm:$0xff] }
 0x341   :  { %v2254_v20 = vpop.f32.mrf.mxu1  ;;  %2855 = vmatpush2.msra.mxu1 %v2677_v45  ;;  %v2328_v35 = vadd.f32 %v2327_v10, %v1970_v9  ;;  %v3556_v45 = vmov 0.0  }
 0x342   :  { %v2255_v23 = vadd.f32 %v2254_v20, %v2184_v18  ;;  %3170 = vmatprep.subr.mxu1 %v3556_v45 }
 0x343   :  { %v2256_v26 = vpop.f32.mrf.mxu1 }
 0x344   :  { %vm2543_vm8 = vcmp.ge.f32.partialorder %v2255_v23, 0.0  ;;  %v2547_v29 = vmul.f32 0.2, %v2255_v23  ;;  %v2257_v30 = vadd.f32 %v2256_v26, %v2186_v57  ;;  %v2572_v26 = vrot.slane %v3817_v25, %v3749_v58  ;;  %v2886_v58 = vld [vmem:[#allocation16 + $0x18] sm:$0xff]  ;;  %v2900_v25 = vld [vmem:[#allocation16 + $0x88] sm:$0xff] }
 0x346   :  { %vm2544_vm9 = vcmp.ge.f32.partialorder %v2257_v30, 0.0  ;;  %v2548_v33 = vmul.f32 0.2, %v2257_v30  ;;  %v2551_v36 = vsel %vm2543_vm8, %v2255_v23, %v2547_v29 }
 0x347   :  { %v2577_v47 = vadd.f32 %v2560_v32, %v2551_v36  ;;  %v2903_v32 = vld [vmem:[#allocation16 + $0xa0] sm:$0xff]  ;;  %v2901_v36 = vld [vmem:[#allocation16 + $0x90] sm:$0xff] }
 0x348   :  { %v2552_v43 = vsel %vm2544_vm9, %v2257_v30, %v2548_v33  ;;  %v2887_v33 = vld [vmem:[#allocation16 + $0x20] sm:$0xff] }
 0x349   :  { %v2578_v52 = vadd.f32 %v2564_v41, %v2552_v43  ;;  %v3018_v43 = vld [vmem:[#allocation21 + $0x78] sm:$0xff] }
 0x34b   :  { %2785 = vmatprep.mubr.f32.mxu0 %v2578_v52  ;;  %v3017_v52 = vld [vmem:[#allocation21 + $0x70] sm:$0xff] }
 0x34c   :  { %2786 = vmatmul.mubr.f32.vlgmr.msra.gmra.mxu0 %v2577_v47  ;;  %v3016_v47 = vld [vmem:[#allocation21 + $0x68] sm:$0xff] }
 0x34d   :  { %3119 = vmatpush3.msra.mxu0 %v2898_v49  ;;  %v3014_v49 = vld [vmem:[#allocation21 + $0x58] sm:$0xff] }
 0x34e   :  { %3120 = vmatprep.subr.mxu0 %v2913_v50  ;;  %v3013_v50 = vld [vmem:[#allocation21 + $0x50] sm:$0xff] }
 0x34f   :  { %3121 = vmatpush3.msra.mxu0 %v2897_v51  ;;  %v3012_v51 = vld [vmem:[#allocation21 + $0x48] sm:$0xff] }
 0x350   :  { %3122 = vmatprep.subr.mxu0 %v2912_v42  ;;  %v3011_v42 = vld [vmem:[#allocation21 + $0x40] sm:$0xff] }
 0x351   :  { %3123 = vmatpush3.msra.mxu0 %v2896_v54  ;;  %v3010_v54 = vld [vmem:[#allocation21 + $0x38] sm:$0xff] }
 0x352   :  { %3124 = vmatprep.subr.mxu0 %v2911_v56  ;;  %v3009_v56 = vld [vmem:[#allocation21 + $0x30] sm:$0xff] }
 0x353   :  { %3125 = vmatpush3.msra.mxu0 %v2895_v8  ;;  %v2709_v8 = vld [vmem:[#allocation13] sm:$0x3] }
 0x354   :  { %3126 = vmatprep.subr.mxu0 %v2910_v4 }
 0x355   :  { %3127 = vmatpush3.msra.mxu0 %v2894_v46  ;;  %v2714_v46 = vrot.slane %v2709_v8, %v3739_v19 }
 0x356   :  { %3128 = vmatprep.subr.mxu0 %v2909_v59  ;;  %v2718_v59 = vrot.slane %v2709_v8, %v3717_v28 }
 0x357   :  { %3129 = vmatpush3.msra.mxu0 %v2893_v60 }
 0x358   :  { %3130 = vmatprep.subr.mxu0 %v2908_v22 }
 0x359   :  { %3131 = vmatpush3.msra.mxu0 %v2892_v61 }
 0x35a   :  { %3132 = vmatprep.subr.mxu0 %v2907_v63 }
 0x35b   :  { %3133 = vmatpush3.msra.mxu0 %v2891_v11 }
 0x35c   :  { %3134 = vmatprep.subr.mxu0 %v2906_v15  ;;  %v2869_v15 = vld [vmem:[#allocation15] sm:$0x3] }
 0x35d   :  { %3135 = vmatpush3.msra.mxu0 %v2890_v62  ;;  %v2874_v40 = vrot.slane %v2869_v15, %v3739_v19  ;;  %v3004_v19 = vld [vmem:[#allocation21 + $0x8] sm:$0xff] }
 0x35e   :  { %3136 = vmatprep.subr.mxu0 %v2905_v3 }
 0x35f   :  { %3137 = vmatpush3.msra.mxu0 %v2889_v2 }
 0x360   :  { %3138 = vmatprep.subr.mxu0 %v2904_v5  ;;  %v2878_v5 = vrot.slane %v2869_v15, %v3717_v28  ;;  %v3005_v28 = vld [vmem:[#allocation21 + $0x10] sm:$0xff] }
 0x361   :  { %3139 = vmatpush3.msra.mxu0 %v2888_v1 }
 0x362   :  { %3140 = vmatprep.subr.mxu0 %v2903_v32 }
 0x363   :  { %3141 = vmatpush3.msra.mxu0 %v2887_v33 }
 0x364   :  { %3142 = vmatprep.subr.mxu0 %v2902_v34 }
 0x365   :  { %3143 = vmatpush3.msra.mxu0 %v2886_v58 }
 0x366   :  { %3144 = vmatprep.subr.mxu0 %v2901_v36 }
 0x367   :  { %3145 = vmatpush3.msra.mxu0 %v2885_v53 }
 0x368   :  { %3146 = vmatprep.subr.mxu0 %v2900_v25 }
 0x369   :  { %3147 = vmatpush3.msra.mxu0 %v2884_v38 }
 0x36a   :  { %3148 = vmatprep.subr.mxu0 %v2899_v37 }
 0x36b   :  { %3149 = vmatpush3.msra.mxu0 %v2883_v39 }
 0x37f   :  { %v2467_v16 = vpop.f32.mrf.mxu0 }
 0x381   :  { %v2396_v7 = vpop.f32.mrf.mxu1  ;;  %v2469_v18 = vpop.f32.mrf.mxu0 }
 0x382   :  { %v2397_v14 = vadd.f32 %v2396_v7, %v2326_v12 }
 0x383   :  { %v2398_v13 = vpop.f32.mrf.mxu1 }
 0x384   :  { %v2399_v44 = vadd.f32 %v2398_v13, %v2328_v35  ;;  %v2468_v17 = vadd.f32 %v2467_v16, %v2397_v14  ;;  %v3008_v13 = vld [vmem:[#allocation21 + $0x28] sm:$0xff]  ;;  %v3007_v35 = vld [vmem:[#allocation21 + $0x20] sm:$0xff]  ;;  %v3006_v14 = vld [vmem:[#allocation21 + $0x18] sm:$0xff] }
 0x385   :  { %v3003_v16 = vld [vmem:[#allocation21] sm:$0xff] }
 0x386   :  { %v2470_v20 = vadd.f32 %v2469_v18, %v2399_v44 }
 0x3c1   :  { %v2538_v55 = vpop.f32.mrf.mxu1 }
 0x3c2   :  { %v2539_v21 = vadd.f32 %v2538_v55, %v2468_v17  ;;  %v3115_v17 = vld [vmem:[#allocation18] ss:$0 sm:$0xff] }
 0x3c3   :  { %v2540_v57 = vpop.f32.mrf.mxu1 }
 0x3c4   :  { %vm2545_vm10 = vcmp.ge.f32.partialorder %v2539_v21, 0.0  ;;  %v2549_v23 = vmul.f32 0.2, %v2539_v21  ;;  %v2541_v24 = vadd.f32 %v2540_v57, %v2470_v20  ;;  %v3116_v57 = vld [vmem:[#allocation19] ss:$0 sm:$0xff] }
 0x3c6   :  { %vm2546_vm11 = vcmp.ge.f32.partialorder %v2541_v24, 0.0  ;;  %v2550_v27 = vmul.f32 0.2, %v2541_v24  ;;  %v2553_v29 = vsel %vm2545_vm10, %v2539_v21, %v2549_v23 }
 0x3c7   :  { %v2579_v41 = vadd.f32 %v2568_v0, %v2553_v29 }
 0x3c8   :  { %v2554_v30 = vsel %vm2546_vm11, %v2541_v24, %v2550_v27 }
 0x3c9   :  { %v2580_v31 = vadd.f32 %v2572_v26, %v2554_v30  ;;  %v3117_v26 = vld [vmem:[#allocation22] ss:$0 sm:$0xff] }
 0x3cb   :  { %2856 = vmatprep.mubr.f32.mxu1 %v2580_v31 }
 0x3cc   :  { %2857 = vmatmul.mubr.f32.vlgmr.msra.gmra.mxu1 %v2579_v41 }
 0x3cd   :  { %3171 = vmatpush3.msra.mxu1 %v3018_v43  ;;  %3202 = vmatprep.mubr.msk.f32.mxu1 %vm3557_vm14, %v3556_v45 }
 0x3ce   :  { %3172 = vmatprep.subr.mxu1 %v3556_v45 }
 0x3cf   :  { %3173 = vmatpush3.msra.mxu1 %v3017_v52 }
 0x3d0   :  { %3174 = vmatprep.subr.mxu1 %v3556_v45 }
 0x3d1   :  { %3175 = vmatpush3.msra.mxu1 %v3016_v47 }
 0x3d2   :  { %3176 = vmatprep.subr.mxu1 %v3556_v45 }
 0x3d3   :  { %3177 = vmatpush3.msra.mxu1 %v3015_v48 }
 0x3d4   :  { %3178 = vmatprep.subr.mxu1 %v3556_v45 }
 0x3d5   :  { %3179 = vmatpush3.msra.mxu1 %v3014_v49 }
 0x3d6   :  { %3180 = vmatprep.subr.mxu1 %v3556_v45 }
 0x3d7   :  { %3181 = vmatpush3.msra.mxu1 %v3013_v50 }
 0x3d8   :  { %3182 = vmatprep.subr.mxu1 %v3556_v45 }
 0x3d9   :  { %3183 = vmatpush3.msra.mxu1 %v3012_v51 }
 0x3da   :  { %3184 = vmatprep.subr.mxu1 %v3556_v45 }
 0x3db   :  { %3185 = vmatpush3.msra.mxu1 %v3011_v42 }
 0x3dc   :  { %3186 = vmatprep.subr.mxu1 %v3556_v45 }
 0x3dd   :  { %3187 = vmatpush3.msra.mxu1 %v3010_v54 }
 0x3de   :  { %3188 = vmatprep.subr.mxu1 %v3556_v45 }
 0x3df   :  { %3189 = vmatpush3.msra.mxu1 %v3009_v56 }
 0x3e0   :  { %3190 = vmatprep.subr.mxu1 %v3556_v45 }
 0x3e1   :  { %3191 = vmatpush3.msra.mxu1 %v3008_v13 }
 0x3e2   :  { %3192 = vmatprep.subr.mxu1 %v3556_v45 }
 0x3e3   :  { %3193 = vmatpush3.msra.mxu1 %v3007_v35 }
 0x3e4   :  { %3194 = vmatprep.subr.mxu1 %v3556_v45 }
 0x3e5   :  { %3195 = vmatpush3.msra.mxu1 %v3006_v14 }
 0x3e6   :  { %3196 = vmatprep.subr.mxu1 %v3556_v45 }
 0x3e7   :  { %3197 = vmatpush3.msra.mxu1 %v3005_v28 }
 0x3e8   :  { %3198 = vmatprep.subr.mxu1 %v3556_v45 }
 0x3e9   :  { %3199 = vmatpush3.msra.mxu1 %v3004_v19 }
 0x3ea   :  { %3200 = vmatprep.subr.mxu1 %v3556_v45 }
 0x3eb   :  { %3201 = vmatpush3.msra.mxu1 %v3003_v16 }
 0x40c   :  { %v2787_v4 = vpop.f32.mrf.mxu0 }
 0x40d   :  { %v2788_v22 = vadd.f32 %v2787_v4, %v2714_v46 }
 0x40e   :  { %v2789_v60 = vpop.f32.mrf.mxu0 }
 0x40f   :  { %v2790_v63 = vadd.f32 %v2789_v60, %v2718_v59 }
 0x48c   :  { %v2858_v61 = vpop.f32.mrf.mxu1 }
 0x48d   :  { %v2859_v11 = vadd.f32 %v2858_v61, %v2788_v22 }
 0x48e   :  { %v2860_v62 = vpop.f32.mrf.mxu1 }
 0x48f   :  { %vm2863_vm12 = vcmp.ge.f32.partialorder %v2859_v11, 0.0  ;;  %v2865_v3 = vmul.f32 0.2, %v2859_v11  ;;  %v2861_v2 = vadd.f32 %v2860_v62, %v2790_v63 }
 0x491   :  { %vm2864_vm13 = vcmp.ge.f32.partialorder %v2861_v2, 0.0  ;;  %v2866_v6 = vmul.f32 0.2, %v2861_v2  ;;  %v2867_v7 = vsel %vm2863_vm12, %v2859_v11, %v2865_v3 }
 0x492   :  { %v2881_v12 = vadd.f32 %v2874_v40, %v2867_v7 }
 0x493   :  { %v2868_v9 = vsel %vm2864_vm13, %v2861_v2, %v2866_v6 }
 0x494   :  { %v2882_v10 = vadd.f32 %v2878_v5, %v2868_v9 }
 0x496   :  { %2986 = vmatprep.mubr.f32.mxu0 %v2882_v10 }
 0x497   :  { %2987 = vmatmul.mubr.f32.vlgmr.msra.gmra.mxu0 %v2881_v12 }
 0x557   :  { %v3150_v44 = vpop.f32.mrf.mxu0 }
 0x559   :  { %v3151_v18 = vpop.f32.mrf.mxu0 }
 0x55a   :  { %v3152_v55 = vadd.f32 %v3151_v18, %v3150_v44 }
 0x55c   :  { %v2989_v20 = vadd.f32 %v3152_v55, %v3115_v17 }
 0x55e   :  { %vm2992_vm15 = vcmp.ge.f32.partialorder %v2989_v20, 0.0  ;;  %v2993_v21 = vmul.f32 0.2, %v2989_v20 }
 0x560   :  { %v2994_v23 = vsel %vm2992_vm15, %v2989_v20, %v2993_v21 }
 0x561   :  { %v3002_v24 = vadd.f32 %v3116_v57, %v2994_v23 }
 0x563   :  { %3203 = vmatmul.mubr.f32.vlgmr.msra.gmra.mxu1 %v3002_v24 }
 0x623   :  { %v3092_v0 = vpop.f32.mrf.mxu1 }
 0x624   :  { %v3093_v27 = vadd.f32 %v3117_v26, %v3092_v0 }
 0x625   :  { %v3204_v29 = vpop.f32.mrf.mxu1 }
 0x626   :  { %v3096_v30 = vsub.f32 0.0, %v3093_v27 }
 0x628   :  { %v3097_v31 = vmul.f32 1.442695, %v3096_v30 }
 0x62a   :  { %3231 = vpow2.f32 %v3097_v31 }
 0x637   :  { %v3232_v41 = vpop.eup %3231 }
 0x638   :  { %v3099_v1 = vadd.f32 1.0, %v3232_v41 }
 0x63a   :  { %3233 = vrcp.f32 %v3099_v1 }
 0x647   :  { %v3234_v32 = vpop.eup %3233 }
 0x648   :  { %3102 = vst [vmem:[%s3870_s15] sm:$0x3] %v3234_v32 }
 0x649   :  { %3107 = vsyncpa [#allocation3], 1 }
 0x64a   :  { %3108 = vsyncpa [#allocation5], 1 }
 0x64b   :  { %3109 = vsyncpa [#allocation8], 1 }
 0x64c   :  { %3110 = vsyncpa [#allocation11], 1 }
 0x64d   :  { %3111 = vsyncpa [#allocation14], 1 }
 0x64e   :  { %3112 = vsyncpa [#allocation17], 1 }
 0x64f   :  { %3113 = vsyncpa [#allocation20], 1 }
 0x650   :  { %3114 = vsyncpa [#allocation23], 1 }

</bundles_post_ra>
